<compile_context>
chip_gen: v7x
topology: tpu7x:2x2x1
jax: 0.10.0
libtpu: 0.0.40
codegen_flags: <defaults>
</compile_context>

<pallas_src>
import functools
import math

import jax
import jax.numpy as jnp
from jax.experimental import pallas as pl
from jax.experimental.pallas import tpu as pltpu


def _leaky(v, slope):
    return jnp.where(v >= 0, v, slope * v)


# ----------------------------------------------------------------------------
# Single fused kernel: node encoder -> gnn_layers x (GIN1, GIN2) -> MLP head
# ----------------------------------------------------------------------------
def _fused_loop_gnn_kernel(
    # graph inputs
    node_attr_ref, edge1_ref, edge2_ref, adj_ref,
    # node encoder
    w_ne_ref, b_ne_ref,
    # GIN layer 1 (edge/node processor weights pre-split by input source)
    g1_we_e_ref, g1_we_rx_ref, g1_we_ra_ref, g1_we_sx_ref, g1_we_sa_ref,
    g1_be_ref, g1_wn_x_ref, g1_wn_a_ref, g1_wn_agg_ref, g1_bn_ref,
    # GIN layer 2
    g2_we_e_ref, g2_we_rx_ref, g2_we_ra_ref, g2_we_sx_ref, g2_we_sa_ref,
    g2_be_ref, g2_wn_x_ref, g2_wn_a_ref, g2_wn_agg_ref, g2_bn_ref,
    # MLP head
    w1_ref, b1_ref, w2_ref, b2_ref, w3_ref, b3_ref,
    # output
    o_ref,
    *, gnn_layers):
    f32 = jnp.float32
    B, N, Da = node_attr_ref.shape
    De = edge1_ref.shape[-1]
    H = w_ne_ref.shape[-1]

    attr2d = node_attr_ref[...].reshape(B * N, Da)            # (B*N, Da)
    adj_m = adj_ref[...].reshape(B, N, N, 1)                  # (B, N, N, 1)

    # ---- node encoder: x = LeakyReLU(node_attr @ W + b, 0.1) ---------------
    x = _leaky(jnp.dot(attr2d, w_ne_ref[...], preferred_element_type=f32)
               + b_ne_ref[...], 0.1)                          # (B*N, H)

    # ---- loop-invariant GIN contributions (edge_attr / node_attr terms) ----
    def gil_consts(edge_ref, we_e, we_ra, we_sa, wn_a, b_e):
        e_base = jnp.dot(edge_ref[...].reshape(B * N * N, De), we_e[...],
                         preferred_element_type=f32) + b_e[...]
        e_base = e_base.reshape(B, N, N, H)
        r_a = jnp.dot(attr2d, we_ra[...], preferred_element_type=f32)  # recv
        s_a = jnp.dot(attr2d, we_sa[...], preferred_element_type=f32)  # send
        n_a = jnp.dot(attr2d, wn_a[...], preferred_element_type=f32)   # node
        return e_base, r_a, s_a, n_a

    c1 = gil_consts(edge1_ref, g1_we_e_ref, g1_we_ra_ref, g1_we_sa_ref,
                    g1_wn_a_ref, g1_be_ref)
    c2 = gil_consts(edge2_ref, g2_we_e_ref, g2_we_ra_ref, g2_we_sa_ref,
                    g2_wn_a_ref, g2_be_ref)

    # ---- one GraphInteractionLayer + the GIN-level LeakyReLU ---------------
    def gil(x_in, consts, we_rx, we_sx, wn_x, wn_agg, b_n):
        e_base, r_a, s_a, n_a = consts
        r = jnp.dot(x_in, we_rx[...], preferred_element_type=f32) + r_a
        s = jnp.dot(x_in, we_sx[...], preferred_element_type=f32) + s_a
        # receiver varies along axis 1, sender along axis 2 (matches repeat()s)
        e = e_base + r.reshape(B, N, 1, H) + s.reshape(B, 1, N, H)
        e = _leaky(e, 0.01)                                   # edge_code
        agg = jnp.sum(e * adj_m, axis=2).reshape(B * N, H)    # sum over senders
        y = (jnp.dot(x_in, wn_x[...], preferred_element_type=f32) + n_a
             + jnp.dot(agg, wn_agg[...], preferred_element_type=f32)
             + b_n[...])
        return _leaky(y, 0.01)                                # GIN outer leaky

    # ---- statically unrolled gnn_layers loop --------------------------------
    # TODO(synk): dropout omitted (dropout=0 / inference => identity)
    x1 = x
    for _ in range(gnn_layers):
        x1 = gil(x, c1, g1_we_rx_ref, g1_we_sx_ref, g1_wn_x_ref,
                 g1_wn_agg_ref, g1_bn_ref)
        x = gil(x1, c2, g2_we_rx_ref, g2_we_sx_ref, g2_wn_x_ref,
                g2_wn_agg_ref, g2_bn_ref)

    # ---- head: gnn_code = cat(x1/x of nodes 0..2) realised as split matmuls -
    # gnn_code layout per batch = [x1_n0 | x_n0 | x1_n1 | x_n1 | x1_n2 | x_n2]
    x1_b = x1.reshape(B, N, H)
    x_b = x.reshape(B, N, H)
    w1 = w1_ref[...]                                          # (6H, 128)
    h = b1_ref[...]                                           # (1, 128) bcast
    for k in range(3):
        h = h + jnp.dot(x1_b[:, k, :], w1[(2 * k) * H:(2 * k + 1) * H, :],
                        preferred_element_type=f32)
        h = h + jnp.dot(x_b[:, k, :], w1[(2 * k + 1) * H:(2 * k + 2) * H, :],
                        preferred_element_type=f32)
    h = jnp.tanh(h)
    h = jnp.tanh(jnp.dot(h, w2_ref[...], preferred_element_type=f32)
                 + b2_ref[...])
    z = jnp.dot(h, w3_ref[...], preferred_element_type=f32) + b3_ref[...]
    o_ref[...] = pl.reciprocal(1.0 + jnp.exp(-z), approx=True)   # sigmoid


# ----------------------------------------------------------------------------
# Forward wrapper: a single pallas_call, everything resident in VMEM
# ----------------------------------------------------------------------------
def loop_gnn_forward(params, node_attr, edge_attr1, edge_attr2, adj,
                     gnn_layers):
    assert gnn_layers >= 1, "reference model requires gnn_layers >= 1"
    B = node_attr.shape[0]
    g1, g2 = params["gin1"], params["gin2"]
    w_ne, b_ne = params["node_enc"]
    w1, b1 = params["lin1"]
    w2, b2 = params["lin2"]
    w3, b3 = params["out"]
    Dout = w3.shape[1]

    operands = (
        node_attr, edge_attr1, edge_attr2, adj,
        w_ne, b_ne,
        g1["we_e"], g1["we_rx"], g1["we_ra"], g1["we_sx"], g1["we_sa"],
        g1["b_e"], g1["wn_x"], g1["wn_a"], g1["wn_agg"], g1["b_n"],
        g2["we_e"], g2["we_rx"], g2["we_ra"], g2["we_sx"], g2["we_sa"],
        g2["b_e"], g2["wn_x"], g2["wn_a"], g2["wn_agg"], g2["b_n"],
        w1, b1, w2, b2, w3, b3,
    )
    vmem_spec = pl.BlockSpec(memory_space=pltpu.MemorySpace.VMEM)
    return pl.pallas_call(
        functools.partial(_fused_loop_gnn_kernel, gnn_layers=gnn_layers),
        out_shape=jax.ShapeDtypeStruct((B, Dout), jnp.float32),
        in_specs=[vmem_spec] * len(operands),
        out_specs=vmem_spec,
    )(*operands)


# ----------------------------------------------------------------------------
# Parameter construction (deterministic, PyTorch-Linear-style uniform init),
# with weights pre-split so the kernel never needs to concatenate inputs.
# ----------------------------------------------------------------------------
def init_linear(key, fan_in, fan_out):
    kw, kb = jax.random.split(key)
    bound = 1.0 / math.sqrt(fan_in)
    w = jax.random.uniform(kw, (fan_in, fan_out), jnp.float32, -bound, bound)
    b = jax.random.uniform(kb, (1, fan_out), jnp.float32, -bound, bound)
    return w, b


def init_gin_layer(key, nhid, len_node_attr, len_edge_attr):
    # GraphInteractionLayer(n_node_info = nhid + len_node_attr,
    #                       n_edge_attr = len_edge_attr, n_edge_code = nhid)
    n_node_info = nhid + len_node_attr
    De, H, Da = len_edge_attr, nhid, len_node_attr
    k1, k2 = jax.random.split(key)
    w_e, b_e = init_linear(k1, De + 2 * n_node_info, H)
    w_n, b_n = init_linear(k2, n_node_info + H, n_node_info - 4)
    return {
        # edge_processor input = [edge_attr | recv(x|attr) | send(x|attr)]
        "we_e": w_e[:De],
        "we_rx": w_e[De:De + H],
        "we_ra": w_e[De + H:De + H + Da],
        "we_sx": w_e[De + n_node_info:De + n_node_info + H],
        "we_sa": w_e[De + n_node_info + H:],
        "b_e": b_e,
        # node_processor input = [x | attr | edge_agg]
        "wn_x": w_n[:H],
        "wn_a": w_n[H:H + Da],
        "wn_agg": w_n[n_node_info:],
        "b_n": b_n,
    }


def init_loop_gnn(key, nhid, len_node_attr, len_edge_attr, output_size):
    assert len_node_attr == 4, (
        "model consistency requires len_node_attr == 4 "
        "(node_processor out = n_node_info - 4 must equal nhid)")
    keys = jax.random.split(key, 6)
    return {
        "gin1": init_gin_layer(keys[0], nhid, len_node_attr, len_edge_attr),
        "gin2": init_gin_layer(keys[1], nhid, len_node_attr, len_edge_attr),
        "node_enc": init_linear(keys[2], len_node_attr, nhid),
        "lin1": init_linear(keys[3], 6 * nhid, 128),
        "lin2": init_linear(keys[4], 128, 64),
        "out": init_linear(keys[5], 64, output_size),
    }


# ----------------------------------------------------------------------------
if __name__ == "__main__":
    B = 2
    N = 8
    NHID = 32
    LEN_NODE_ATTR = 4      # required: node_processor out = n_node_info - 4
    LEN_EDGE_ATTR = 6
    OUTPUT_SIZE = 3
    GNN_LAYERS = 2

    key = jax.random.PRNGKey(0)
    kp, k1, k2, k3, k4 = jax.random.split(key, 5)

    params = init_loop_gnn(kp, NHID, LEN_NODE_ATTR, LEN_EDGE_ATTR, OUTPUT_SIZE)

    node_attr = jax.random.normal(k1, (B, N, LEN_NODE_ATTR), jnp.float32)
    edge_attr1 = jax.random.normal(k2, (B, N, N, LEN_EDGE_ATTR), jnp.float32)
    edge_attr2 = jax.random.normal(k3, (B, N, N, LEN_EDGE_ATTR), jnp.float32)
    adj = (jax.random.uniform(k4, (B, N, N)) > 0.5).astype(jnp.float32)

    pred = loop_gnn_forward(params, node_attr, edge_attr1, edge_attr2, adj,
                            GNN_LAYERS)
    pred = jax.block_until_ready(pred)
    assert pred.shape == (B, OUTPUT_SIZE)
    assert bool(jnp.all(jnp.isfinite(pred)))
    assert bool(jnp.all((pred >= 0.0) & (pred <= 1.0)))
    print("KERNEL_OK")
</pallas_src>

<mosaic_0001>
module attributes {stable_mosaic.version = 11 : i64} {
  func.func @_fused_loop_gnn_kernel(%arg0: memref<2x8x4xf32, #tpu.memory_space<vmem>>, %arg1: memref<2x8x8x6xf32, #tpu.memory_space<vmem>>, %arg2: memref<2x8x8x6xf32, #tpu.memory_space<vmem>>, %arg3: memref<2x8x8xf32, #tpu.memory_space<vmem>>, %arg4: memref<4x32xf32, #tpu.memory_space<vmem>>, %arg5: memref<1x32xf32, #tpu.memory_space<vmem>>, %arg6: memref<6x32xf32, #tpu.memory_space<vmem>>, %arg7: memref<32x32xf32, #tpu.memory_space<vmem>>, %arg8: memref<4x32xf32, #tpu.memory_space<vmem>>, %arg9: memref<32x32xf32, #tpu.memory_space<vmem>>, %arg10: memref<4x32xf32, #tpu.memory_space<vmem>>, %arg11: memref<1x32xf32, #tpu.memory_space<vmem>>, %arg12: memref<32x32xf32, #tpu.memory_space<vmem>>, %arg13: memref<4x32xf32, #tpu.memory_space<vmem>>, %arg14: memref<32x32xf32, #tpu.memory_space<vmem>>, %arg15: memref<1x32xf32, #tpu.memory_space<vmem>>, %arg16: memref<6x32xf32, #tpu.memory_space<vmem>>, %arg17: memref<32x32xf32, #tpu.memory_space<vmem>>, %arg18: memref<4x32xf32, #tpu.memory_space<vmem>>, %arg19: memref<32x32xf32, #tpu.memory_space<vmem>>, %arg20: memref<4x32xf32, #tpu.memory_space<vmem>>, %arg21: memref<1x32xf32, #tpu.memory_space<vmem>>, %arg22: memref<32x32xf32, #tpu.memory_space<vmem>>, %arg23: memref<4x32xf32, #tpu.memory_space<vmem>>, %arg24: memref<32x32xf32, #tpu.memory_space<vmem>>, %arg25: memref<1x32xf32, #tpu.memory_space<vmem>>, %arg26: memref<192x128xf32, #tpu.memory_space<vmem>>, %arg27: memref<1x128xf32, #tpu.memory_space<vmem>>, %arg28: memref<128x64xf32, #tpu.memory_space<vmem>>, %arg29: memref<1x64xf32, #tpu.memory_space<vmem>>, %arg30: memref<64x3xf32, #tpu.memory_space<vmem>>, %arg31: memref<1x3xf32, #tpu.memory_space<vmem>>, %arg32: memref<2x3xf32, #tpu.memory_space<vmem>>) attributes {dimension_semantics = [], scalar_prefetch = 0 : i64, scratch_operands = 0 : i64, tpu.core_type = #tpu.core_type<tc>} {
    %c0 = arith.constant 0 : index
    %c0_0 = arith.constant 0 : index
    %c0_1 = arith.constant 0 : index
    %0 = vector.load %arg0[%c0, %c0_0, %c0_1] : memref<2x8x4xf32, #tpu.memory_space<vmem>>, vector<2x8x4xf32>
    %1 = vector.shape_cast %0 : vector<2x8x4xf32> to vector<16x4xf32>
    %c0_2 = arith.constant 0 : index
    %c0_3 = arith.constant 0 : index
    %c0_4 = arith.constant 0 : index
    %2 = vector.load %arg3[%c0_2, %c0_3, %c0_4] : memref<2x8x8xf32, #tpu.memory_space<vmem>>, vector<2x8x8xf32>
    %3 = vector.shape_cast %2 : vector<2x8x8xf32> to vector<2x8x8x1xf32>
    %c0_5 = arith.constant 0 : index
    %c0_6 = arith.constant 0 : index
    %4 = vector.load %arg4[%c0_5, %c0_6] : memref<4x32xf32, #tpu.memory_space<vmem>>, vector<4x32xf32>
    %cst = arith.constant dense<0.000000e+00> : vector<16x32xf32>
    %5 = tpu.matmul %1, %4, %cst {dimension_numbers = #tpu.dot_dimension_numbers<[1], [0], [0], [1], [0, 0, 1, 1], [], []>} : vector<16x4xf32>, vector<4x32xf32>, vector<16x32xf32> -> vector<16x32xf32>
    %c0_7 = arith.constant 0 : index
    %c0_8 = arith.constant 0 : index
    %6 = vector.load %arg5[%c0_7, %c0_8] : memref<1x32xf32, #tpu.memory_space<vmem>>, vector<1x32xf32>
    %7 = vector.broadcast %6 : vector<1x32xf32> to vector<16x32xf32>
    %8 = arith.addf %5, %7 : vector<16x32xf32>
    %cst_9 = arith.constant 0.000000e+00 : f32
    %9 = vector.broadcast %cst_9 : f32 to vector<16x32xf32>
    %10 = arith.cmpf oge, %8, %9 : vector<16x32xf32>
    %cst_10 = arith.constant 1.000000e-01 : f32
    %11 = vector.broadcast %cst_10 : f32 to vector<16x32xf32>
    %12 = arith.mulf %11, %8 : vector<16x32xf32>
    %13 = arith.select %10, %8, %12 : vector<16x32xi1>, vector<16x32xf32>
    %c0_11 = arith.constant 0 : index
    %c0_12 = arith.constant 0 : index
    %c0_13 = arith.constant 0 : index
    %c0_14 = arith.constant 0 : index
    %14 = vector.load %arg1[%c0_11, %c0_12, %c0_13, %c0_14] : memref<2x8x8x6xf32, #tpu.memory_space<vmem>>, vector<2x8x8x6xf32>
    %15 = vector.shape_cast %14 : vector<2x8x8x6xf32> to vector<128x6xf32>
    %c0_15 = arith.constant 0 : index
    %c0_16 = arith.constant 0 : index
    %16 = vector.load %arg6[%c0_15, %c0_16] : memref<6x32xf32, #tpu.memory_space<vmem>>, vector<6x32xf32>
    %cst_17 = arith.constant dense<0.000000e+00> : vector<128x32xf32>
    %17 = tpu.matmul %15, %16, %cst_17 {dimension_numbers = #tpu.dot_dimension_numbers<[1], [0], [0], [1], [0, 0, 1, 1], [], []>} : vector<128x6xf32>, vector<6x32xf32>, vector<128x32xf32> -> vector<128x32xf32>
    %c0_18 = arith.constant 0 : index
    %c0_19 = arith.constant 0 : index
    %18 = vector.load %arg11[%c0_18, %c0_19] : memref<1x32xf32, #tpu.memory_space<vmem>>, vector<1x32xf32>
    %19 = vector.broadcast %18 : vector<1x32xf32> to vector<128x32xf32>
    %20 = arith.addf %17, %19 : vector<128x32xf32>
    %21 = vector.shape_cast %20 : vector<128x32xf32> to vector<2x8x8x32xf32>
    %c0_20 = arith.constant 0 : index
    %c0_21 = arith.constant 0 : index
    %22 = vector.load %arg8[%c0_20, %c0_21] : memref<4x32xf32, #tpu.memory_space<vmem>>, vector<4x32xf32>
    %cst_22 = arith.constant dense<0.000000e+00> : vector<16x32xf32>
    %23 = tpu.matmul %1, %22, %cst_22 {dimension_numbers = #tpu.dot_dimension_numbers<[1], [0], [0], [1], [0, 0, 1, 1], [], []>} : vector<16x4xf32>, vector<4x32xf32>, vector<16x32xf32> -> vector<16x32xf32>
    %c0_23 = arith.constant 0 : index
    %c0_24 = arith.constant 0 : index
    %24 = vector.load %arg10[%c0_23, %c0_24] : memref<4x32xf32, #tpu.memory_space<vmem>>, vector<4x32xf32>
    %cst_25 = arith.constant dense<0.000000e+00> : vector<16x32xf32>
    %25 = tpu.matmul %1, %24, %cst_25 {dimension_numbers = #tpu.dot_dimension_numbers<[1], [0], [0], [1], [0, 0, 1, 1], [], []>} : vector<16x4xf32>, vector<4x32xf32>, vector<16x32xf32> -> vector<16x32xf32>
    %c0_26 = arith.constant 0 : index
    %c0_27 = arith.constant 0 : index
    %26 = vector.load %arg13[%c0_26, %c0_27] : memref<4x32xf32, #tpu.memory_space<vmem>>, vector<4x32xf32>
    %cst_28 = arith.constant dense<0.000000e+00> : vector<16x32xf32>
    %27 = tpu.matmul %1, %26, %cst_28 {dimension_numbers = #tpu.dot_dimension_numbers<[1], [0], [0], [1], [0, 0, 1, 1], [], []>} : vector<16x4xf32>, vector<4x32xf32>, vector<16x32xf32> -> vector<16x32xf32>
    %c0_29 = arith.constant 0 : index
    %c0_30 = arith.constant 0 : index
    %c0_31 = arith.constant 0 : index
    %c0_32 = arith.constant 0 : index
    %28 = vector.load %arg2[%c0_29, %c0_30, %c0_31, %c0_32] : memref<2x8x8x6xf32, #tpu.memory_space<vmem>>, vector<2x8x8x6xf32>
    %29 = vector.shape_cast %28 : vector<2x8x8x6xf32> to vector<128x6xf32>
    %c0_33 = arith.constant 0 : index
    %c0_34 = arith.constant 0 : index
    %30 = vector.load %arg16[%c0_33, %c0_34] : memref<6x32xf32, #tpu.memory_space<vmem>>, vector<6x32xf32>
    %cst_35 = arith.constant dense<0.000000e+00> : vector<128x32xf32>
    %31 = tpu.matmul %29, %30, %cst_35 {dimension_numbers = #tpu.dot_dimension_numbers<[1], [0], [0], [1], [0, 0, 1, 1], [], []>} : vector<128x6xf32>, vector<6x32xf32>, vector<128x32xf32> -> vector<128x32xf32>
    %c0_36 = arith.constant 0 : index
    %c0_37 = arith.constant 0 : index
    %32 = vector.load %arg21[%c0_36, %c0_37] : memref<1x32xf32, #tpu.memory_space<vmem>>, vector<1x32xf32>
    %33 = vector.broadcast %32 : vector<1x32xf32> to vector<128x32xf32>
    %34 = arith.addf %31, %33 : vector<128x32xf32>
    %35 = vector.shape_cast %34 : vector<128x32xf32> to vector<2x8x8x32xf32>
    %c0_38 = arith.constant 0 : index
    %c0_39 = arith.constant 0 : index
    %36 = vector.load %arg18[%c0_38, %c0_39] : memref<4x32xf32, #tpu.memory_space<vmem>>, vector<4x32xf32>
    %cst_40 = arith.constant dense<0.000000e+00> : vector<16x32xf32>
    %37 = tpu.matmul %1, %36, %cst_40 {dimension_numbers = #tpu.dot_dimension_numbers<[1], [0], [0], [1], [0, 0, 1, 1], [], []>} : vector<16x4xf32>, vector<4x32xf32>, vector<16x32xf32> -> vector<16x32xf32>
    %c0_41 = arith.constant 0 : index
    %c0_42 = arith.constant 0 : index
    %38 = vector.load %arg20[%c0_41, %c0_42] : memref<4x32xf32, #tpu.memory_space<vmem>>, vector<4x32xf32>
    %cst_43 = arith.constant dense<0.000000e+00> : vector<16x32xf32>
    %39 = tpu.matmul %1, %38, %cst_43 {dimension_numbers = #tpu.dot_dimension_numbers<[1], [0], [0], [1], [0, 0, 1, 1], [], []>} : vector<16x4xf32>, vector<4x32xf32>, vector<16x32xf32> -> vector<16x32xf32>
    %c0_44 = arith.constant 0 : index
    %c0_45 = arith.constant 0 : index
    %40 = vector.load %arg23[%c0_44, %c0_45] : memref<4x32xf32, #tpu.memory_space<vmem>>, vector<4x32xf32>
    %cst_46 = arith.constant dense<0.000000e+00> : vector<16x32xf32>
    %41 = tpu.matmul %1, %40, %cst_46 {dimension_numbers = #tpu.dot_dimension_numbers<[1], [0], [0], [1], [0, 0, 1, 1], [], []>} : vector<16x4xf32>, vector<4x32xf32>, vector<16x32xf32> -> vector<16x32xf32>
    %c0_47 = arith.constant 0 : index
    %c0_48 = arith.constant 0 : index
    %42 = vector.load %arg7[%c0_47, %c0_48] : memref<32x32xf32, #tpu.memory_space<vmem>>, vector<32x32xf32>
    %cst_49 = arith.constant dense<0.000000e+00> : vector<16x32xf32>
    %43 = tpu.matmul %13, %42, %cst_49 {dimension_numbers = #tpu.dot_dimension_numbers<[1], [0], [0], [1], [0, 0, 1, 1], [], []>} : vector<16x32xf32>, vector<32x32xf32>, vector<16x32xf32> -> vector<16x32xf32>
    %44 = arith.addf %43, %23 : vector<16x32xf32>
    %c0_50 = arith.constant 0 : index
    %c0_51 = arith.constant 0 : index
    %45 = vector.load %arg9[%c0_50, %c0_51] : memref<32x32xf32, #tpu.memory_space<vmem>>, vector<32x32xf32>
    %cst_52 = arith.constant dense<0.000000e+00> : vector<16x32xf32>
    %46 = tpu.matmul %13, %45, %cst_52 {dimension_numbers = #tpu.dot_dimension_numbers<[1], [0], [0], [1], [0, 0, 1, 1], [], []>} : vector<16x32xf32>, vector<32x32xf32>, vector<16x32xf32> -> vector<16x32xf32>
    %47 = arith.addf %46, %25 : vector<16x32xf32>
    %48 = vector.shape_cast %44 : vector<16x32xf32> to vector<2x8x1x32xf32>
    %49 = vector.broadcast %48 : vector<2x8x1x32xf32> to vector<2x8x8x32xf32>
    %50 = arith.addf %21, %49 : vector<2x8x8x32xf32>
    %51 = vector.shape_cast %47 : vector<16x32xf32> to vector<2x1x8x32xf32>
    %52 = vector.broadcast %51 : vector<2x1x8x32xf32> to vector<2x8x8x32xf32>
    %53 = arith.addf %50, %52 : vector<2x8x8x32xf32>
    %cst_53 = arith.constant 0.000000e+00 : f32
    %54 = vector.broadcast %cst_53 : f32 to vector<2x8x8x32xf32>
    %55 = arith.cmpf oge, %53, %54 : vector<2x8x8x32xf32>
    %cst_54 = arith.constant 0.00999999977 : f32
    %56 = vector.broadcast %cst_54 : f32 to vector<2x8x8x32xf32>
    %57 = arith.mulf %56, %53 : vector<2x8x8x32xf32>
    %58 = arith.select %55, %53, %57 : vector<2x8x8x32xi1>, vector<2x8x8x32xf32>
    %59 = vector.broadcast %3 : vector<2x8x8x1xf32> to vector<2x8x8x32xf32>
    %60 = arith.mulf %58, %59 : vector<2x8x8x32xf32>
    %cst_55 = arith.constant dense<0.000000e+00> : vector<2x8x32xf32>
    %61 = vector.multi_reduction <add>, %60, %cst_55 [2] : vector<2x8x8x32xf32> to vector<2x8x32xf32>
    %62 = vector.shape_cast %61 : vector<2x8x32xf32> to vector<16x32xf32>
    %c0_56 = arith.constant 0 : index
    %c0_57 = arith.constant 0 : index
    %63 = vector.load %arg12[%c0_56, %c0_57] : memref<32x32xf32, #tpu.memory_space<vmem>>, vector<32x32xf32>
    %cst_58 = arith.constant dense<0.000000e+00> : vector<16x32xf32>
    %64 = tpu.matmul %13, %63, %cst_58 {dimension_numbers = #tpu.dot_dimension_numbers<[1], [0], [0], [1], [0, 0, 1, 1], [], []>} : vector<16x32xf32>, vector<32x32xf32>, vector<16x32xf32> -> vector<16x32xf32>
    %65 = arith.addf %64, %27 : vector<16x32xf32>
    %c0_59 = arith.constant 0 : index
    %c0_60 = arith.constant 0 : index
    %66 = vector.load %arg14[%c0_59, %c0_60] : memref<32x32xf32, #tpu.memory_space<vmem>>, vector<32x32xf32>
    %cst_61 = arith.constant dense<0.000000e+00> : vector<16x32xf32>
    %67 = tpu.matmul %62, %66, %cst_61 {dimension_numbers = #tpu.dot_dimension_numbers<[1], [0], [0], [1], [0, 0, 1, 1], [], []>} : vector<16x32xf32>, vector<32x32xf32>, vector<16x32xf32> -> vector<16x32xf32>
    %68 = arith.addf %65, %67 : vector<16x32xf32>
    %c0_62 = arith.constant 0 : index
    %c0_63 = arith.constant 0 : index
    %69 = vector.load %arg15[%c0_62, %c0_63] : memref<1x32xf32, #tpu.memory_space<vmem>>, vector<1x32xf32>
    %70 = vector.broadcast %69 : vector<1x32xf32> to vector<16x32xf32>
    %71 = arith.addf %68, %70 : vector<16x32xf32>
    %cst_64 = arith.constant 0.000000e+00 : f32
    %72 = vector.broadcast %cst_64 : f32 to vector<16x32xf32>
    %73 = arith.cmpf oge, %71, %72 : vector<16x32xf32>
    %cst_65 = arith.constant 0.00999999977 : f32
    %74 = vector.broadcast %cst_65 : f32 to vector<16x32xf32>
    %75 = arith.mulf %74, %71 : vector<16x32xf32>
    %76 = arith.select %73, %71, %75 : vector<16x32xi1>, vector<16x32xf32>
    %c0_66 = arith.constant 0 : index
    %c0_67 = arith.constant 0 : index
    %77 = vector.load %arg17[%c0_66, %c0_67] : memref<32x32xf32, #tpu.memory_space<vmem>>, vector<32x32xf32>
    %cst_68 = arith.constant dense<0.000000e+00> : vector<16x32xf32>
    %78 = tpu.matmul %76, %77, %cst_68 {dimension_numbers = #tpu.dot_dimension_numbers<[1], [0], [0], [1], [0, 0, 1, 1], [], []>} : vector<16x32xf32>, vector<32x32xf32>, vector<16x32xf32> -> vector<16x32xf32>
    %79 = arith.addf %78, %37 : vector<16x32xf32>
    %c0_69 = arith.constant 0 : index
    %c0_70 = arith.constant 0 : index
    %80 = vector.load %arg19[%c0_69, %c0_70] : memref<32x32xf32, #tpu.memory_space<vmem>>, vector<32x32xf32>
    %cst_71 = arith.constant dense<0.000000e+00> : vector<16x32xf32>
    %81 = tpu.matmul %76, %80, %cst_71 {dimension_numbers = #tpu.dot_dimension_numbers<[1], [0], [0], [1], [0, 0, 1, 1], [], []>} : vector<16x32xf32>, vector<32x32xf32>, vector<16x32xf32> -> vector<16x32xf32>
    %82 = arith.addf %81, %39 : vector<16x32xf32>
    %83 = vector.shape_cast %79 : vector<16x32xf32> to vector<2x8x1x32xf32>
    %84 = vector.broadcast %83 : vector<2x8x1x32xf32> to vector<2x8x8x32xf32>
    %85 = arith.addf %35, %84 : vector<2x8x8x32xf32>
    %86 = vector.shape_cast %82 : vector<16x32xf32> to vector<2x1x8x32xf32>
    %87 = vector.broadcast %86 : vector<2x1x8x32xf32> to vector<2x8x8x32xf32>
    %88 = arith.addf %85, %87 : vector<2x8x8x32xf32>
    %cst_72 = arith.constant 0.000000e+00 : f32
    %89 = vector.broadcast %cst_72 : f32 to vector<2x8x8x32xf32>
    %90 = arith.cmpf oge, %88, %89 : vector<2x8x8x32xf32>
    %cst_73 = arith.constant 0.00999999977 : f32
    %91 = vector.broadcast %cst_73 : f32 to vector<2x8x8x32xf32>
    %92 = arith.mulf %91, %88 : vector<2x8x8x32xf32>
    %93 = arith.select %90, %88, %92 : vector<2x8x8x32xi1>, vector<2x8x8x32xf32>
    %94 = vector.broadcast %3 : vector<2x8x8x1xf32> to vector<2x8x8x32xf32>
    %95 = arith.mulf %93, %94 : vector<2x8x8x32xf32>
    %cst_74 = arith.constant dense<0.000000e+00> : vector<2x8x32xf32>
    %96 = vector.multi_reduction <add>, %95, %cst_74 [2] : vector<2x8x8x32xf32> to vector<2x8x32xf32>
    %97 = vector.shape_cast %96 : vector<2x8x32xf32> to vector<16x32xf32>
    %c0_75 = arith.constant 0 : index
    %c0_76 = arith.constant 0 : index
    %98 = vector.load %arg22[%c0_75, %c0_76] : memref<32x32xf32, #tpu.memory_space<vmem>>, vector<32x32xf32>
    %cst_77 = arith.constant dense<0.000000e+00> : vector<16x32xf32>
    %99 = tpu.matmul %76, %98, %cst_77 {dimension_numbers = #tpu.dot_dimension_numbers<[1], [0], [0], [1], [0, 0, 1, 1], [], []>} : vector<16x32xf32>, vector<32x32xf32>, vector<16x32xf32> -> vector<16x32xf32>
    %100 = arith.addf %99, %41 : vector<16x32xf32>
    %c0_78 = arith.constant 0 : index
    %c0_79 = arith.constant 0 : index
    %101 = vector.load %arg24[%c0_78, %c0_79] : memref<32x32xf32, #tpu.memory_space<vmem>>, vector<32x32xf32>
    %cst_80 = arith.constant dense<0.000000e+00> : vector<16x32xf32>
    %102 = tpu.matmul %97, %101, %cst_80 {dimension_numbers = #tpu.dot_dimension_numbers<[1], [0], [0], [1], [0, 0, 1, 1], [], []>} : vector<16x32xf32>, vector<32x32xf32>, vector<16x32xf32> -> vector<16x32xf32>
    %103 = arith.addf %100, %102 : vector<16x32xf32>
    %c0_81 = arith.constant 0 : index
    %c0_82 = arith.constant 0 : index
    %104 = vector.load %arg25[%c0_81, %c0_82] : memref<1x32xf32, #tpu.memory_space<vmem>>, vector<1x32xf32>
    %105 = vector.broadcast %104 : vector<1x32xf32> to vector<16x32xf32>
    %106 = arith.addf %103, %105 : vector<16x32xf32>
    %cst_83 = arith.constant 0.000000e+00 : f32
    %107 = vector.broadcast %cst_83 : f32 to vector<16x32xf32>
    %108 = arith.cmpf oge, %106, %107 : vector<16x32xf32>
    %cst_84 = arith.constant 0.00999999977 : f32
    %109 = vector.broadcast %cst_84 : f32 to vector<16x32xf32>
    %110 = arith.mulf %109, %106 : vector<16x32xf32>
    %111 = arith.select %108, %106, %110 : vector<16x32xi1>, vector<16x32xf32>
    %c0_85 = arith.constant 0 : index
    %c0_86 = arith.constant 0 : index
    %112 = vector.load %arg7[%c0_85, %c0_86] : memref<32x32xf32, #tpu.memory_space<vmem>>, vector<32x32xf32>
    %cst_87 = arith.constant dense<0.000000e+00> : vector<16x32xf32>
    %113 = tpu.matmul %111, %112, %cst_87 {dimension_numbers = #tpu.dot_dimension_numbers<[1], [0], [0], [1], [0, 0, 1, 1], [], []>} : vector<16x32xf32>, vector<32x32xf32>, vector<16x32xf32> -> vector<16x32xf32>
    %114 = arith.addf %113, %23 : vector<16x32xf32>
    %c0_88 = arith.constant 0 : index
    %c0_89 = arith.constant 0 : index
    %115 = vector.load %arg9[%c0_88, %c0_89] : memref<32x32xf32, #tpu.memory_space<vmem>>, vector<32x32xf32>
    %cst_90 = arith.constant dense<0.000000e+00> : vector<16x32xf32>
    %116 = tpu.matmul %111, %115, %cst_90 {dimension_numbers = #tpu.dot_dimension_numbers<[1], [0], [0], [1], [0, 0, 1, 1], [], []>} : vector<16x32xf32>, vector<32x32xf32>, vector<16x32xf32> -> vector<16x32xf32>
    %117 = arith.addf %116, %25 : vector<16x32xf32>
    %118 = vector.shape_cast %114 : vector<16x32xf32> to vector<2x8x1x32xf32>
    %119 = vector.broadcast %118 : vector<2x8x1x32xf32> to vector<2x8x8x32xf32>
    %120 = arith.addf %21, %119 : vector<2x8x8x32xf32>
    %121 = vector.shape_cast %117 : vector<16x32xf32> to vector<2x1x8x32xf32>
    %122 = vector.broadcast %121 : vector<2x1x8x32xf32> to vector<2x8x8x32xf32>
    %123 = arith.addf %120, %122 : vector<2x8x8x32xf32>
    %cst_91 = arith.constant 0.000000e+00 : f32
    %124 = vector.broadcast %cst_91 : f32 to vector<2x8x8x32xf32>
    %125 = arith.cmpf oge, %123, %124 : vector<2x8x8x32xf32>
    %cst_92 = arith.constant 0.00999999977 : f32
    %126 = vector.broadcast %cst_92 : f32 to vector<2x8x8x32xf32>
    %127 = arith.mulf %126, %123 : vector<2x8x8x32xf32>
    %128 = arith.select %125, %123, %127 : vector<2x8x8x32xi1>, vector<2x8x8x32xf32>
    %129 = vector.broadcast %3 : vector<2x8x8x1xf32> to vector<2x8x8x32xf32>
    %130 = arith.mulf %128, %129 : vector<2x8x8x32xf32>
    %cst_93 = arith.constant dense<0.000000e+00> : vector<2x8x32xf32>
    %131 = vector.multi_reduction <add>, %130, %cst_93 [2] : vector<2x8x8x32xf32> to vector<2x8x32xf32>
    %132 = vector.shape_cast %131 : vector<2x8x32xf32> to vector<16x32xf32>
    %c0_94 = arith.constant 0 : index
    %c0_95 = arith.constant 0 : index
    %133 = vector.load %arg12[%c0_94, %c0_95] : memref<32x32xf32, #tpu.memory_space<vmem>>, vector<32x32xf32>
    %cst_96 = arith.constant dense<0.000000e+00> : vector<16x32xf32>
    %134 = tpu.matmul %111, %133, %cst_96 {dimension_numbers = #tpu.dot_dimension_numbers<[1], [0], [0], [1], [0, 0, 1, 1], [], []>} : vector<16x32xf32>, vector<32x32xf32>, vector<16x32xf32> -> vector<16x32xf32>
    %135 = arith.addf %134, %27 : vector<16x32xf32>
    %c0_97 = arith.constant 0 : index
    %c0_98 = arith.constant 0 : index
    %136 = vector.load %arg14[%c0_97, %c0_98] : memref<32x32xf32, #tpu.memory_space<vmem>>, vector<32x32xf32>
    %cst_99 = arith.constant dense<0.000000e+00> : vector<16x32xf32>
    %137 = tpu.matmul %132, %136, %cst_99 {dimension_numbers = #tpu.dot_dimension_numbers<[1], [0], [0], [1], [0, 0, 1, 1], [], []>} : vector<16x32xf32>, vector<32x32xf32>, vector<16x32xf32> -> vector<16x32xf32>
    %138 = arith.addf %135, %137 : vector<16x32xf32>
    %c0_100 = arith.constant 0 : index
    %c0_101 = arith.constant 0 : index
    %139 = vector.load %arg15[%c0_100, %c0_101] : memref<1x32xf32, #tpu.memory_space<vmem>>, vector<1x32xf32>
    %140 = vector.broadcast %139 : vector<1x32xf32> to vector<16x32xf32>
    %141 = arith.addf %138, %140 : vector<16x32xf32>
    %cst_102 = arith.constant 0.000000e+00 : f32
    %142 = vector.broadcast %cst_102 : f32 to vector<16x32xf32>
    %143 = arith.cmpf oge, %141, %142 : vector<16x32xf32>
    %cst_103 = arith.constant 0.00999999977 : f32
    %144 = vector.broadcast %cst_103 : f32 to vector<16x32xf32>
    %145 = arith.mulf %144, %141 : vector<16x32xf32>
    %146 = arith.select %143, %141, %145 : vector<16x32xi1>, vector<16x32xf32>
    %c0_104 = arith.constant 0 : index
    %c0_105 = arith.constant 0 : index
    %147 = vector.load %arg17[%c0_104, %c0_105] : memref<32x32xf32, #tpu.memory_space<vmem>>, vector<32x32xf32>
    %cst_106 = arith.constant dense<0.000000e+00> : vector<16x32xf32>
    %148 = tpu.matmul %146, %147, %cst_106 {dimension_numbers = #tpu.dot_dimension_numbers<[1], [0], [0], [1], [0, 0, 1, 1], [], []>} : vector<16x32xf32>, vector<32x32xf32>, vector<16x32xf32> -> vector<16x32xf32>
    %149 = arith.addf %148, %37 : vector<16x32xf32>
    %c0_107 = arith.constant 0 : index
    %c0_108 = arith.constant 0 : index
    %150 = vector.load %arg19[%c0_107, %c0_108] : memref<32x32xf32, #tpu.memory_space<vmem>>, vector<32x32xf32>
    %cst_109 = arith.constant dense<0.000000e+00> : vector<16x32xf32>
    %151 = tpu.matmul %146, %150, %cst_109 {dimension_numbers = #tpu.dot_dimension_numbers<[1], [0], [0], [1], [0, 0, 1, 1], [], []>} : vector<16x32xf32>, vector<32x32xf32>, vector<16x32xf32> -> vector<16x32xf32>
    %152 = arith.addf %151, %39 : vector<16x32xf32>
    %153 = vector.shape_cast %149 : vector<16x32xf32> to vector<2x8x1x32xf32>
    %154 = vector.broadcast %153 : vector<2x8x1x32xf32> to vector<2x8x8x32xf32>
    %155 = arith.addf %35, %154 : vector<2x8x8x32xf32>
    %156 = vector.shape_cast %152 : vector<16x32xf32> to vector<2x1x8x32xf32>
    %157 = vector.broadcast %156 : vector<2x1x8x32xf32> to vector<2x8x8x32xf32>
    %158 = arith.addf %155, %157 : vector<2x8x8x32xf32>
    %cst_110 = arith.constant 0.000000e+00 : f32
    %159 = vector.broadcast %cst_110 : f32 to vector<2x8x8x32xf32>
    %160 = arith.cmpf oge, %158, %159 : vector<2x8x8x32xf32>
    %cst_111 = arith.constant 0.00999999977 : f32
    %161 = vector.broadcast %cst_111 : f32 to vector<2x8x8x32xf32>
    %162 = arith.mulf %161, %158 : vector<2x8x8x32xf32>
    %163 = arith.select %160, %158, %162 : vector<2x8x8x32xi1>, vector<2x8x8x32xf32>
    %164 = vector.broadcast %3 : vector<2x8x8x1xf32> to vector<2x8x8x32xf32>
    %165 = arith.mulf %163, %164 : vector<2x8x8x32xf32>
    %cst_112 = arith.constant dense<0.000000e+00> : vector<2x8x32xf32>
    %166 = vector.multi_reduction <add>, %165, %cst_112 [2] : vector<2x8x8x32xf32> to vector<2x8x32xf32>
    %167 = vector.shape_cast %166 : vector<2x8x32xf32> to vector<16x32xf32>
    %c0_113 = arith.constant 0 : index
    %c0_114 = arith.constant 0 : index
    %168 = vector.load %arg22[%c0_113, %c0_114] : memref<32x32xf32, #tpu.memory_space<vmem>>, vector<32x32xf32>
    %cst_115 = arith.constant dense<0.000000e+00> : vector<16x32xf32>
    %169 = tpu.matmul %146, %168, %cst_115 {dimension_numbers = #tpu.dot_dimension_numbers<[1], [0], [0], [1], [0, 0, 1, 1], [], []>} : vector<16x32xf32>, vector<32x32xf32>, vector<16x32xf32> -> vector<16x32xf32>
    %170 = arith.addf %169, %41 : vector<16x32xf32>
    %c0_116 = arith.constant 0 : index
    %c0_117 = arith.constant 0 : index
    %171 = vector.load %arg24[%c0_116, %c0_117] : memref<32x32xf32, #tpu.memory_space<vmem>>, vector<32x32xf32>
    %cst_118 = arith.constant dense<0.000000e+00> : vector<16x32xf32>
    %172 = tpu.matmul %167, %171, %cst_118 {dimension_numbers = #tpu.dot_dimension_numbers<[1], [0], [0], [1], [0, 0, 1, 1], [], []>} : vector<16x32xf32>, vector<32x32xf32>, vector<16x32xf32> -> vector<16x32xf32>
    %173 = arith.addf %170, %172 : vector<16x32xf32>
    %c0_119 = arith.constant 0 : index
    %c0_120 = arith.constant 0 : index
    %174 = vector.load %arg25[%c0_119, %c0_120] : memref<1x32xf32, #tpu.memory_space<vmem>>, vector<1x32xf32>
    %175 = vector.broadcast %174 : vector<1x32xf32> to vector<16x32xf32>
    %176 = arith.addf %173, %175 : vector<16x32xf32>
    %cst_121 = arith.constant 0.000000e+00 : f32
    %177 = vector.broadcast %cst_121 : f32 to vector<16x32xf32>
    %178 = arith.cmpf oge, %176, %177 : vector<16x32xf32>
    %cst_122 = arith.constant 0.00999999977 : f32
    %179 = vector.broadcast %cst_122 : f32 to vector<16x32xf32>
    %180 = arith.mulf %179, %176 : vector<16x32xf32>
    %181 = arith.select %178, %176, %180 : vector<16x32xi1>, vector<16x32xf32>
    %182 = vector.shape_cast %146 : vector<16x32xf32> to vector<2x8x32xf32>
    %183 = vector.shape_cast %181 : vector<16x32xf32> to vector<2x8x32xf32>
    %c0_123 = arith.constant 0 : index
    %c0_124 = arith.constant 0 : index
    %184 = vector.load %arg26[%c0_123, %c0_124] : memref<192x128xf32, #tpu.memory_space<vmem>>, vector<192x128xf32>
    %c0_125 = arith.constant 0 : index
    %c0_126 = arith.constant 0 : index
    %185 = vector.load %arg27[%c0_125, %c0_126] : memref<1x128xf32, #tpu.memory_space<vmem>>, vector<1x128xf32>
    %186 = vector.extract_strided_slice %182 {offsets = [0, 0, 0], sizes = [2, 1, 32], strides = [1, 1, 1]} : vector<2x8x32xf32> to vector<2x1x32xf32>
    %187 = vector.shape_cast %186 : vector<2x1x32xf32> to vector<2x32xf32>
    %188 = vector.extract_strided_slice %184 {offsets = [0, 0], sizes = [32, 128], strides = [1, 1]} : vector<192x128xf32> to vector<32x128xf32>
    %cst_127 = arith.constant dense<0.000000e+00> : vector<2x128xf32>
    %189 = tpu.matmul %187, %188, %cst_127 {dimension_numbers = #tpu.dot_dimension_numbers<[1], [0], [0], [1], [0, 0, 1, 1], [], []>} : vector<2x32xf32>, vector<32x128xf32>, vector<2x128xf32> -> vector<2x128xf32>
    %190 = vector.broadcast %185 : vector<1x128xf32> to vector<2x128xf32>
    %191 = arith.addf %190, %189 : vector<2x128xf32>
    %192 = vector.extract_strided_slice %183 {offsets = [0, 0, 0], sizes = [2, 1, 32], strides = [1, 1, 1]} : vector<2x8x32xf32> to vector<2x1x32xf32>
    %193 = vector.shape_cast %192 : vector<2x1x32xf32> to vector<2x32xf32>
    %194 = vector.extract_strided_slice %184 {offsets = [32, 0], sizes = [32, 128], strides = [1, 1]} : vector<192x128xf32> to vector<32x128xf32>
    %cst_128 = arith.constant dense<0.000000e+00> : vector<2x128xf32>
    %195 = tpu.matmul %193, %194, %cst_128 {dimension_numbers = #tpu.dot_dimension_numbers<[1], [0], [0], [1], [0, 0, 1, 1], [], []>} : vector<2x32xf32>, vector<32x128xf32>, vector<2x128xf32> -> vector<2x128xf32>
    %196 = arith.addf %191, %195 : vector<2x128xf32>
    %197 = vector.extract_strided_slice %182 {offsets = [0, 1, 0], sizes = [2, 1, 32], strides = [1, 1, 1]} : vector<2x8x32xf32> to vector<2x1x32xf32>
    %198 = vector.shape_cast %197 : vector<2x1x32xf32> to vector<2x32xf32>
    %199 = vector.extract_strided_slice %184 {offsets = [64, 0], sizes = [32, 128], strides = [1, 1]} : vector<192x128xf32> to vector<32x128xf32>
    %cst_129 = arith.constant dense<0.000000e+00> : vector<2x128xf32>
    %200 = tpu.matmul %198, %199, %cst_129 {dimension_numbers = #tpu.dot_dimension_numbers<[1], [0], [0], [1], [0, 0, 1, 1], [], []>} : vector<2x32xf32>, vector<32x128xf32>, vector<2x128xf32> -> vector<2x128xf32>
    %201 = arith.addf %196, %200 : vector<2x128xf32>
    %202 = vector.extract_strided_slice %183 {offsets = [0, 1, 0], sizes = [2, 1, 32], strides = [1, 1, 1]} : vector<2x8x32xf32> to vector<2x1x32xf32>
    %203 = vector.shape_cast %202 : vector<2x1x32xf32> to vector<2x32xf32>
    %204 = vector.extract_strided_slice %184 {offsets = [96, 0], sizes = [32, 128], strides = [1, 1]} : vector<192x128xf32> to vector<32x128xf32>
    %cst_130 = arith.constant dense<0.000000e+00> : vector<2x128xf32>
    %205 = tpu.matmul %203, %204, %cst_130 {dimension_numbers = #tpu.dot_dimension_numbers<[1], [0], [0], [1], [0, 0, 1, 1], [], []>} : vector<2x32xf32>, vector<32x128xf32>, vector<2x128xf32> -> vector<2x128xf32>
    %206 = arith.addf %201, %205 : vector<2x128xf32>
    %207 = vector.extract_strided_slice %182 {offsets = [0, 2, 0], sizes = [2, 1, 32], strides = [1, 1, 1]} : vector<2x8x32xf32> to vector<2x1x32xf32>
    %208 = vector.shape_cast %207 : vector<2x1x32xf32> to vector<2x32xf32>
    %209 = vector.extract_strided_slice %184 {offsets = [128, 0], sizes = [32, 128], strides = [1, 1]} : vector<192x128xf32> to vector<32x128xf32>
    %cst_131 = arith.constant dense<0.000000e+00> : vector<2x128xf32>
    %210 = tpu.matmul %208, %209, %cst_131 {dimension_numbers = #tpu.dot_dimension_numbers<[1], [0], [0], [1], [0, 0, 1, 1], [], []>} : vector<2x32xf32>, vector<32x128xf32>, vector<2x128xf32> -> vector<2x128xf32>
    %211 = arith.addf %206, %210 : vector<2x128xf32>
    %212 = vector.extract_strided_slice %183 {offsets = [0, 2, 0], sizes = [2, 1, 32], strides = [1, 1, 1]} : vector<2x8x32xf32> to vector<2x1x32xf32>
    %213 = vector.shape_cast %212 : vector<2x1x32xf32> to vector<2x32xf32>
    %214 = vector.extract_strided_slice %184 {offsets = [160, 0], sizes = [32, 128], strides = [1, 1]} : vector<192x128xf32> to vector<32x128xf32>
    %cst_132 = arith.constant dense<0.000000e+00> : vector<2x128xf32>
    %215 = tpu.matmul %213, %214, %cst_132 {dimension_numbers = #tpu.dot_dimension_numbers<[1], [0], [0], [1], [0, 0, 1, 1], [], []>} : vector<2x32xf32>, vector<32x128xf32>, vector<2x128xf32> -> vector<2x128xf32>
    %216 = arith.addf %211, %215 : vector<2x128xf32>
    %217 = math.tanh %216 : vector<2x128xf32>
    %c0_133 = arith.constant 0 : index
    %c0_134 = arith.constant 0 : index
    %218 = vector.load %arg28[%c0_133, %c0_134] : memref<128x64xf32, #tpu.memory_space<vmem>>, vector<128x64xf32>
    %cst_135 = arith.constant dense<0.000000e+00> : vector<2x64xf32>
    %219 = tpu.matmul %217, %218, %cst_135 {dimension_numbers = #tpu.dot_dimension_numbers<[1], [0], [0], [1], [0, 0, 1, 1], [], []>} : vector<2x128xf32>, vector<128x64xf32>, vector<2x64xf32> -> vector<2x64xf32>
    %c0_136 = arith.constant 0 : index
    %c0_137 = arith.constant 0 : index
    %220 = vector.load %arg29[%c0_136, %c0_137] : memref<1x64xf32, #tpu.memory_space<vmem>>, vector<1x64xf32>
    %221 = vector.broadcast %220 : vector<1x64xf32> to vector<2x64xf32>
    %222 = arith.addf %219, %221 : vector<2x64xf32>
    %223 = math.tanh %222 : vector<2x64xf32>
    %c0_138 = arith.constant 0 : index
    %c0_139 = arith.constant 0 : index
    %224 = vector.load %arg30[%c0_138, %c0_139] : memref<64x3xf32, #tpu.memory_space<vmem>>, vector<64x3xf32>
    %cst_140 = arith.constant dense<0.000000e+00> : vector<2x3xf32>
    %225 = tpu.matmul %223, %224, %cst_140 {dimension_numbers = #tpu.dot_dimension_numbers<[1], [0], [0], [1], [0, 0, 1, 1], [], []>} : vector<2x64xf32>, vector<64x3xf32>, vector<2x3xf32> -> vector<2x3xf32>
    %c0_141 = arith.constant 0 : index
    %c0_142 = arith.constant 0 : index
    %226 = vector.load %arg31[%c0_141, %c0_142] : memref<1x3xf32, #tpu.memory_space<vmem>>, vector<1x3xf32>
    %227 = vector.broadcast %226 : vector<1x3xf32> to vector<2x3xf32>
    %228 = arith.addf %225, %227 : vector<2x3xf32>
    %cst_143 = arith.constant 0.000000e+00 : f32
    %229 = vector.broadcast %cst_143 : f32 to vector<2x3xf32>
    %230 = arith.subf %229, %228 : vector<2x3xf32>
    %231 = math.exp %230 : vector<2x3xf32>
    %cst_144 = arith.constant 1.000000e+00 : f32
    %232 = vector.broadcast %cst_144 : f32 to vector<2x3xf32>
    %233 = arith.addf %232, %231 : vector<2x3xf32>
    %234 = tpu.reciprocal %233 {approx = true} : vector<2x3xf32> -> vector<2x3xf32>
    %c0_145 = arith.constant 0 : index
    %c0_146 = arith.constant 0 : index
    %235 = vector.load %arg32[%c0_145, %c0_146] : memref<2x3xf32, #tpu.memory_space<vmem>>, vector<2x3xf32>
    tpu.vector_store %arg32[%c0_145, %c0_146], %234 {strides = array<i32>} : memref<2x3xf32, #tpu.memory_space<vmem>>, vector<2x3xf32>,
    return
  }
}

</mosaic_0001>

<bundles_post_ra>
// kernel: tpu_custom_call.1
= control target key start
LH: loop header
LB: loop body
LE: loop exit
PB: predicated region body
PF: predicated region fallthrough
CT: control target
= control target key end

     0   :  { %s5987_s6 = smov 1   ;;  %s5988_s10 = smov 2   ;;  %s7514_s0 = inlined_call_operand.smem [shape: u32[33], index: -1, kind: input, shape index: {}] }
   0x1   :  { %s6032_s5 = sld [smem:[%s7514_s0]]   ;;  %s5989_s14 = smov 3  }
   0x2   :  { %s6037_s9 = sld [smem:[%s7514_s0 + %s5987_s6]]   ;;  %s5990_s18 = smov 4  }
   0x3   :  { %s6042_s13 = sld [smem:[%s7514_s0 + %s5988_s10]]   ;;  %s5991_s22 = smov 5  }
   0x4   :  { %s6047_s17 = sld [smem:[%s7514_s0 + %s5989_s14]]   ;;  %s5992_s26 = smov 6  }
   0x5   :  { %s6052_s21 = sld [smem:[%s7514_s0 + %s5990_s18]]   ;;  %s5993_s30 = smov 7  }
   0x6   :  { %s6057_s25 = sld [smem:[%s7514_s0 + %s5991_s22]]   ;;  %s5994_s4 = smov 8  }
   0x7   :  { %s6062_s29 = sld [smem:[%s7514_s0 + %s5992_s26]]   ;;  %s5995_s10 = smov 9  }
   0x8   :  { %s6067_s3 = sld [smem:[%s7514_s0 + %s5993_s30]]   ;;  %s5996_s15 = smov 10  }
   0x9   :  { %s6072_s8 = sld [smem:[%s7514_s0 + %s5994_s4]]   ;;  %s5997_s20 = smov 11  }
   0xa   :  { %7606 = sst [smem:[#allocation5_spill]] %s6047_s17  ;;  %s5998_s26 = smov 12  }
   0xb   :  { %s6077_s14 = sld [smem:[%s7514_s0 + %s5995_s10]]   ;;  %s5999_s1 = smov 13  }
   0xc   :  { %7607 = sst [smem:[#allocation6_spill]] %s6057_s25  ;;  %s6000_s7 = smov 14  }
   0xd   :  { %s6082_s19 = sld [smem:[%s7514_s0 + %s5996_s15]]   ;;  %s6001_s15 = smov 15  }
   0xe   :  { %s6087_s24 = sld [smem:[%s7514_s0 + %s5997_s20]]   ;;  %s6002_s22 = smov 16  }
   0xf   :  { %s6092_s30 = sld [smem:[%s7514_s0 + %s5998_s26]]   ;;  %s6003_s28 = smov 17  }
  0x10   :  { %s6097_s6 = sld [smem:[%s7514_s0 + %s5999_s1]]  }
  0x11   :  { %s6102_s12 = sld [smem:[%s7514_s0 + %s6000_s7]]   ;;  %s6004_s7 = smov 18  }
  0x12   :  { %s6107_s20 = sld [smem:[%s7514_s0 + %s6001_s15]]   ;;  %s6005_s15 = smov 19  }
  0x13   :  { %s6112_s27 = sld [smem:[%s7514_s0 + %s6002_s22]]   ;;  %s6006_s22 = smov 20  }
  0x14   :  { %7608 = sst [smem:[#allocation7_spill]] %s6087_s24 }
  0x15   :  { %7609 = sst [smem:[#allocation8_spill]] %s6092_s30 }
  0x16   :  { %s6117_s4 = sld [smem:[%s7514_s0 + %s6003_s28]]   ;;  %s6007_s28 = smov 21  }
  0x17   :  { %7610 = sst [smem:[#allocation9_spill]] %s6102_s12 }
  0x18   :  { %7611 = sst [smem:[#allocation10_spill]] %s6107_s20 }
  0x19   :  { %s6122_s24 = sld [smem:[%s7514_s0 + %s6004_s7]]   ;;  %s6008_s7 = smov 22  }
  0x1a   :  { %s6127_s20 = sld [smem:[%s7514_s0 + %s6005_s15]]   ;;  %s6009_s15 = smov 23  }
  0x1b   :  { %s6132_s12 = sld [smem:[%s7514_s0 + %s6006_s22]]   ;;  %s6010_s22 = smov 24  }
  0x1c   :  { %7612 = sst [smem:[#allocation11_spill]] %s6117_s4 }
  0x1d   :  { %s6137_s4 = sld [smem:[%s7514_s0 + %s6007_s28]]   ;;  %s6011_s28 = smov 25  }
  0x1e   :  { %s6142_s25 = sld [smem:[%s7514_s0 + %s6008_s7]]   ;;  %s6012_s7 = smov 26  }
  0x1f   :  { %s6152_s17 = sld [smem:[%s7514_s0 + %s6010_s22]]   ;;  %s6014_s22 = smov 28  }
  0x20   :  { %7613 = sst [smem:[#allocation12_spill]] %s6127_s20 }
  0x21   :  { %s6147_s20 = sld [smem:[%s7514_s0 + %s6009_s15]]   ;;  %s6013_s15 = smov 27  }
  0x22   :  { %s6167_s30 = sld [smem:[%s7514_s0 + %s6013_s15]]   ;;  %s6017_s15 = smov 31  }
  0x23   :  { %7614 = sst [smem:[#allocation13_spill]] %s6137_s4 }
  0x24   :  { %7615 = sst [smem:[#allocation14_spill]] %s6142_s25 }
  0x25   :  { %7616 = sst [smem:[#allocation15_spill]] %s6152_s17 }
  0x26   :  { %s6157_s4 = sld [smem:[%s7514_s0 + %s6011_s28]]   ;;  %s6015_s28 = smov 29  }
  0x27   :  { %s6162_s25 = sld [smem:[%s7514_s0 + %s6012_s7]]   ;;  %s6016_s7 = smov 30  }
  0x28   :  { %7619 = sst [smem:[#allocation18_spill]] %s6167_s30 }
  0x29   :  { %s6172_s17 = sld [smem:[%s7514_s0 + %s6014_s22]]   ;;  %s6018_s22 = smov 32  }
  0x2a   :  { %s6187_s30 = sld [smem:[%s7514_s0 + %s6017_s15]]  }
  0x2c   :  { %7617 = sst [smem:[#allocation16_spill]] %s6157_s4 }
  0x2d   :  { %7618 = sst [smem:[#allocation17_spill]] %s6162_s25 }
  0x2e   :  { %s6177_s4 = sld [smem:[%s7514_s0 + %s6015_s28]]  }
  0x2f   :  { %7620 = sst [smem:[#allocation19_spill]] %s6172_s17 }
  0x30   :  { %s6182_s25 = sld [smem:[%s7514_s0 + %s6016_s7]]  }
  0x31   :  { %s6192_s17 = sld [smem:[%s7514_s0 + %s6018_s22]]  }
  0x32   :  { %v251_v0 = vld [vmem:[%s6052_s21] sm:$0xf]  ;;  %vm266_vm0 = vcmask 1043456   ;;  %vm259_vm1 = vcmask 31744   ;;  %v6199_v2 = vld [vmem:[%s6032_s5 + $0x8] sm:$0xff]  ;;  %vm424_vm2 = vcmask 1045504  }
  0x33   :  { %v6196_v1 = vld [vmem:[%s6032_s5] sm:$0xff]  ;;  %5304 = vmatprep.subr.msk.mxu0 %vm266_vm0, %v251_v0  ;;  %vm375_vm3 = vcmask 48128   ;;  %v352_v5 = vld [vmem:[%s6037_s9 + $0x8] sm:$0xff]  ;;  %v353_v6 = vld [vmem:[%s6037_s9 + $0x10] sm:$0xff] }
  0x34   :  { %5306 = vmatprep.mubr.msk.f32.mxu0 %vm259_vm1, %v6196_v1  ;;  %v367_v3 = vld [vmem:[%s6062_s29] sm:$0x3f]  ;;  %5305 = vmatpush3.msk.msra.mxu0 %vm266_vm0, %v251_v0  ;;  %v354_v10 = vld [vmem:[%s6037_s9 + $0x18] sm:$0xff]  ;;  %v356_v13 = vld [vmem:[%s6037_s9 + $0x28] sm:$0xff] }
  0x35   :  { %v351_v4 = vld [vmem:[%s6037_s9] sm:$0xff]  ;;  %5309 = vmatprep.subr.msk.mxu1 %vm424_vm2, %v367_v3  ;;  %5307 = vmatmul.mubr.msk.f32.vlgmr.msra.gmra.mrb[0].mxu0 %vm259_vm1, %v6199_v2  ;;  %v357_v14 = vld [vmem:[%s6037_s9 + $0x30] sm:$0xff]  ;;  %v1268_v16 = vld [vmem:[%s6067_s3 + $0x8] sm:$0xff] }
  0x36   :  { %5310 = vmatpush3.msk.msra.mxu1 %vm424_vm2, %v367_v3  ;;  %v826_v7 = vld [vmem:[%s6112_s27] sm:$0x3f]  ;;  %5311 = vmatprep.mubr.msk.f32.mxu1 %vm375_vm3, %v351_v4  ;;  %v358_v18 = vld [vmem:[%s6037_s9 + $0x38] sm:$0xff] }
  0x37   :  { %5887 = vmatprep.subr.msk.mxu1 %vm424_vm2, %v826_v7  ;;  %v573_v8 = vld [vmem:[%s6072_s8] sm:$0xf]  ;;  %5312 = vmatmul.mubr.msk.f32.vlgmr.msra.gmra.mrb[0].mxu1 %vm375_vm3, %v352_v5 }
  0x38   :  { %5335 = vmatprep.subr.msk.mxu0 %vm266_vm0, %v573_v8  ;;  %v652_v9 = vld [vmem:[%s6082_s19] sm:$0xf]  ;;  %5314 = vmatprep.mubr.msk.f32.mxu1 %vm375_vm3, %v353_v6 }
  0x39   :  { %5888 = vmatpush3.msk.msra.mxu1 %vm424_vm2, %v826_v7  ;;  %v355_v11 = vld [vmem:[%s6037_s9 + $0x20] sm:$0xff]  ;;  %5336 = vmatpush3.msk.msra.mxu0 %vm266_vm0, %v573_v8 }
  0x3a   :  { %5337 = vmatprep.mubr.msk.f32.mxu0 %vm259_vm1, %v6196_v1  ;;  %5340 = vmatprep.subr.msk.mxu0 %vm266_vm0, %v652_v9  ;;  %v731_v12 = vld [vmem:[%s6097_s6] sm:$0xf] }
  0x3b   :  { %5338 = vmatmul.mubr.msk.f32.vlgmr.msra.gmra.mrb[2].mxu0 %vm259_vm1, %v6199_v2  ;;  %5315 = vmatmul.mubr.msk.f32.gmra.mrb[2].mxu1 %vm375_vm3, %v354_v10  ;;  %v1267_v15 = vld [vmem:[%s6067_s3] sm:$0xff] }
  0x3c   :  { %5341 = vmatpush3.msk.msra.mxu0 %vm266_vm0, %v652_v9  ;;  %5317 = vmatprep.mubr.msk.f32.mxu1 %vm375_vm3, %v355_v11  ;;  %v6244_v17 = vld [vmem:[%s6122_s24] sm:$0xf]  ;;  %v6255_v21 = vpack.c.bf16 %v1268_v16, %v1267_v15 }
  0x3d   :  { %5342 = vmatprep.mubr.msk.f32.mxu0 %vm259_vm1, %v6196_v1  ;;  %5345 = vmatprep.subr.msk.mxu0 %vm266_vm0, %v731_v12  ;;  %v359_v19 = vld [vmem:[%s6037_s9 + $0x40] sm:$0xff] }
  0x3e   :  { %v810_v20 = vld [vmem:[%s6042_s13] sm:$0xff]  ;;  %5376 = vmatprep.subr.msk.mxu1 %vm266_vm0, %v6244_v17 }
  0x3f   :  { %5343 = vmatmul.mubr.msk.f32.vlgmr.msra.gmra.mrb[4].mxu0 %vm259_vm1, %v6199_v2  ;;  %5318 = vmatmul.mubr.msk.f32.gmra.mrb[4].mxu1 %vm375_vm3, %v356_v13 }
  0x40   :  { %5346 = vmatpush3.msk.msra.mxu0 %vm266_vm0, %v731_v12  ;;  %5320 = vmatprep.mubr.msk.f32.mxu1 %vm375_vm3, %v357_v14 }
  0x41   :  { %5347 = vmatprep.mubr.msk.f32.mxu0 %vm259_vm1, %v6196_v1  ;;  %5350 = vmatprep.subr.msk.mxu0 %vm424_vm2, %v826_v7 }
  0x42   :  { %70 = vsyncpa [#allocation3], 0  ;;  %v1269_v22 = vld [vmem:[%s6067_s3 + $0x10] sm:$0xff]  ;;  %v1270_v23 = vld [vmem:[%s6067_s3 + $0x18] sm:$0xff]  ;;  %s7621_s0 = sld [smem:[#allocation8_spill]]  ;;  %s7622_s5 = sld [smem:[#allocation5_spill]]  ;;  %v139_v58 = vlaneseq }
  0x43   :  { %5348 = vmatmul.mubr.msk.f32.vlgmr.msra.gmra.mrb[6].mxu0 %vm259_vm1, %v6199_v2  ;;  %5321 = vmatmul.mubr.msk.f32.gmra.mrb[6].mxu1 %vm375_vm3, %v358_v18  ;;  %v811_v24 = vld [vmem:[%s6042_s13 + $0x8] sm:$0xff]  ;;  %v361_v26 = vld [vmem:[%s6037_s9 + $0x50] sm:$0xff]  ;;  %v6272_v28 = vpack.c.bf16 %v1270_v23, %v1269_v22  ;;  %v813_v29 = vld [vmem:[%s6042_s13 + $0x18] sm:$0xff]  ;;  %vm1271_vm6 = vcmask 261120   ;;  %s7650_s21 = sld [smem:[#allocation7_spill]]  ;;  %s7676_s29 = sld [smem:[#allocation11_spill]] }
  0x44   :  { %5351 = vmatpush3.msk.msra.mxu0 %vm424_vm2, %v826_v7  ;;  %5323 = vmatprep.mubr.msk.f32.mxu1 %vm375_vm3, %v359_v19  ;;  %v360_v25 = vld [vmem:[%s6037_s9 + $0x48] sm:$0xff]  ;;  %v812_v27 = vld [vmem:[%s6042_s13 + $0x10] sm:$0xff]  ;;  %v362_v30 = vld [vmem:[%s6037_s9 + $0x58] sm:$0xff]  ;;  %v6354_v59 = vshrl.u32 %v139_v58, 7  ;;  %s7677_s3 = sld [smem:[#allocation14_spill]]  ;;  %s7678_s8 = sld [smem:[#allocation12_spill]] }
  0x45   :  { %5352 = vmatprep.mubr.msk.f32.mxu0 %vm375_vm3, %v810_v20  ;;  %5688 = vmatprep.subr.bf16.mxu0 %v6255_v21  ;;  %v814_v31 = vld [vmem:[%s6042_s13 + $0x20] sm:$0xff]  ;;  %v815_v33 = vld [vmem:[%s6042_s13 + $0x28] sm:$0xff]  ;;  %v816_v35 = vld [vmem:[%s6042_s13 + $0x30] sm:$0xff]  ;;  %s7681_s19 = sld [smem:[#allocation15_spill]]  ;;  %s7682_s24 = sld [smem:[#allocation13_spill]] }
  0x46   :  { %v363_v32 = vld [vmem:[%s6037_s9 + $0x60] sm:$0xff]  ;;  %v364_v34 = vld [vmem:[%s6037_s9 + $0x68] sm:$0xff]  ;;  %v365_v36 = vld [vmem:[%s6037_s9 + $0x70] sm:$0xff]  ;;  %v6358_v61 = vsub.s32 0, %v6354_v59  ;;  %v155_v62 = vsub.s32 2, %v6354_v59  ;;  %v148_v63 = vsub.s32 1, %v6354_v59 }
  0x47   :  { %5353 = vmatmul.mubr.msk.f32.vlgmr.msra.gmra.mrb[8].mxu0 %vm375_vm3, %v811_v24  ;;  %5324 = vmatmul.mubr.msk.f32.gmra.mrb[8].mxu1 %vm375_vm3, %v360_v25  ;;  %v817_v37 = vld [vmem:[%s6042_s13 + $0x38] sm:$0xff]  ;;  %v818_v39 = vld [vmem:[%s6042_s13 + $0x40] sm:$0xff]  ;;  %v819_v41 = vld [vmem:[%s6042_s13 + $0x48] sm:$0xff]  ;;  %v162_v5 = vsub.s32 3, %v6354_v59  ;;  %v169_v8 = vsub.s32 4, %v6354_v59  ;;  %v176_v11 = vsub.s32 5, %v6354_v59 }
  0x48   :  { %5690 = vmatpush3.bf16.msra.mxu0 %v6255_v21  ;;  %5326 = vmatprep.mubr.msk.f32.mxu1 %vm375_vm3, %v361_v26  ;;  %v366_v38 = vld [vmem:[%s6037_s9 + $0x78] sm:$0xff]  ;;  %v822_v40 = vld [vmem:[%s6042_s13 + $0x60] sm:$0xff]  ;;  %v823_v42 = vld [vmem:[%s6042_s13 + $0x68] sm:$0xff]  ;;  %v183_v14 = vsub.s32 6, %v6354_v59  ;;  %s7624_s9 = sld [smem:[#allocation6_spill]]  ;;  %s7721_s6 = sld [smem:[#allocation16_spill]] }
  0x49   :  { %5355 = vmatprep.mubr.msk.f32.mxu0 %vm375_vm3, %v812_v27  ;;  %5692 = vmatprep.subr.bf16.mxu0 %v6272_v28  ;;  %v824_v43 = vld [vmem:[%s6042_s13 + $0x70] sm:$0xff]  ;;  %v1109_v44 = vld [vmem:[%s6132_s12] sm:$0xf]  ;;  %v825_v45 = vld [vmem:[%s6042_s13 + $0x78] sm:$0xff]  ;;  %s7751_s12 = sld [smem:[#allocation17_spill]]  ;;  %s7780_s27 = sld [smem:[#allocation18_spill]] }
  0x4a   :  { %v1188_v46 = vld [vmem:[%s6147_s20] sm:$0xf]  ;;  %v1354_v48 = vld [vmem:[%s6077_s14 + $0x8] sm:$0xff]  ;;  %v820_v50 = vld [vmem:[%s6042_s13 + $0x50] sm:$0xff]  ;;  %s7776_s20 = sld [smem:[#allocation19_spill]] }
  0x4b   :  { %5356 = vmatmul.mubr.msk.f32.gmra.mrb[10].mxu0 %vm375_vm3, %v813_v29  ;;  %5327 = vmatmul.mubr.msk.f32.gmra.mrb[10].mxu1 %vm375_vm3, %v362_v30  ;;  %v1353_v47 = vld [vmem:[%s6077_s14] sm:$0xff]  ;;  %v1355_v51 = vld [vmem:[%s6077_s14 + $0x10] sm:$0xff]  ;;  %v1356_v52 = vld [vmem:[%s6077_s14 + $0x18] sm:$0xff]  ;;  %s7679_s14 = sld [smem:[#allocation10_spill]] }
  0x4c   :  { %5358 = vmatprep.mubr.msk.f32.mxu0 %vm375_vm3, %v814_v31  ;;  %5329 = vmatprep.mubr.msk.f32.mxu1 %vm375_vm3, %v363_v32  ;;  %v6335_v49 = vpack.c.bf16 %v1354_v48, %v1353_v47  ;;  %v821_v53 = vld [vmem:[%s6042_s13 + $0x58] sm:$0xff]  ;;  %v6344_v54 = vpack.c.bf16 %v1356_v52, %v1355_v51  ;;  %v1820_v55 = vld [vmem:[%s7621_s0] sm:$0xff]  ;;  %v1821_v56 = vld [vmem:[%s7621_s0 + $0x8] sm:$0xff]  ;;  %s7633_s13 = sld [smem:[#allocation9_spill]] }
  0x4d   :  { %5694 = vmatpush3.bf16.msra.mxu0 %v6272_v28  ;;  %v6351_v57 = vpack.c.bf16 %v1821_v56, %v1820_v55  ;;  %v137_v60 = vld [vmem:[%s7622_s5] sm:$0xff]  ;;  %v138_v0 = vld [vmem:[%s7622_s5 + $0x8] sm:$0xff]  ;;  %v1822_v31 = vld [vmem:[%s7621_s0 + $0x10] sm:$0xff] }
  0x4e   :  { %7623 = vst [vmem:[#allocation20_spill] sm:$0xff] %v6344_v54  ;;  %v149_v3 = vrot.slane %v137_v60, %v148_v63  ;;  %v198_v4 = vrot.slane %v138_v0, %v6358_v61  ;;  %v205_v6 = vrot.slane %v138_v0, %v148_v63  ;;  %v163_v7 = vrot.slane %v137_v60, %v162_v5  ;;  %v4995_v23 = vld [vmem:[%s7624_s9] ss:$0 sm:$0xff]  ;;  %v1823_v32 = vld [vmem:[%s7621_s0 + $0x18] sm:$0xff] }
  0x4f   :  { %5359 = vmatmul.mubr.msk.f32.gmra.mrb[12].mxu0 %vm375_vm3, %v815_v33  ;;  %5330 = vmatmul.mubr.msk.f32.gmra.mrb[12].mxu1 %vm375_vm3, %v364_v34  ;;  %v212_v9 = vrot.slane %v138_v0, %v155_v62  ;;  %v170_v10 = vrot.slane %v137_v60, %v169_v8  ;;  %v219_v12 = vrot.slane %v138_v0, %v162_v5 }
  0x50   :  { %5361 = vmatprep.mubr.msk.f32.mxu0 %vm375_vm3, %v816_v35  ;;  %5332 = vmatprep.mubr.msk.f32.mxu1 %vm375_vm3, %v365_v36  ;;  %v177_v13 = vrot.slane %v137_v60, %v176_v11  ;;  %v226_v15 = vrot.slane %v138_v0, %v169_v8  ;;  %v184_v16 = vrot.slane %v137_v60, %v183_v14 }
  0x51   :  { %5704 = vmatprep.subr.bf16.mxu0 %v6351_v57  ;;  %v233_v18 = vrot.slane %v138_v0, %v176_v11  ;;  %v240_v20 = vrot.slane %v138_v0, %v183_v14 }
  0x53   :  { %5362 = vmatmul.mubr.msk.f32.gmra.mrb[14].mxu0 %vm375_vm3, %v817_v37  ;;  %5333 = vmatmul.mubr.msk.f32.gmra.mrb[14].mxu1 %vm375_vm3, %v366_v38  ;;  %v6379_v37 = vpack.c.bf16 %v1823_v32, %v1822_v31 }
  0x54   :  { %5364 = vmatprep.mubr.msk.f32.mxu0 %vm375_vm3, %v818_v39  ;;  %5370 = vmatprep.mubr.msk.f32.mxu1 %vm375_vm3, %v822_v40 }
  0x55   :  { %7626 = vst [vmem:[#allocation22_spill] sm:$0xff] %v6379_v37 }
  0x57   :  { %5365 = vmatmul.mubr.msk.f32.gmra.mrb[16].mxu0 %vm375_vm3, %v819_v41  ;;  %5371 = vmatmul.mubr.msk.f32.vlgmr.msra.gmra.mrb[16].mxu1 %vm375_vm3, %v823_v42 }
  0x58   :  { %5373 = vmatprep.mubr.msk.f32.mxu1 %vm375_vm3, %v824_v43  ;;  %5377 = vmatpush3.msk.msra.mxu1 %vm266_vm0, %v6244_v17  ;;  %v190_v17 = vsub.s32 7, %v6354_v59 }
  0x59   :  { %5381 = vmatprep.subr.msk.mxu1 %vm266_vm0, %v1109_v44  ;;  %5367 = vmatprep.mubr.msk.f32.mxu0 %vm375_vm3, %v820_v50 }
  0x5a   :  { %v191_v19 = vrot.slane %v137_v60, %v190_v17  ;;  %v247_v22 = vrot.slane %v138_v0, %v190_v17 }
  0x5b   :  { %5374 = vmatmul.mubr.msk.f32.gmra.mrb[18].mxu1 %vm375_vm3, %v825_v45  ;;  %5368 = vmatmul.mubr.msk.f32.gmra.mrb[18].mxu0 %vm375_vm3, %v821_v53 }
  0x5c   :  { %5378 = vmatprep.mubr.msk.f32.mxu1 %vm259_vm1, %v6196_v1 }
  0x5f   :  { %5379 = vmatmul.mubr.msk.f32.vlgmr.msra.gmra.mrb[20].mxu1 %vm259_vm1, %v6199_v2 }
  0x60   :  { %5382 = vmatpush3.msk.msra.mxu1 %vm266_vm0, %v1109_v44  ;;  %5383 = vmatprep.mubr.msk.f32.mxu1 %vm259_vm1, %v6196_v1 }
  0x61   :  { %5386 = vmatprep.subr.msk.mxu1 %vm266_vm0, %v1188_v46 }
  0x63   :  { %5384 = vmatmul.mubr.msk.f32.vlgmr.msra.gmra.mrb[22].mxu1 %vm259_vm1, %v6199_v2 }
  0x64   :  { %5387 = vmatpush3.msk.msra.mxu1 %vm266_vm0, %v1188_v46  ;;  %5388 = vmatprep.mubr.msk.f32.mxu1 %vm259_vm1, %v6196_v1  ;;  %v142_v1 = vrot.slane %v137_v60, %v6358_v61 }
  0x65   :  { %5696 = vmatprep.subr.bf16.mxu1 %v6335_v49 }
  0x66   :  { %144 = vbcast.lane.b32.xlu0 %v142_v1, 256 }
  0x67   :  { %5389 = vmatmul.mubr.msk.f32.vlgmr.msra.gmra.mrb[24].mxu1 %vm259_vm1, %v6199_v2  ;;  %v156_v2 = vrot.slane %v137_v60, %v155_v62 }
  0x68   :  { %5698 = vmatpush3.bf16.msra.mxu1 %v6335_v49 }
  0x69   :  { %5700 = vmatprep.subr.bf16.mxu1 %v6344_v54  ;;  %158 = vbcast.lane.b32.xlu1 %v156_v2, 256 }
  0x6a   :  { %151 = vbcast.lane.b32.xlu0 %v149_v3, 256 }
  0x6c   :  { %5702 = vmatpush3.bf16.msra.mxu1 %v6344_v54 }
  0x6d   :  { %200 = vbcast.lane.b32.xlu1 %v198_v4, 256 }
  0x6e   :  { %207 = vbcast.lane.b32.xlu0 %v205_v6, 256 }
  0x71   :  { %165 = vbcast.lane.b32.xlu1 %v163_v7, 256 }
  0x72   :  { %214 = vbcast.lane.b32.xlu0 %v212_v9, 256 }
  0x75   :  { %172 = vbcast.lane.b32.xlu1 %v170_v10, 256 }
  0x76   :  { %221 = vbcast.lane.b32.xlu0 %v219_v12, 256 }
  0x79   :  { %179 = vbcast.lane.b32.xlu1 %v177_v13, 256 }
  0x7a   :  { %228 = vbcast.lane.b32.xlu0 %v226_v15, 256 }
  0x7d   :  { %186 = vbcast.lane.b32.xlu1 %v184_v16, 256 }
  0x7e   :  { %235 = vbcast.lane.b32.xlu0 %v233_v18, 256 }
  0x81   :  { %193 = vbcast.lane.b32.xlu1 %v191_v19, 256 }
  0x82   :  { %242 = vbcast.lane.b32.xlu0 %v240_v20, 256 }
  0x85   :  { %249 = vbcast.lane.b32.xlu1 %v247_v22, 256  ;;  %v1899_v22 = vld [vmem:[%s7633_s13] sm:$0xff] }
 0x108   :  { %v5308_v24 = vpop.f32.mrb[0].mxu0 }
 0x109   :  { %v342_v25 = vadd.f32 %v5308_v24, %v4995_v23  ;;  %v336_v26 = vpop.f32.mrb[1].mxu0 }
 0x10a   :  { %v337_v27 = vadd.f32 %v4995_v23, %v336_v26  ;;  %v6371_v29 = vpop.f32.mrb[0].mxu1  ;;  %v1900_v23 = vld [vmem:[%s7633_s13 + $0x8] sm:$0xff]  ;;  %v1902_v26 = vld [vmem:[%s7633_s13 + $0x18] sm:$0xff] }
 0x10b   :  { %v348_v30 = vmul.f32 0.1, %v342_v25  ;;  %v6375_v33 = vpop.f32.mrb[1].mxu1  ;;  %vm346_vm4 = vcmp.ge.f32.partialorder %v342_v25, 0.0  ;;  %v6474_v24 = vpack.c.bf16 %v1900_v23, %v1899_v22 }
 0x10c   :  { %vm345_vm5 = vcmp.ge.f32.partialorder %v337_v27, 0.0  ;;  %v347_v34 = vmul.f32 0.1, %v337_v27 }
 0x10d   :  { %v350_v40 = vsel %vm346_vm4, %v342_v25, %v348_v30  ;;  %7648 = vst [vmem:[#allocation43_spill] sm:$0xff] %v6474_v24  ;;  %v1901_v25 = vld [vmem:[%s7633_s13 + $0x10] sm:$0xff]  ;;  %v6019_v30 = vmov 1966171168  }
 0x10e   :  { %v6377_v35 = vpop.f32.mrb[2].mxu0  ;;  %v349_v36 = vsel %vm345_vm5, %v337_v27, %v347_v34  ;;  %v6381_v38 = vpop.f32.mrb[2].mxu1  ;;  %v6479_v27 = vpack.c.bf16 %v1902_v26, %v1901_v25  ;;  %v1436_v31 = vunpack.c.l.s4 %v6019_v30  ;;  %vm1919_vm5 = vcmask 1041409  }
 0x10f   :  { %7625 = vst [vmem:[#allocation21_spill] sm:$0xff] %v6377_v35  ;;  %v6383_v39 = vpop.f32.mrb[3].mxu0  ;;  %5399 = vmatprep.mubr.msk.f32.mxu0 %vm1271_vm6, %v349_v36  ;;  %5410 = vmatprep.mubr.msk.f32.mxu1 %vm1271_vm6, %v349_v36  ;;  %v6387_v41 = vpop.f32.mrb[3].mxu1 }
 0x110   :  { %7627 = vst [vmem:[#allocation23_spill] sm:$0xff] %v6383_v39  ;;  %5400 = vmatmul.mubr.msk.f32.vlgmr.msra.gmra.mrb[20].mxu0 %vm1271_vm6, %v350_v40  ;;  %5411 = vmatmul.mubr.msk.f32.vlgmr.msra.gmra.mrb[26].mxu1 %vm1271_vm6, %v350_v40  ;;  %7649 = vst [vmem:[#allocation44_spill] sm:$0xff] %v6479_v27  ;;  %v1437_v32 = vunpack.c.0.s8 %v1436_v31  ;;  %v6484_v34 = vpop.permute.xlu0 %144  ;;  %v6500_v31 = vld [vmem:[%s7650_s21] ss:$0 sm:$0xff] }
 0x111   :  { %5706 = vmatpush3.bf16.msra.mxu0 %v6351_v57  ;;  %5421 = vmatprep.mubr.msk.f32.mxu0 %vm1271_vm6, %v349_v36 }
 0x112   :  { %v6393_v42 = vpop.f32.mrb[4].mxu0  ;;  %5708 = vmatprep.subr.bf16.mxu0 %v6379_v37  ;;  %v6396_v43 = vpop.f32.mrb[4].mxu1  ;;  %v6487_v36 = vsub.s32 %v1437_v32, %v6354_v59 }
 0x113   :  { %7628 = vst [vmem:[#allocation24_spill] sm:$0xff] %v6393_v42  ;;  %v6398_v44 = vpop.f32.mrb[5].mxu0  ;;  %v6400_v45 = vpop.f32.mrb[5].mxu1 }
 0x114   :  { %7629 = vst [vmem:[#allocation25_spill] sm:$0xff] %v6398_v44 }
 0x115   :  { %5710 = vmatpush3.bf16.msra.mxu0 %v6379_v37 }
 0x116   :  { %v6403_v46 = vpop.f32.mrb[6].mxu0  ;;  %v6405_v47 = vpop.f32.mrb[6].mxu1  ;;  %5712 = vmatprep.subr.bf16.mxu0 %v6474_v24 }
 0x117   :  { %7630 = vst [vmem:[#allocation26_spill] sm:$0xff] %v6403_v46  ;;  %v6407_v48 = vpop.f32.mrb[7].mxu0  ;;  %v6409_v50 = vpop.f32.mrb[7].mxu1 }
 0x118   :  { %7631 = vst [vmem:[#allocation27_spill] sm:$0xff] %v6407_v48  ;;  %5422 = vmatmul.mubr.msk.f32.vlgmr.msra.gmra.mrb[22].mxu0 %vm1271_vm6, %v350_v40 }
 0x119   :  { %5714 = vmatpush3.bf16.msra.mxu0 %v6474_v24 }
 0x11a   :  { %v6412_v51 = vpop.f32.mrb[8].mxu0  ;;  %v6414_v52 = vpop.f32.mrb[8].mxu1  ;;  %5716 = vmatprep.subr.bf16.mxu0 %v6479_v27 }
 0x11b   :  { %v6416_v53 = vpop.f32.mrb[9].mxu0  ;;  %v6418_v55 = vpop.f32.mrb[9].mxu1 }
 0x11d   :  { %5718 = vmatpush3.bf16.msra.mxu0 %v6479_v27 }
 0x11e   :  { %v6420_v56 = vpop.f32.mrb[10].mxu0  ;;  %v6422_v58 = vpop.f32.mrb[10].mxu1 }
 0x11f   :  { %v6424_v60 = vpop.f32.mrb[11].mxu0  ;;  %v6426_v62 = vpop.f32.mrb[11].mxu1 }
 0x122   :  { %v6428_v63 = vpop.f32.mrb[12].mxu0  ;;  %v6430_v0 = vpop.f32.mrb[12].mxu1 }
 0x123   :  { %v6432_v1 = vpop.f32.mrb[13].mxu0  ;;  %v6434_v2 = vpop.f32.mrb[13].mxu1 }
 0x126   :  { %v6436_v3 = vpop.f32.mrb[14].mxu0  ;;  %v6438_v4 = vpop.f32.mrb[14].mxu1 }
 0x127   :  { %v6440_v5 = vpop.f32.mrb[15].mxu0  ;;  %v6442_v6 = vpop.f32.mrb[15].mxu1 }
 0x128   :  { %7632 = vst [vmem:[#allocation28_spill] sm:$0xff] %v6440_v5 }
 0x12a   :  { %v6444_v7 = vpop.f32.mrb[16].mxu0  ;;  %v6446_v8 = vpop.f32.mrb[16].mxu1 }
 0x12b   :  { %7634 = vst [vmem:[#allocation29_spill] sm:$0xff] %v6444_v7  ;;  %7635 = vst [vmem:[#allocation30_spill] sm:$0xff] %v6446_v8  ;;  %v6448_v9 = vpop.f32.mrb[17].mxu0  ;;  %v6450_v10 = vpop.f32.mrb[17].mxu1 }
 0x12c   :  { %7636 = vst [vmem:[#allocation31_spill] sm:$0xff] %v6448_v9  ;;  %7637 = vst [vmem:[#allocation32_spill] sm:$0xff] %v6450_v10  ;;  %v6595_v10 = vadd.f32 %v6430_v0, %v6500_v31 }
 0x12e   :  { %v6452_v11 = vpop.f32.mrb[18].mxu1  ;;  %v6468_v19 = vpop.f32.mrb[18].mxu0  ;;  %7661 = vst [vmem:[#allocation55_spill] sm:$0xff] %v6595_v10 }
 0x12f   :  { %7638 = vst [vmem:[#allocation33_spill] sm:$0xff] %v6452_v11  ;;  %v6454_v12 = vpop.f32.mrb[19].mxu1  ;;  %7646 = vst [vmem:[#allocation41_spill] sm:$0xff] %v6468_v19  ;;  %v6470_v20 = vpop.f32.mrb[19].mxu0 }
 0x130   :  { %7639 = vst [vmem:[#allocation34_spill] sm:$0xff] %v6454_v12  ;;  %7647 = vst [vmem:[#allocation42_spill] sm:$0xff] %v6470_v20 }
 0x132   :  { %v6456_v13 = vpop.f32.mrb[20].mxu1 }
 0x133   :  { %7640 = vst [vmem:[#allocation35_spill] sm:$0xff] %v6456_v13  ;;  %v6458_v14 = vpop.f32.mrb[21].mxu1 }
 0x134   :  { %7641 = vst [vmem:[#allocation36_spill] sm:$0xff] %v6458_v14 }
 0x136   :  { %v6460_v15 = vpop.f32.mrb[22].mxu1 }
 0x137   :  { %7642 = vst [vmem:[#allocation37_spill] sm:$0xff] %v6460_v15  ;;  %v6462_v16 = vpop.f32.mrb[23].mxu1 }
 0x138   :  { %7643 = vst [vmem:[#allocation38_spill] sm:$0xff] %v6462_v16 }
 0x13a   :  { %v6464_v17 = vpop.f32.mrb[24].mxu1 }
 0x13b   :  { %7644 = vst [vmem:[#allocation39_spill] sm:$0xff] %v6464_v17  ;;  %v6466_v18 = vpop.f32.mrb[25].mxu1 }
 0x13c   :  { %7645 = vst [vmem:[#allocation40_spill] sm:$0xff] %v6466_v18  ;;  %v6493_v18 = vpop.permute.xlu1 %158 }
 0x1e3   :  { %v5401_v40 = vpop.f32.mrb[20].mxu0  ;;  %v5412_v22 = vpop.f32.mrb[26].mxu1 }
 0x1e4   :  { %v1350_v23 = vadd.f32 %v5401_v40, %v6377_v35  ;;  %v6491_v25 = vadd.f32 %v5412_v22, %v6393_v42  ;;  %v1344_v26 = vpop.f32.mrb[21].mxu0  ;;  %v1423_v54 = vpop.f32.mrb[27].mxu1 }
 0x1e5   :  { %v1345_v27 = vadd.f32 %v1344_v26, %v6383_v39  ;;  %v6497_v30 = vadd.f32 %v1423_v54, %v6398_v44  ;;  %v6504_v35 = vpop.permute.xlu0 %151  ;;  %v6510_v26 = vadd.f32 %v6371_v29, %v6500_v31  ;;  %v6514_v54 = vadd.f32 %v6500_v31, %v6375_v33 }
 0x1e6   :  { %v1483_v59 = vcombine.high %v1350_v23, %v1350_v23  ;;  %v1490_v32 = vrot.slane %v1350_v23, %v6487_v36 }
 0x1e7   :  { %v1434_v17 = vcombine.high %v1345_v27, %v1345_v27  ;;  %v1441_v40 = vrot.slane %v1345_v27, %v6487_v36  ;;  %7651 = vst [vmem:[#allocation45_spill] sm:$0xff] %v6510_v26  ;;  %7652 = vst [vmem:[#allocation46_spill] sm:$0xff] %v6514_v54 }
 0x1e8   :  { %v1497_v22 = vrot.slane %v1483_v59, %v6487_v36  ;;  %v1498_v42 = vcombine.high %v1490_v32, %v1490_v32  ;;  %v1506_v24 = vrot.slane %v1490_v32, %v6487_v36  ;;  %v6520_v59 = vadd.f32 %v6500_v31, %v6418_v55  ;;  %v6522_v32 = vpop.permute.xlu1 %200 }
 0x1e9   :  { %v1448_v23 = vrot.slane %v1434_v17, %v6487_v36  ;;  %v1449_v37 = vcombine.high %v1441_v40, %v1441_v40  ;;  %v6530_v17 = vadd.f32 %v6396_v43, %v6500_v31  ;;  %v6545_v43 = vadd.f32 %v6500_v31, %v6426_v62  ;;  %v6547_v12 = vpop.permute.xlu0 %207 }
 0x1ea   :  { %v1499_v44 = vcombine.high %v1497_v22, %v1497_v22  ;;  %v1520_v27 = vrot.slane %v1498_v42, %v6487_v36  ;;  %v1528_v39 = vcombine.high %v1506_v24, %v1506_v24  ;;  %7653 = vst [vmem:[#allocation47_spill] sm:$0xff] %v6520_v59  ;;  %v6525_v29 = vrot.slane %v1497_v22, %v6487_v36 }
 0x1eb   :  { %v1567_v16 = vrot.slane %v1506_v24, %v6358_v61  ;;  %v1450_v33 = vcombine.high %v1448_v23, %v1448_v23  ;;  %7654 = vst [vmem:[#allocation48_spill] sm:$0xff] %v6530_v17  ;;  %v6534_v42 = vadd.f32 %v6414_v52, %v6500_v31  ;;  %v1464_v24 = vrot.slane %v1448_v23, %v6487_v36 }
 0x1ec   :  { %v1530_v15 = vcombine.high %v1520_v27, %v1520_v27  ;;  %v1571_v55 = vrot.slane %v1520_v27, %v6358_v61  ;;  %v6538_v20 = vrot.slane %v1499_v44, %v6487_v36  ;;  %v1575_v22 = vrot.slane %v1528_v39, %v6358_v61  ;;  %7656 = vst [vmem:[#allocation50_spill] sm:$0xff] %v6545_v43 }
 0x1ed   :  { %7655 = vst [vmem:[#allocation49_spill] sm:$0xff] %v6534_v42  ;;  %v1620_v19 = vadd.f32 %v1567_v16, %v6520_v59  ;;  %v6551_v11 = vrot.slane %v1441_v40, %v6487_v36  ;;  %v6554_v44 = vrot.slane %v1449_v37, %v6487_v36  ;;  %v1583_v39 = vrot.slane %v6525_v29, %v6358_v61  ;;  %v6603_v8 = vpop.permute.xlu0 %214 }
 0x1ee   :  { %v1579_v52 = vrot.slane %v1530_v15, %v6358_v61  ;;  %v1621_v16 = vadd.f32 %v1571_v55, %v6534_v42  ;;  %v1478_v62 = vrot.slane %v1450_v33, %v6487_v36  ;;  %v6565_v27 = vadd.f32 %v6500_v31, %v6400_v45  ;;  %v6585_v55 = vpop.permute.xlu1 %165  ;;  %7662 = vst [vmem:[#allocation56_spill] sm:$0xff] %v6603_v8 }
 0x1ef   :  { %v6560_v23 = vadd.f32 %v1620_v19, %v6491_v25  ;;  %v6569_v15 = vadd.f32 %v6500_v31, %v6409_v50  ;;  %v6573_v37 = vadd.f32 %v6422_v58, %v6500_v31  ;;  %v6577_v40 = vadd.f32 %v6500_v31, %v6434_v2 }
 0x1f0   :  { %7657 = vst [vmem:[#allocation51_spill] sm:$0xff] %v6565_v27  ;;  %v1587_v19 = vrot.slane %v6538_v20, %v6358_v61  ;;  %v1622_v33 = vadd.f32 %v1575_v22, %v6545_v43  ;;  %v6583_v45 = vadd.f32 %v1621_v16, %v6491_v25  ;;  %v1480_v50 = vcombine.high %v1464_v24, %v1464_v24 }
 0x1f1   :  { %7658 = vst [vmem:[#allocation52_spill] sm:$0xff] %v6569_v15  ;;  %7659 = vst [vmem:[#allocation53_spill] sm:$0xff] %v6573_v37  ;;  %v1623_v42 = vadd.f32 %v1579_v52, %v6573_v37  ;;  %v1535_v58 = vrot.slane %v6551_v11, %v6358_v61  ;;  %v1539_v2 = vrot.slane %v6554_v44, %v6358_v61 }
 0x1f2   :  { %7660 = vst [vmem:[#allocation54_spill] sm:$0xff] %v6577_v40  ;;  %v1551_v59 = vrot.slane %v1464_v24, %v6358_v61  ;;  %v1624_v22 = vadd.f32 %v1583_v39, %v6577_v40  ;;  %v1555_v16 = vrot.slane %v1478_v62, %v6358_v61  ;;  %v1559_v43 = vrot.slane %v1480_v50, %v6358_v61 }
 0x1f3   :  { %v1612_v52 = vadd.f32 %v1535_v58, %v6514_v54  ;;  %v1613_v37 = vadd.f32 %v1539_v2, %v6510_v26  ;;  %v1625_v24 = vadd.f32 %v1587_v19, %v6595_v10  ;;  %v1638_v39 = vadd.f32 %v1622_v33, %v6491_v25 }
 0x1f4   :  { %v1616_v9 = vadd.f32 %v1551_v59, %v6565_v27  ;;  %v1617_v7 = vadd.f32 %v1555_v16, %v6530_v17  ;;  %v1618_v0 = vadd.f32 %v1559_v43, %v6569_v15  ;;  %v1639_v59 = vadd.f32 %v1623_v42, %v6491_v25  ;;  %v6617_v27 = vpop.permute.xlu1 %172  ;;  %v6622_v42 = vpop.permute.xlu0 %221 }
 0x1f5   :  { %v6610_v40 = vadd.f32 %v1612_v52, %v6497_v30  ;;  %v6613_v50 = vadd.f32 %v1613_v37, %v6497_v30  ;;  %vm1654_vm7 = vcmp.ge.f32.partialorder %v1638_v39, 0.0  ;;  %v1670_v2 = vmul.f32 0.01, %v1638_v39  ;;  %7663 = vst [vmem:[#allocation57_spill] sm:$0xff] %v6622_v42 }
 0x1f6   :  { %v1632_v58 = vadd.f32 %v1616_v9, %v6497_v30  ;;  %v1633_v19 = vadd.f32 %v1617_v7, %v6497_v30  ;;  %v1640_v43 = vadd.f32 %v1624_v22, %v6491_v25  ;;  %vm1655_vm9 = vcmp.ge.f32.partialorder %v1639_v59, 0.0 }
 0x1f7   :  { %v1671_v16 = vmul.f32 0.01, %v1639_v59  ;;  %v1482_v52 = vcombine.high %v1478_v62, %v1478_v62  ;;  %v1686_v10 = vsel %vm1654_vm7, %v1638_v39, %v1670_v2  ;;  %v1634_v22 = vadd.f32 %v1618_v0, %v6497_v30 }
 0x1f8   :  { %vm1648_vm8 = vcmp.ge.f32.partialorder %v1632_v58, 0.0  ;;  %v1664_v33 = vmul.f32 0.01, %v1632_v58  ;;  %vm1649_vm10 = vcmp.ge.f32.partialorder %v1633_v19, 0.0  ;;  %v1665_v37 = vmul.f32 0.01, %v1633_v19  ;;  %v6631_v2 = vpop.permute.xlu1 %179 }
 0x1f9   :  { %v1702_v9 = vmul.f32 %v1686_v10, %v6603_v8  ;;  %v1687_v17 = vsel %vm1655_vm9, %v1639_v59, %v1671_v16  ;;  %v1672_v26 = vmul.f32 0.01, %v1640_v43  ;;  %vm1656_vm11 = vcmp.ge.f32.partialorder %v1640_v43, 0.0  ;;  %7664 = vst [vmem:[#allocation58_spill] sm:$0xff] %v6631_v2 }
 0x1fa   :  { %v1680_v15 = vsel %vm1648_vm8, %v1632_v58, %v1664_v33  ;;  %v1681_v7 = vsel %vm1649_vm10, %v1633_v19, %v1665_v37  ;;  %v6627_v5 = vadd.f32 %v1625_v24, %v6491_v25  ;;  %v1703_v39 = vmul.f32 %v1687_v17, %v6622_v42  ;;  %v6644_v33 = vpop.permute.xlu0 %228 }
 0x1fb   :  { %v1696_v54 = vmul.f32 %v1680_v15, %v6617_v27  ;;  %v1778_v62 = vsel %vm1271_vm6, %v1702_v9, 0.0  ;;  %v1479_v10 = vcombine.high %v6551_v11, %v6551_v11  ;;  %v1697_v58 = vmul.f32 %v1681_v7, %v6631_v2  ;;  %7666 = vst [vmem:[#allocation60_spill] sm:$0xff] %v6644_v33 }
 0x1fc   :  { %v1688_v59 = vsel %vm1656_vm11, %v1640_v43, %v1672_v26  ;;  %v1481_v15 = vcombine.high %v6554_v44, %v6554_v44  ;;  %v1563_v0 = vrot.slane %v1482_v52, %v6358_v61  ;;  %v6642_v19 = vadd.f32 %v6405_v47, %v6500_v31  ;;  %v6666_v42 = vpop.permute.xlu1 %186 }
 0x1fd   :  { %v1736_v24 = vsel %vm1271_vm6, %v1696_v54, 0.0  ;;  %v1779_v17 = vrot.slane %v1778_v62, 4  ;;  %v1666_v16 = vmul.f32 0.01, %v1634_v22  ;;  %v1529_v11 = vcombine.high %v6525_v29, %v6525_v29  ;;  %7669 = vst [vmem:[#allocation63_spill] sm:$0xff] %v6666_v42 }
 0x1fe   :  { %7665 = vst [vmem:[#allocation59_spill] sm:$0xff] %v6642_v19  ;;  %v1785_v26 = vsel %vm1271_vm6, %v1703_v39, 0.0  ;;  %v1704_v43 = vmul.f32 %v1688_v59, %v6644_v33  ;;  %vm1650_vm12 = vcmp.ge.f32.partialorder %v1634_v22, 0.0  ;;  %v1531_v44 = vcombine.high %v6538_v20, %v6538_v20 }
 0x1ff   :  { %v1543_v54 = vrot.slane %v1479_v10, %v6358_v61  ;;  %v1737_v52 = vrot.slane %v1736_v24, 4  ;;  %v1743_v47 = vsel %vm1271_vm6, %v1697_v58, 0.0  ;;  %v1547_v37 = vrot.slane %v1481_v15, %v6358_v61 }
 0x200   :  { %v1619_v9 = vadd.f32 %v1563_v0, %v6642_v19  ;;  %v6658_v29 = vadd.f32 %v6500_v31, %v6387_v41  ;;  %v1780_v7 = vadd.f32 %v1779_v17, %v1778_v62  ;;  %v1786_v39 = vrot.slane %v1785_v26, 4 }
 0x201   :  { %v1682_v59 = vsel %vm1650_vm12, %v1634_v22, %v1666_v16  ;;  %v6662_v33 = vadd.f32 %v6381_v38, %v6500_v31  ;;  %v1591_v20 = vrot.slane %v1529_v11, %v6358_v61  ;;  %v1744_v10 = vrot.slane %v1743_v47, 4 }
 0x202   :  { %7667 = vst [vmem:[#allocation61_spill] sm:$0xff] %v6658_v29  ;;  %v1792_v58 = vsel %vm1271_vm6, %v1704_v43, 0.0  ;;  %v1595_v15 = vrot.slane %v1531_v44, %v6358_v61  ;;  %v1614_v0 = vadd.f32 %v1543_v54, %v6658_v29  ;;  %v1738_v41 = vadd.f32 %v1737_v52, %v1736_v24 }
 0x203   :  { %7668 = vst [vmem:[#allocation62_spill] sm:$0xff] %v6662_v33  ;;  %v1635_v62 = vadd.f32 %v1619_v9, %v6497_v30  ;;  %v6673_v22 = vadd.f32 %v6438_v4, %v6500_v31  ;;  %v6677_v38 = vadd.f32 %v6500_v31, %v6442_v6  ;;  %v1615_v17 = vadd.f32 %v1547_v37, %v6662_v33 }
 0x204   :  { %v1698_v16 = vmul.f32 %v1682_v59, %v6666_v42  ;;  %v1781_v11 = vrot.slane %v1780_v7, 2  ;;  %v1787_v43 = vadd.f32 %v1786_v39, %v1785_v26  ;;  %v1793_v44 = vrot.slane %v1792_v58, 4  ;;  %v6687_v59 = vpop.permute.xlu1 %193 }
 0x205   :  { %7670 = vst [vmem:[#allocation64_spill] sm:$0xff] %v6673_v22  ;;  %7671 = vst [vmem:[#allocation65_spill] sm:$0xff] %v6677_v38  ;;  %vm1657_vm13 = vcmp.ge.f32.partialorder %v6627_v5, 0.0  ;;  %v1745_v24 = vadd.f32 %v1744_v10, %v1743_v47  ;;  %vm1651_vm14 = vcmp.ge.f32.partialorder %v1635_v62, 0.0  ;;  %v1667_v54 = vmul.f32 0.01, %v1635_v62 }
 0x206   :  { %v1626_v52 = vadd.f32 %v1591_v20, %v6677_v38  ;;  %v1739_v4 = vrot.slane %v1738_v41, 2  ;;  %v1673_v9 = vmul.f32 0.01, %v6627_v5  ;;  %v1627_v6 = vadd.f32 %v1595_v15, %v6673_v22  ;;  %7672 = vst [vmem:[#allocation66_spill] sm:$0xff] %v6687_v59 }
 0x207   :  { %v1630_v31 = vadd.f32 %v1614_v0, %v6497_v30  ;;  %v1750_v37 = vsel %vm1271_vm6, %v1698_v16, 0.0  ;;  %v1683_v26 = vsel %vm1651_vm14, %v1635_v62, %v1667_v54  ;;  %v1631_v47 = vadd.f32 %v1615_v17, %v6497_v30  ;;  %v6697_v0 = vpop.permute.xlu0 %235 }
 0x208   :  { %v1642_v39 = vadd.f32 %v1626_v52, %v6491_v25  ;;  %v1699_v10 = vmul.f32 %v1683_v26, %v6687_v59  ;;  %v1643_v20 = vadd.f32 %v1627_v6, %v6491_v25  ;;  %v6693_v38 = vadd.f32 %v1781_v11, %v1780_v7  ;;  %7673 = vst [vmem:[#allocation67_spill] sm:$0xff] %v6697_v0 }
 0x209   :  { %v1788_v19 = vrot.slane %v1787_v43, 2  ;;  %v1746_v33 = vrot.slane %v1745_v24, 2  ;;  %v6695_v15 = vadd.f32 %v1793_v44, %v1792_v58  ;;  %v1740_v16 = vadd.f32 %v1739_v4, %v1738_v41 }
 0x20a   :  { %v1751_v22 = vrot.slane %v1750_v37, 4  ;;  %v1689_v62 = vsel %vm1657_vm13, %v6627_v5, %v1673_v9  ;;  %vm1644_vm15 = vcmp.ge.f32.partialorder %v6610_v40, 0.0  ;;  %vm1658_vm0 = vcmp.ge.f32.partialorder %v1642_v39, 0.0 }
 0x20b   :  { %v1674_v30 = vmul.f32 0.01, %v1642_v39  ;;  %vm1645_vm1 = vcmp.ge.f32.partialorder %v6613_v50, 0.0  ;;  %v1660_v25 = vmul.f32 0.01, %v6610_v40  ;;  %v1757_v7 = vsel %vm1271_vm6, %v1699_v10, 0.0  ;;  %v6714_v6 = vpop.permute.xlu0 %242 }
 0x20c   :  { %v1675_v58 = vmul.f32 0.01, %v1643_v20  ;;  %vm1646_vm2 = vcmp.ge.f32.partialorder %v1630_v31, 0.0  ;;  %v1661_v17 = vmul.f32 0.01, %v6613_v50  ;;  %v6707_v41 = vadd.f32 %v1788_v19, %v1787_v43  ;;  %7674 = vst [vmem:[#allocation68_spill] sm:$0xff] %v6714_v6 }
 0x20d   :  { %vm1647_vm3 = vcmp.ge.f32.partialorder %v1631_v47, 0.0  ;;  %v1662_v11 = vmul.f32 0.01, %v1630_v31  ;;  %v1663_v44 = vmul.f32 0.01, %v1631_v47  ;;  %v1705_v5 = vmul.f32 %v1689_v62, %v6697_v0  ;;  %v6719_v0 = vpop.permute.xlu1 %249 }
 0x20e   :  { %vm1659_vm4 = vcmp.ge.f32.partialorder %v1643_v20, 0.0  ;;  %v1676_v54 = vsel %vm1644_vm15, %v6610_v40, %v1660_v25  ;;  %v1677_v52 = vsel %vm1645_vm1, %v6613_v50, %v1661_v17  ;;  %v6712_v4 = vadd.f32 %v1746_v33, %v1745_v24  ;;  %7675 = vst [vmem:[#allocation69_spill] sm:$0xff] %v6719_v0 }
 0x20f   :  { %v1758_v9 = vrot.slane %v1757_v7, 4  ;;  %v1690_v26 = vsel %vm1658_vm0, %v1642_v39, %v1674_v30  ;;  %v1678_v10 = vsel %vm1646_vm2, %v1630_v31, %v1662_v11  ;;  %v1752_v19 = vadd.f32 %v1751_v22, %v1750_v37 }
 0x210   :  { %v1679_v43 = vsel %vm1647_vm3, %v1631_v47, %v1663_v44  ;;  %v1692_v29 = vmul.f32 %v1676_v54, %v6484_v34  ;;  %v1693_v8 = vmul.f32 %v1677_v52, %v6504_v35  ;;  %v1741_v62 = vrot.slane %v1740_v16, 1 }
 0x211   :  { %v1691_v40 = vsel %vm1659_vm4, %v1643_v20, %v1675_v58  ;;  %v1694_v50 = vmul.f32 %v1678_v10, %v6493_v18  ;;  %v1695_v33 = vmul.f32 %v1679_v43, %v6585_v55  ;;  %v1799_v24 = vsel %vm1271_vm6, %v1705_v5, 0.0 }
 0x212   :  { %v1706_v25 = vmul.f32 %v1690_v26, %v6714_v6  ;;  %v1708_v31 = vsel %vm1271_vm6, %v1692_v29, 0.0  ;;  %v1715_v22 = vsel %vm1271_vm6, %v1693_v8, 0.0  ;;  %v1759_v37 = vadd.f32 %v1758_v9, %v1757_v7 }
 0x213   :  { %v1709_v39 = vrot.slane %v1708_v31, 4  ;;  %v1716_v47 = vrot.slane %v1715_v22, 4  ;;  %v1722_v30 = vsel %vm1271_vm6, %v1694_v50, 0.0  ;;  %v1753_v17 = vrot.slane %v1752_v19, 2 }
 0x214   :  { %v1707_v20 = vmul.f32 %v1691_v40, %v6719_v0  ;;  %v1723_v58 = vrot.slane %v1722_v30, 4  ;;  %v1729_v11 = vsel %vm1271_vm6, %v1695_v33, 0.0  ;;  %v1748_v44 = vrot.slane %v6712_v4, 1 }
 0x215   :  { %v1710_v5 = vadd.f32 %v1709_v39, %v1708_v31  ;;  %v1717_v54 = vadd.f32 %v1716_v47, %v1715_v22  ;;  %v1730_v52 = vrot.slane %v1729_v11, 4  ;;  %vm1921_vm7 = vcmask 1042434  }
 0x216   :  { %v1742_v29 = vadd.f32 %v1741_v62, %v1740_v16  ;;  %v1800_v8 = vrot.slane %v1799_v24, 4  ;;  %v1806_v7 = vsel %vm1271_vm6, %v1706_v25, 0.0  ;;  %v1724_v9 = vadd.f32 %v1723_v58, %v1722_v30 }
 0x217   :  { %vm1923_vm8 = vcmask 1043459   ;;  %v1760_v26 = vrot.slane %v1759_v37, 2  ;;  %v1711_v10 = vrot.slane %v1710_v5, 2  ;;  %v1718_v43 = vrot.slane %v1717_v54, 2 }
 0x218   :  { %v1731_v40 = vadd.f32 %v1730_v52, %v1729_v11  ;;  %vm1925_vm9 = vcmask 1044484   ;;  %v1754_v50 = vadd.f32 %v1753_v17, %v1752_v19  ;;  %v1813_v33 = vsel %vm1271_vm6, %v1707_v20, 0.0 }
 0x219   :  { %v1725_v0 = vrot.slane %v1724_v9, 2  ;;  %vm1927_vm10 = vcmask 1045509   ;;  %vm1652_vm11 = vcmp.ge.f32.partialorder %v6560_v23, 0.0  ;;  %v1712_v31 = vadd.f32 %v1711_v10, %v1710_v5 }
 0x21a   :  { %v1719_v22 = vadd.f32 %v1718_v43, %v1717_v54  ;;  %v1732_v16 = vrot.slane %v1731_v40, 2  ;;  %vm1929_vm12 = vcmask 1046534   ;;  %vm1653_vm13 = vcmp.ge.f32.partialorder %v6583_v45, 0.0 }
 0x21b   :  { %v1807_v62 = vrot.slane %v1806_v7, 4  ;;  %v1726_v25 = vadd.f32 %v1725_v0, %v1724_v9  ;;  %vm1931_vm14 = vcmask 1047559   ;;  %v1668_v39 = vmul.f32 0.01, %v6560_v23 }
 0x21c   :  { %v1669_v47 = vmul.f32 0.01, %v6583_v45  ;;  %v1713_v19 = vrot.slane %v1712_v31, 1  ;;  %v1720_v30 = vrot.slane %v1719_v22, 1  ;;  %v1733_v17 = vadd.f32 %v1732_v16, %v1731_v40 }
 0x21d   :  { %v1761_v20 = vadd.f32 %v1760_v26, %v1759_v37  ;;  %v1814_v58 = vrot.slane %v1813_v33, 4  ;;  %v1727_v11 = vrot.slane %v1726_v25, 1  ;;  %v1684_v5 = vsel %vm1652_vm11, %v6560_v23, %v1668_v39 }
 0x21e   :  { %v1685_v54 = vsel %vm1653_vm13, %v6583_v45, %v1669_v47  ;;  %v1714_v52 = vadd.f32 %v1713_v19, %v1712_v31  ;;  %v1721_v10 = vadd.f32 %v1720_v30, %v1719_v22  ;;  %v1734_v0 = vrot.slane %v1733_v17, 1 }
 0x21f   :  { %v1700_v9 = vmul.f32 %v1684_v5, %v6522_v32  ;;  %v1801_v43 = vadd.f32 %v1800_v8, %v1799_v24  ;;  %v1728_v6 = vadd.f32 %v1727_v11, %v1726_v25  ;;  %v1755_v59 = vrot.slane %v1754_v50, 1 }
 0x220   :  { %v1701_v42 = vmul.f32 %v1685_v54, %v6547_v12  ;;  %v1735_v40 = vadd.f32 %v1734_v0, %v1733_v17  ;;  %v1762_v37 = vrot.slane %v1761_v20, 1  ;;  %v1920_v26 = vsel %vm1919_vm5, %v1721_v10, %v1714_v52 }
 0x221   :  { %v1764_v16 = vsel %vm1271_vm6, %v1700_v9, 0.0  ;;  %v1808_v2 = vadd.f32 %v1807_v62, %v1806_v7  ;;  %v1922_v23 = vsel %vm1921_vm7, %v1728_v6, %v1920_v26  ;;  %v1815_v22 = vadd.f32 %v1814_v58, %v1813_v33 }
 0x222   :  { %v1765_v45 = vrot.slane %v1764_v16, 4  ;;  %v1771_v31 = vsel %vm1271_vm6, %v1701_v42, 0.0  ;;  %v1749_v39 = vadd.f32 %v1748_v44, %v6712_v4  ;;  %v1924_v24 = vsel %vm1923_vm8, %v1735_v40, %v1922_v23 }
 0x223   :  { %v1772_v8 = vrot.slane %v1771_v31, 4  ;;  %v1795_v25 = vrot.slane %v6695_v15, 2  ;;  %v1756_v47 = vadd.f32 %v1755_v59, %v1754_v50  ;;  %v1926_v19 = vsel %vm1925_vm9, %v1742_v29, %v1924_v24 }
 0x224   :  { %v1766_v30 = vadd.f32 %v1765_v45, %v1764_v16  ;;  %v1802_v17 = vrot.slane %v1801_v43, 2  ;;  %v1763_v11 = vadd.f32 %v1762_v37, %v1761_v20  ;;  %v1928_v7 = vsel %vm1927_vm10, %v1749_v39, %v1926_v19 }
 0x225   :  { %v1773_v6 = vadd.f32 %v1772_v8, %v1771_v31  ;;  %v1809_v62 = vrot.slane %v1808_v2, 2  ;;  %v1930_v42 = vsel %vm1929_vm12, %v1756_v47, %v1928_v7  ;;  %v1816_v58 = vrot.slane %v1815_v22, 2  ;;  %v2588_v7 = vld [vmem:[%s7677_s3] sm:$0xff] }
 0x226   :  { %v1767_v33 = vrot.slane %v1766_v30, 2  ;;  %v1932_v4 = vsel %vm1931_vm14, %v1763_v11, %v1930_v42  ;;  %v1783_v5 = vrot.slane %v6693_v38, 1  ;;  %v1796_v59 = vadd.f32 %v1795_v25, %v6695_v15  ;;  %v2038_v42 = vld [vmem:[%s7676_s29 + $0x10] sm:$0xff] }
 0x227   :  { %v1774_v44 = vrot.slane %v1773_v6, 2  ;;  %5432 = vmatprep.mubr.msk.f32.mxu0 %vm1271_vm6, %v1932_v4  ;;  %v1790_v50 = vrot.slane %v6707_v41, 1  ;;  %v1803_v20 = vadd.f32 %v1802_v17, %v1801_v43  ;;  %v1810_v52 = vadd.f32 %v1809_v62, %v1808_v2  ;;  %v2037_v17 = vld [vmem:[%s7676_s29 + $0x8] sm:$0xff]  ;;  %v2590_v4 = vld [vmem:[%s7677_s3 + $0x10] sm:$0xff] }
 0x228   :  { %v1768_v29 = vadd.f32 %v1767_v33, %v1766_v30  ;;  %v1817_v0 = vadd.f32 %v1816_v58, %v1815_v22  ;;  %v1784_v40 = vadd.f32 %v1783_v5, %v6693_v38  ;;  %v1797_v37 = vrot.slane %v1796_v59, 1  ;;  %v2036_v30 = vld [vmem:[%s7676_s29] sm:$0xff]  ;;  %v2039_v33 = vld [vmem:[%s7676_s29 + $0x18] sm:$0xff] }
 0x229   :  { %v1775_v54 = vadd.f32 %v1774_v44, %v1773_v6  ;;  %v1791_v26 = vadd.f32 %v1790_v50, %v6707_v41  ;;  %v1804_v16 = vrot.slane %v1803_v20, 1  ;;  %v1811_v45 = vrot.slane %v1810_v52, 1  ;;  %v2589_v6 = vld [vmem:[%s7677_s3 + $0x8] sm:$0xff]  ;;  %v2591_v44 = vld [vmem:[%s7677_s3 + $0x18] sm:$0xff] }
 0x22a   :  { %v1769_v10 = vrot.slane %v1768_v29, 1  ;;  %v1818_v31 = vrot.slane %v1817_v0, 1  ;;  %v1798_v2 = vadd.f32 %v1797_v37, %v1796_v59  ;;  %v6770_v11 = vpack.c.bf16 %v2037_v17, %v2036_v30  ;;  %v2121_v59 = vld [vmem:[%s7678_s8] sm:$0xff] }
 0x22b   :  { %v1776_v9 = vrot.slane %v1775_v54, 1  ;;  %v1805_v39 = vadd.f32 %v1804_v16, %v1803_v20  ;;  %v1812_v24 = vadd.f32 %v1811_v45, %v1810_v52  ;;  %v6774_v62 = vpack.c.bf16 %v2589_v6, %v2588_v7  ;;  %v2124_v16 = vld [vmem:[%s7678_s8 + $0x18] sm:$0xff] }
 0x22c   :  { %v1770_v23 = vadd.f32 %v1769_v10, %v1768_v29  ;;  %v1819_v8 = vadd.f32 %v1818_v31, %v1817_v0  ;;  %5720 = vmatprep.subr.bf16.mxu1 %v6770_v11  ;;  %v6782_v58 = vpack.c.bf16 %v2039_v33, %v2038_v42  ;;  %v6786_v5 = vpack.c.bf16 %v2591_v44, %v2590_v4  ;;  %v2122_v29 = vld [vmem:[%s7678_s8 + $0x8] sm:$0xff]  ;;  %v7692_v33 = vld [vmem:[#allocation28_spill] sm:$0xff]  ;;  %v7694_v44 = vld [vmem:[#allocation29_spill] sm:$0xff] }
 0x22d   :  { %v1777_v15 = vadd.f32 %v1776_v9, %v1775_v54  ;;  %5722 = vmatpush3.bf16.msra.mxu1 %v6770_v11  ;;  %5736 = vmatprep.subr.bf16.mxu0 %v6774_v62  ;;  %v6794_v50 = vpack.c.bf16 %v2122_v29, %v2121_v59  ;;  %v5061_v54 = vld [vmem:[%s7679_s14] ss:$0 sm:$0xff] }
 0x22e   :  { %5724 = vmatprep.subr.bf16.mxu1 %v6782_v58 }
 0x22f   :  { %v1933_v43 = vsel %vm1919_vm5, %v1777_v15, %v1770_v23 }
 0x230   :  { %v1934_v22 = vsel %vm1921_vm7, %v1784_v40, %v1933_v43  ;;  %v2667_v43 = vld [vmem:[%s7681_s19] sm:$0xff] }
 0x231   :  { %v1935_v38 = vsel %vm1923_vm8, %v1791_v26, %v1934_v22  ;;  %5726 = vmatpush3.bf16.msra.mxu1 %v6782_v58  ;;  %v2123_v26 = vld [vmem:[%s7678_s8 + $0x10] sm:$0xff] }
 0x232   :  { %v1936_v41 = vsel %vm1925_vm9, %v1798_v2, %v1935_v38  ;;  %5728 = vmatprep.subr.bf16.mxu1 %v6794_v50  ;;  %v6802_v45 = vpack.c.bf16 %v2124_v16, %v2123_v26  ;;  %v2668_v2 = vld [vmem:[%s7681_s19 + $0x8] sm:$0xff]  ;;  %v2669_v22 = vld [vmem:[%s7681_s19 + $0x10] sm:$0xff]  ;;  %v2670_v38 = vld [vmem:[%s7681_s19 + $0x18] sm:$0xff] }
 0x233   :  { %v1937_v25 = vsel %vm1927_vm10, %v1805_v39, %v1936_v41  ;;  %v6821_v39 = vpack.c.bf16 %v2668_v2, %v2667_v43 }
 0x234   :  { %v1938_v47 = vsel %vm1929_vm12, %v1812_v24, %v1937_v25  ;;  %7680 = vst [vmem:[#allocation70_spill] sm:$0xff] %v6802_v45  ;;  %v6824_v24 = vpack.c.bf16 %v2670_v38, %v2669_v22 }
 0x235   :  { %v1939_v19 = vsel %vm1931_vm14, %v1819_v8, %v1938_v47  ;;  %7683 = vst [vmem:[#allocation71_spill] sm:$0xff] %v6821_v39 }
 0x236   :  { %5433 = vmatmul.mubr.msk.f32.vlgmr.msra.gmra.mrb[22].mxu0 %vm1271_vm6, %v1939_v19  ;;  %7684 = vst [vmem:[#allocation72_spill] sm:$0xff] %v6824_v24 }
 0x237   :  { %5738 = vmatpush3.bf16.msra.mxu0 %v6774_v62 }
 0x238   :  { %5740 = vmatprep.subr.bf16.mxu0 %v6786_v5 }
 0x23b   :  { %5742 = vmatpush3.bf16.msra.mxu0 %v6786_v5 }
 0x23c   :  { %5744 = vmatprep.subr.bf16.mxu0 %v6821_v39 }
 0x309   :  { %v5434_v20 = vpop.f32.mrb[22].mxu0 }
 0x30a   :  { %v5889_v52 = vadd.f32 %v5434_v20, %v6403_v46  ;;  %v2010_v10 = vpop.f32.mrb[23].mxu0  ;;  %v7696_v20 = vld [vmem:[#allocation30_spill] sm:$0xff] }
 0x30b   :  { %v5890_v0 = vadd.f32 %v2010_v10, %v6407_v48 }
 0x30c   :  { %v2029_v9 = vadd.f32 %v5889_v52, %v5061_v54  ;;  %v7698_v52 = vld [vmem:[#allocation31_spill] sm:$0xff] }
 0x30d   :  { %v2028_v40 = vadd.f32 %v5890_v0, %v5061_v54 }
 0x30e   :  { %v2033_v37 = vmul.f32 0.01, %v2029_v9  ;;  %vm2031_vm15 = vcmp.ge.f32.partialorder %v2029_v9, 0.0 }
 0x30f   :  { %v2032_v23 = vmul.f32 0.01, %v2028_v40  ;;  %vm2030_vm0 = vcmp.ge.f32.partialorder %v2028_v40, 0.0 }
 0x310   :  { %v2035_v31 = vsel %vm2031_vm15, %v2029_v9, %v2033_v37  ;;  %v7700_v9 = vld [vmem:[#allocation32_spill] sm:$0xff] }
 0x311   :  { %v2034_v15 = vsel %vm2030_vm0, %v2028_v40, %v2032_v23 }
 0x312   :  { %5443 = vmatprep.mubr.msk.f32.mxu1 %vm1271_vm6, %v2034_v15  ;;  %5465 = vmatprep.mubr.msk.f32.mxu0 %vm1271_vm6, %v2034_v15 }
 0x313   :  { %5444 = vmatmul.mubr.msk.f32.vlgmr.msra.gmra.mrb[28].mxu1 %vm1271_vm6, %v2035_v31  ;;  %5466 = vmatmul.mubr.msk.f32.vlgmr.msra.gmra.mrb[24].mxu0 %vm1271_vm6, %v2035_v31 }
 0x314   :  { %5730 = vmatpush3.bf16.msra.mxu1 %v6794_v50  ;;  %5454 = vmatprep.mubr.msk.f32.mxu1 %vm1271_vm6, %v2034_v15 }
 0x315   :  { %5732 = vmatprep.subr.bf16.mxu1 %v6802_v45  ;;  %5746 = vmatpush3.bf16.msra.mxu0 %v6821_v39 }
 0x316   :  { %5748 = vmatprep.subr.bf16.mxu0 %v6824_v24 }
 0x318   :  { %5734 = vmatpush3.bf16.msra.mxu1 %v6802_v45 }
 0x319   :  { %5752 = vmatprep.subr.bf16.mxu1 %v6255_v21  ;;  %5750 = vmatpush3.bf16.msra.mxu0 %v6824_v24 }
 0x31a   :  { %5768 = vmatprep.subr.bf16.mxu0 %v6351_v57 }
 0x31b   :  { %5455 = vmatmul.mubr.msk.f32.vlgmr.msra.gmra.mrb[30].mxu1 %vm1271_vm6, %v2035_v31 }
 0x31c   :  { %5754 = vmatpush3.bf16.msra.mxu1 %v6255_v21  ;;  %v5026_v21 = vld [vmem:[%s7682_s24] ss:$0 sm:$0xff] }
 0x31d   :  { %5756 = vmatprep.subr.bf16.mxu1 %v6272_v28  ;;  %v6833_v41 = vadd.f32 %v6412_v51, %v5026_v21  ;;  %v6837_v47 = vadd.f32 %v5026_v21, %v6416_v53  ;;  %v6840_v19 = vadd.f32 %v6420_v56, %v5026_v21  ;;  %v6843_v30 = vadd.f32 %v5026_v21, %v6424_v60 }
 0x31e   :  { %v6847_v7 = vadd.f32 %v6428_v63, %v5026_v21  ;;  %v6850_v51 = vadd.f32 %v5026_v21, %v6432_v1  ;;  %v6854_v53 = vadd.f32 %v6436_v3, %v5026_v21  ;;  %v6857_v56 = vadd.f32 %v5026_v21, %v7692_v33 }
 0x31f   :  { %7685 = vst [vmem:[#allocation73_spill] sm:$0xff] %v6833_v41  ;;  %7686 = vst [vmem:[#allocation74_spill] sm:$0xff] %v6837_v47  ;;  %v6861_v59 = vadd.f32 %v7694_v44, %v5026_v21  ;;  %v6866_v54 = vadd.f32 %v7696_v20, %v5026_v21  ;;  %v6869_v3 = vadd.f32 %v5026_v21, %v7698_v52  ;;  %v7704_v44 = vld [vmem:[#allocation34_spill] sm:$0xff] }
 0x320   :  { %5758 = vmatpush3.bf16.msra.mxu1 %v6272_v28  ;;  %7687 = vst [vmem:[#allocation75_spill] sm:$0xff] %v6840_v19  ;;  %7688 = vst [vmem:[#allocation76_spill] sm:$0xff] %v6843_v30  ;;  %v6873_v40 = vadd.f32 %v5026_v21, %v7700_v9 }
 0x321   :  { %5760 = vmatprep.subr.bf16.mxu1 %v6335_v49  ;;  %7689 = vst [vmem:[#allocation77_spill] sm:$0xff] %v6847_v7  ;;  %7690 = vst [vmem:[#allocation78_spill] sm:$0xff] %v6850_v51 }
 0x322   :  { %7691 = vst [vmem:[#allocation79_spill] sm:$0xff] %v6854_v53  ;;  %7693 = vst [vmem:[#allocation28_spill] sm:$0xff] %v6857_v56 }
 0x323   :  { %7695 = vst [vmem:[#allocation29_spill] sm:$0xff] %v6861_v59  ;;  %7697 = vst [vmem:[#allocation30_spill] sm:$0xff] %v6866_v54 }
 0x324   :  { %7699 = vst [vmem:[#allocation31_spill] sm:$0xff] %v6869_v3  ;;  %7701 = vst [vmem:[#allocation32_spill] sm:$0xff] %v6873_v40 }
 0x3e6   :  { %v5445_v28 = vpop.f32.mrb[28].mxu1 }
 0x3e7   :  { %v2118_v8 = vadd.f32 %v5445_v28, %v6456_v13  ;;  %v2112_v25 = vpop.f32.mrb[29].mxu1 }
 0x3e8   :  { %v2113_v17 = vadd.f32 %v2112_v25, %v6458_v14 }
 0x3e9   :  { %v2251_v6 = vcombine.high %v2118_v8, %v2118_v8  ;;  %v2258_v42 = vrot.slane %v2118_v8, %v6487_v36 }
 0x3ea   :  { %v2202_v4 = vcombine.high %v2113_v17, %v2113_v17  ;;  %v2209_v60 = vrot.slane %v2113_v17, %v6487_v36  ;;  %v7702_v17 = vld [vmem:[#allocation33_spill] sm:$0xff] }
 0x3eb   :  { %v2265_v63 = vrot.slane %v2251_v6, %v6487_v36  ;;  %v2266_v29 = vcombine.high %v2258_v42, %v2258_v42  ;;  %v2274_v1 = vrot.slane %v2258_v42, %v6487_v36  ;;  %v6882_v6 = vadd.f32 %v7702_v17, %v5026_v21 }
 0x3ec   :  { %v2216_v10 = vrot.slane %v2202_v4, %v6487_v36  ;;  %v2217_v0 = vcombine.high %v2209_v60, %v2209_v60  ;;  %v2225_v43 = vrot.slane %v2209_v60, %v6487_v36  ;;  %v7706_v60 = vld [vmem:[#allocation41_spill] sm:$0xff] }
 0x3ed   :  { %v2267_v37 = vcombine.high %v2265_v63, %v2265_v63  ;;  %v2281_v26 = vrot.slane %v2265_v63, %v6487_v36  ;;  %v2288_v16 = vrot.slane %v2266_v29, %v6487_v36  ;;  %v2296_v23 = vcombine.high %v2274_v1, %v2274_v1  ;;  %7703 = vst [vmem:[#allocation33_spill] sm:$0xff] %v6882_v6 }
 0x3ee   :  { %v2335_v15 = vrot.slane %v2274_v1, %v6358_v61  ;;  %v2218_v31 = vcombine.high %v2216_v10, %v2216_v10  ;;  %v5456_v2 = vpop.f32.mrb[30].mxu1  ;;  %v2232_v42 = vrot.slane %v2216_v10, %v6487_v36  ;;  %v2239_v33 = vrot.slane %v2217_v0, %v6487_v36  ;;  %v7708_v1 = vld [vmem:[#allocation42_spill] sm:$0xff] }
 0x3ef   :  { %v2295_v22 = vrot.slane %v2267_v37, %v6487_v36  ;;  %v2297_v38 = vcombine.high %v2281_v26, %v2281_v26  ;;  %v2298_v28 = vcombine.high %v2288_v16, %v2288_v16  ;;  %v2339_v8 = vrot.slane %v2288_v16, %v6358_v61  ;;  %v2191_v25 = vpop.f32.mrb[31].mxu1 }
 0x3f0   :  { %v2246_v4 = vrot.slane %v2218_v31, %v6487_v36  ;;  %v6888_v63 = vadd.f32 %v5026_v21, %v7704_v44  ;;  %v6891_v29 = vadd.f32 %v7706_v60, %v5026_v21  ;;  %v6894_v20 = vadd.f32 %v5026_v21, %v7708_v1 }
 0x3f1   :  { %v2299_v52 = vcombine.high %v2295_v22, %v2295_v22  ;;  %v2343_v9 = vrot.slane %v2296_v23, %v6358_v61  ;;  %v2351_v37 = vrot.slane %v2281_v26, %v6358_v61  ;;  %v2388_v10 = vadd.f32 %v2335_v15, %v6869_v3 }
 0x3f2   :  { %7705 = vst [vmem:[#allocation34_spill] sm:$0xff] %v6888_v63  ;;  %7707 = vst [vmem:[#allocation41_spill] sm:$0xff] %v6891_v29  ;;  %v2247_v16 = vcombine.high %v2225_v43, %v2225_v43  ;;  %v2347_v0 = vrot.slane %v2298_v28, %v6358_v61  ;;  %v2355_v31 = vrot.slane %v2295_v22, %v6358_v61 }
 0x3f3   :  { %7709 = vst [vmem:[#allocation42_spill] sm:$0xff] %v6894_v20  ;;  %v2359_v17 = vrot.slane %v2297_v38, %v6358_v61  ;;  %v2389_v44 = vadd.f32 %v2339_v8, %v6861_v59  ;;  %v2248_v60 = vcombine.high %v2232_v42, %v2232_v42  ;;  %v2249_v14 = vcombine.high %v2239_v33, %v2239_v33 }
 0x3f4   :  { %v2250_v21 = vcombine.high %v2246_v4, %v2246_v4  ;;  %v2303_v1 = vrot.slane %v2225_v43, %v6358_v61  ;;  %v2363_v23 = vrot.slane %v2299_v52, %v6358_v61  ;;  %v2307_v26 = vrot.slane %v2239_v33, %v6358_v61 }
 0x3f5   :  { %v2311_v15 = vrot.slane %v2247_v16, %v6358_v61  ;;  %v2319_v3 = vrot.slane %v2232_v42, %v6358_v61  ;;  %v2315_v28 = vrot.slane %v2249_v14, %v6358_v61  ;;  %v2323_v22 = vrot.slane %v2246_v4, %v6358_v61 }
 0x3f6   :  { %v2327_v38 = vrot.slane %v2248_v60, %v6358_v61  ;;  %v2331_v8 = vrot.slane %v2250_v21, %v6358_v61  ;;  %v2390_v59 = vadd.f32 %v2343_v9, %v6894_v20  ;;  %v6914_v43 = vadd.f32 %v2351_v37, %v6873_v40  ;;  %v7710_v9 = vld [vmem:[#allocation37_spill] sm:$0xff]  ;;  %v7711_v37 = vld [vmem:[#allocation38_spill] sm:$0xff] }
 0x3f7   :  { %v2380_v52 = vadd.f32 %v2303_v1, %v6837_v47  ;;  %v2381_v33 = vadd.f32 %v2307_v26, %v6833_v41  ;;  %v2382_v16 = vadd.f32 %v2311_v15, %v6843_v30  ;;  %v2383_v42 = vadd.f32 %v2315_v28, %v6840_v19 }
 0x3f8   :  { %v2384_v14 = vadd.f32 %v2319_v3, %v6850_v51  ;;  %v2385_v4 = vadd.f32 %v2323_v22, %v6847_v7  ;;  %v2386_v60 = vadd.f32 %v2327_v38, %v6857_v56  ;;  %v2387_v21 = vadd.f32 %v2331_v8, %v6854_v53 }
 0x3f9   :  { %v6925_v20 = vadd.f32 %v5456_v2, %v7710_v9  ;;  %v2192_v40 = vadd.f32 %v2191_v25, %v7711_v37  ;;  %v2391_v1 = vadd.f32 %v2347_v0, %v6891_v29  ;;  %v6930_v26 = vadd.f32 %v2355_v31, %v6866_v54 }
 0x3fa   :  { %v6933_v15 = vadd.f32 %v2359_v17, %v6888_v63  ;;  %v6936_v3 = vadd.f32 %v2363_v23, %v6882_v6 }
 0x3fb   :  { %v6939_v28 = vadd.f32 %v2388_v10, %v6925_v20  ;;  %v6942_v22 = vadd.f32 %v2389_v44, %v6925_v20  ;;  %v6945_v2 = vadd.f32 %v2390_v59, %v6925_v20  ;;  %v2396_v25 = vadd.f32 %v2380_v52, %v2192_v40 }
 0x3fc   :  { %v2397_v0 = vadd.f32 %v2381_v33, %v2192_v40  ;;  %v2398_v38 = vadd.f32 %v2382_v16, %v2192_v40  ;;  %v2399_v31 = vadd.f32 %v2383_v42, %v2192_v40  ;;  %v2400_v8 = vadd.f32 %v2384_v14, %v2192_v40 }
 0x3fd   :  { %v2401_v54 = vadd.f32 %v2385_v4, %v2192_v40  ;;  %v2402_v17 = vadd.f32 %v2386_v60, %v2192_v40  ;;  %v2403_v63 = vadd.f32 %v2387_v21, %v2192_v40  ;;  %vm2412_vm1 = vcmp.ge.f32.partialorder %v2396_v25, 0.0 }
 0x3fe   :  { %vm2413_vm2 = vcmp.ge.f32.partialorder %v2397_v0, 0.0  ;;  %vm2414_vm3 = vcmp.ge.f32.partialorder %v2398_v38, 0.0  ;;  %vm2415_vm4 = vcmp.ge.f32.partialorder %v2399_v31, 0.0  ;;  %vm2416_vm11 = vcmp.ge.f32.partialorder %v2400_v8, 0.0 }
 0x3ff   :  { %vm2417_vm13 = vcmp.ge.f32.partialorder %v2401_v54, 0.0  ;;  %vm2418_vm15 = vcmp.ge.f32.partialorder %v2402_v17, 0.0  ;;  %vm2419_vm0 = vcmp.ge.f32.partialorder %v2403_v63, 0.0  ;;  %v2428_v10 = vmul.f32 0.01, %v2396_v25 }
 0x400   :  { %v2429_v44 = vmul.f32 0.01, %v2397_v0  ;;  %v2430_v59 = vmul.f32 0.01, %v2398_v38  ;;  %v2431_v23 = vmul.f32 0.01, %v2399_v31  ;;  %v6948_v52 = vadd.f32 %v2391_v1, %v6925_v20 }
 0x401   :  { %v2432_v33 = vmul.f32 0.01, %v2400_v8  ;;  %v2433_v16 = vmul.f32 0.01, %v2401_v54  ;;  %v2434_v42 = vmul.f32 0.01, %v2402_v17  ;;  %v2444_v40 = vsel %vm2412_vm1, %v2396_v25, %v2428_v10 }
 0x402   :  { %v2435_v14 = vmul.f32 0.01, %v2403_v63  ;;  %v2445_v4 = vsel %vm2413_vm2, %v2397_v0, %v2429_v44  ;;  %v2446_v60 = vsel %vm2414_vm3, %v2398_v38, %v2430_v59  ;;  %v2447_v21 = vsel %vm2415_vm4, %v2399_v31, %v2431_v23  ;;  %v7712_v10 = vld [vmem:[#allocation58_spill] sm:$0xff]  ;;  %v7713_v44 = vld [vmem:[#allocation63_spill] sm:$0xff] }
 0x403   :  { %v2448_v6 = vsel %vm2416_vm11, %v2400_v8, %v2432_v33  ;;  %v2449_v29 = vsel %vm2417_vm13, %v2401_v54, %v2433_v16  ;;  %v2450_v37 = vsel %vm2418_vm15, %v2402_v17, %v2434_v42  ;;  %v2460_v1 = vmul.f32 %v2444_v40, %v6484_v34  ;;  %v7714_v59 = vld [vmem:[#allocation66_spill] sm:$0xff] }
 0x404   :  { %v2451_v9 = vsel %vm2419_vm0, %v2403_v63, %v2435_v14  ;;  %v2461_v53 = vmul.f32 %v2445_v4, %v6504_v35  ;;  %v2462_v25 = vmul.f32 %v2446_v60, %v6493_v18  ;;  %v2463_v0 = vmul.f32 %v2447_v21, %v6585_v55 }
 0x405   :  { %v2464_v38 = vmul.f32 %v2448_v6, %v6617_v27  ;;  %v2465_v31 = vmul.f32 %v2449_v29, %v7712_v10  ;;  %v2466_v8 = vmul.f32 %v2450_v37, %v7713_v44  ;;  %v2467_v54 = vmul.f32 %v2451_v9, %v7714_v59 }
 0x406   :  { %v2476_v17 = vsel %vm1271_vm6, %v2460_v1, 0.0  ;;  %v2483_v23 = vsel %vm1271_vm6, %v2461_v53, 0.0  ;;  %v2490_v63 = vsel %vm1271_vm6, %v2462_v25, 0.0  ;;  %v2497_v33 = vsel %vm1271_vm6, %v2463_v0, 0.0 }
 0x407   :  { %v2477_v16 = vrot.slane %v2476_v17, 4  ;;  %v2484_v42 = vrot.slane %v2483_v23, 4  ;;  %v2491_v40 = vrot.slane %v2490_v63, 4  ;;  %v2498_v14 = vrot.slane %v2497_v33, 4 }
 0x408   :  { %v2504_v6 = vsel %vm1271_vm6, %v2464_v38, 0.0  ;;  %v2511_v29 = vsel %vm1271_vm6, %v2465_v31, 0.0  ;;  %v2518_v37 = vsel %vm1271_vm6, %v2466_v8, 0.0  ;;  %v2525_v9 = vsel %vm1271_vm6, %v2467_v54, 0.0 }
 0x409   :  { %v2478_v4 = vadd.f32 %v2477_v16, %v2476_v17  ;;  %v2485_v60 = vadd.f32 %v2484_v42, %v2483_v23  ;;  %v2492_v21 = vadd.f32 %v2491_v40, %v2490_v63  ;;  %v2499_v53 = vadd.f32 %v2498_v14, %v2497_v33 }
 0x40a   :  { %v2505_v1 = vrot.slane %v2504_v6, 4  ;;  %v2512_v25 = vrot.slane %v2511_v29, 4  ;;  %v2519_v56 = vrot.slane %v2518_v37, 4  ;;  %v2526_v0 = vrot.slane %v2525_v9, 4 }
 0x40b   :  { %v2479_v7 = vrot.slane %v2478_v4, 2  ;;  %v2486_v51 = vrot.slane %v2485_v60, 2  ;;  %v2493_v19 = vrot.slane %v2492_v21, 2  ;;  %v2500_v30 = vrot.slane %v2499_v53, 2 }
 0x40c   :  { %v2506_v41 = vadd.f32 %v2505_v1, %v2504_v6  ;;  %v2513_v38 = vadd.f32 %v2512_v25, %v2511_v29  ;;  %v2520_v47 = vadd.f32 %v2519_v56, %v2518_v37  ;;  %v2527_v31 = vadd.f32 %v2526_v0, %v2525_v9 }
 0x40d   :  { %v2480_v13 = vadd.f32 %v2479_v7, %v2478_v4  ;;  %v2487_v8 = vadd.f32 %v2486_v51, %v2485_v60  ;;  %v2494_v24 = vadd.f32 %v2493_v19, %v2492_v21  ;;  %v2501_v54 = vadd.f32 %v2500_v30, %v2499_v53 }
 0x40e   :  { %v2507_v17 = vrot.slane %v2506_v41, 2  ;;  %v2514_v23 = vrot.slane %v2513_v38, 2  ;;  %v2521_v63 = vrot.slane %v2520_v47, 2  ;;  %v2528_v33 = vrot.slane %v2527_v31, 2 }
 0x40f   :  { %v2481_v16 = vrot.slane %v2480_v13, 1  ;;  %v2488_v42 = vrot.slane %v2487_v8, 1  ;;  %v2495_v40 = vrot.slane %v2494_v24, 1  ;;  %v2502_v14 = vrot.slane %v2501_v54, 1 }
 0x410   :  { %v2508_v45 = vadd.f32 %v2507_v17, %v2506_v41  ;;  %v2515_v48 = vadd.f32 %v2514_v23, %v2513_v38  ;;  %v2522_v46 = vadd.f32 %v2521_v63, %v2520_v47  ;;  %v2529_v39 = vadd.f32 %v2528_v33, %v2527_v31 }
 0x411   :  { %v2482_v6 = vadd.f32 %v2481_v16, %v2480_v13  ;;  %v2489_v29 = vadd.f32 %v2488_v42, %v2487_v8  ;;  %v2496_v56 = vadd.f32 %v2495_v40, %v2494_v24  ;;  %v2503_v37 = vadd.f32 %v2502_v14, %v2501_v54  ;;  %v7715_v40 = vld [vmem:[#allocation56_spill] sm:$0xff] }
 0x412   :  { %v2509_v7 = vrot.slane %v2508_v45, 1  ;;  %v2516_v51 = vrot.slane %v2515_v48, 1  ;;  %v2523_v19 = vrot.slane %v2522_v46, 1  ;;  %v2530_v30 = vrot.slane %v2529_v39, 1 }
 0x413   :  { %v2687_v9 = vsel %vm1919_vm5, %v2489_v29, %v2482_v6  ;;  %v2408_v4 = vadd.f32 %v6914_v43, %v6925_v20  ;;  %v2409_v60 = vadd.f32 %v6930_v26, %v6925_v20  ;;  %v2410_v41 = vadd.f32 %v6933_v15, %v6925_v20  ;;  %v7716_v6 = vld [vmem:[#allocation57_spill] sm:$0xff]  ;;  %v7717_v29 = vld [vmem:[#allocation60_spill] sm:$0xff] }
 0x414   :  { %v2510_v47 = vadd.f32 %v2509_v7, %v2508_v45  ;;  %v2517_v13 = vadd.f32 %v2516_v51, %v2515_v48  ;;  %v2524_v21 = vadd.f32 %v2523_v19, %v2522_v46  ;;  %v2531_v24 = vadd.f32 %v2530_v30, %v2529_v39  ;;  %v7719_v7 = vld [vmem:[#allocation68_spill] sm:$0xff]  ;;  %v7720_v19 = vld [vmem:[#allocation69_spill] sm:$0xff] }
 0x415   :  { %v2688_v53 = vsel %vm1921_vm7, %v2496_v56, %v2687_v9  ;;  %v2411_v1 = vadd.f32 %v6936_v3, %v6925_v20  ;;  %vm2420_vm1 = vcmp.ge.f32.partialorder %v6939_v28, 0.0  ;;  %vm2421_vm2 = vcmp.ge.f32.partialorder %v6942_v22, 0.0 }
 0x416   :  { %v2689_v43 = vsel %vm1923_vm8, %v2503_v37, %v2688_v53  ;;  %vm2422_vm3 = vcmp.ge.f32.partialorder %v6945_v2, 0.0  ;;  %vm2423_vm4 = vcmp.ge.f32.partialorder %v6948_v52, 0.0  ;;  %vm2424_vm11 = vcmp.ge.f32.partialorder %v2408_v4, 0.0  ;;  %v7718_v37 = vld [vmem:[#allocation67_spill] sm:$0xff] }
 0x417   :  { %v2690_v48 = vsel %vm1925_vm9, %v2510_v47, %v2689_v43  ;;  %vm2425_vm13 = vcmp.ge.f32.partialorder %v2409_v60, 0.0  ;;  %vm2426_vm15 = vcmp.ge.f32.partialorder %v2410_v41, 0.0  ;;  %vm2427_vm0 = vcmp.ge.f32.partialorder %v2411_v1, 0.0 }
 0x418   :  { %v2691_v46 = vsel %vm1927_vm10, %v2517_v13, %v2690_v48  ;;  %v2436_v45 = vmul.f32 0.01, %v6939_v28  ;;  %v2437_v39 = vmul.f32 0.01, %v6942_v22  ;;  %v2438_v20 = vmul.f32 0.01, %v6945_v2 }
 0x419   :  { %v2692_v26 = vsel %vm1929_vm12, %v2524_v21, %v2691_v46  ;;  %v2439_v15 = vmul.f32 0.01, %v6948_v52  ;;  %v2440_v3 = vmul.f32 0.01, %v2408_v4  ;;  %v2441_v25 = vmul.f32 0.01, %v2409_v60 }
 0x41a   :  { %v2693_v0 = vsel %vm1931_vm14, %v2531_v24, %v2692_v26  ;;  %v2442_v38 = vmul.f32 0.01, %v2410_v41  ;;  %v2443_v31 = vmul.f32 0.01, %v2411_v1  ;;  %v2452_v8 = vsel %vm2420_vm1, %v6939_v28, %v2436_v45 }
 0x41b   :  { %5476 = vmatprep.mubr.msk.f32.mxu0 %vm1271_vm6, %v2693_v0  ;;  %v2453_v54 = vsel %vm2421_vm2, %v6942_v22, %v2437_v39  ;;  %v2454_v17 = vsel %vm2422_vm3, %v6945_v2, %v2438_v20  ;;  %v2455_v23 = vsel %vm2423_vm4, %v6948_v52, %v2439_v15  ;;  %v2456_v63 = vsel %vm2424_vm11, %v2408_v4, %v2440_v3 }
 0x41c   :  { %v2457_v33 = vsel %vm2425_vm13, %v2409_v60, %v2441_v25  ;;  %v2458_v28 = vsel %vm2426_vm15, %v2410_v41, %v2442_v38  ;;  %v2459_v16 = vsel %vm2427_vm0, %v2411_v1, %v2443_v31  ;;  %v2468_v42 = vmul.f32 %v2452_v8, %v6522_v32 }
 0x41d   :  { %v2469_v22 = vmul.f32 %v2453_v54, %v6547_v12  ;;  %v2470_v14 = vmul.f32 %v2454_v17, %v7715_v40  ;;  %v2471_v2 = vmul.f32 %v2455_v23, %v7716_v6  ;;  %v2472_v56 = vmul.f32 %v2456_v63, %v7717_v29 }
 0x41e   :  { %v2473_v52 = vmul.f32 %v2457_v33, %v7718_v37  ;;  %v2474_v51 = vmul.f32 %v2458_v28, %v7719_v7  ;;  %v2475_v30 = vmul.f32 %v2459_v16, %v7720_v19  ;;  %v2532_v9 = vsel %vm1271_vm6, %v2468_v42, 0.0 }
 0x41f   :  { %v2533_v4 = vrot.slane %v2532_v9, 4  ;;  %v2539_v60 = vsel %vm1271_vm6, %v2469_v22, 0.0  ;;  %v2546_v41 = vsel %vm1271_vm6, %v2470_v14, 0.0  ;;  %v2553_v47 = vsel %vm1271_vm6, %v2471_v2, 0.0 }
 0x420   :  { %v2540_v13 = vrot.slane %v2539_v60, 4  ;;  %v2547_v21 = vrot.slane %v2546_v41, 4  ;;  %v2554_v24 = vrot.slane %v2553_v47, 4  ;;  %v2560_v53 = vsel %vm1271_vm6, %v2472_v56, 0.0 }
 0x421   :  { %v2534_v1 = vadd.f32 %v2533_v4, %v2532_v9  ;;  %v2561_v43 = vrot.slane %v2560_v53, 4  ;;  %v2567_v48 = vsel %vm1271_vm6, %v2473_v52, 0.0  ;;  %v2574_v46 = vsel %vm1271_vm6, %v2474_v51, 0.0 }
 0x422   :  { %v2541_v45 = vadd.f32 %v2540_v13, %v2539_v60  ;;  %v2548_v39 = vadd.f32 %v2547_v21, %v2546_v41  ;;  %v2555_v20 = vadd.f32 %v2554_v24, %v2553_v47  ;;  %v2568_v26 = vrot.slane %v2567_v48, 4 }
 0x423   :  { %v2535_v15 = vrot.slane %v2534_v1, 2  ;;  %v2562_v3 = vadd.f32 %v2561_v43, %v2560_v53  ;;  %v2575_v25 = vrot.slane %v2574_v46, 4  ;;  %v2581_v0 = vsel %vm1271_vm6, %v2475_v30, 0.0 }
 0x424   :  { %v2542_v38 = vrot.slane %v2541_v45, 2  ;;  %v2549_v31 = vrot.slane %v2548_v39, 2  ;;  %v2556_v8 = vrot.slane %v2555_v20, 2  ;;  %v2569_v54 = vadd.f32 %v2568_v26, %v2567_v48 }
 0x425   :  { %v2536_v17 = vadd.f32 %v2535_v15, %v2534_v1  ;;  %v2563_v23 = vrot.slane %v2562_v3, 2  ;;  %v2576_v63 = vadd.f32 %v2575_v25, %v2574_v46  ;;  %v2582_v33 = vrot.slane %v2581_v0, 4 }
 0x426   :  { %v2543_v28 = vadd.f32 %v2542_v38, %v2541_v45  ;;  %v2550_v16 = vadd.f32 %v2549_v31, %v2548_v39  ;;  %v2557_v42 = vadd.f32 %v2556_v8, %v2555_v20  ;;  %v2570_v22 = vrot.slane %v2569_v54, 2 }
 0x427   :  { %v2537_v14 = vrot.slane %v2536_v17, 1  ;;  %v2564_v2 = vadd.f32 %v2563_v23, %v2562_v3  ;;  %v2577_v56 = vrot.slane %v2576_v63, 2  ;;  %v2583_v52 = vadd.f32 %v2582_v33, %v2581_v0  ;;  %v7724_v33 = vld [vmem:[#allocation39_spill] sm:$0xff] }
 0x428   :  { %v2544_v51 = vrot.slane %v2543_v28, 1  ;;  %v2551_v9 = vrot.slane %v2550_v16, 1  ;;  %v2558_v4 = vrot.slane %v2557_v42, 1  ;;  %v2571_v30 = vadd.f32 %v2570_v22, %v2569_v54  ;;  %v7722_v54 = vld [vmem:[#allocation22_spill] sm:$0xff] }
 0x429   :  { %v2538_v60 = vadd.f32 %v2537_v14, %v2536_v17  ;;  %v2565_v41 = vrot.slane %v2564_v2, 1  ;;  %v2578_v47 = vadd.f32 %v2577_v56, %v2576_v63  ;;  %v2584_v13 = vrot.slane %v2583_v52, 2  ;;  %v7723_v17 = vld [vmem:[#allocation43_spill] sm:$0xff]  ;;  %v5070_v63 = vld [vmem:[%s7721_s6] ss:$0 sm:$0xff] }
 0x42a   :  { %v2545_v21 = vadd.f32 %v2544_v51, %v2543_v28  ;;  %v2552_v24 = vadd.f32 %v2551_v9, %v2550_v16  ;;  %v2559_v53 = vadd.f32 %v2558_v4, %v2557_v42  ;;  %v2572_v1 = vrot.slane %v2571_v30, 1  ;;  %v7725_v42 = vld [vmem:[#allocation40_spill] sm:$0xff] }
 0x42b   :  { %v2579_v43 = vrot.slane %v2578_v47, 1  ;;  %v2585_v48 = vadd.f32 %v2584_v13, %v2583_v52  ;;  %v2566_v45 = vadd.f32 %v2565_v41, %v2564_v2  ;;  %v7726_v9 = vld [vmem:[#allocation20_spill] sm:$0xff] }
 0x42c   :  { %v2694_v46 = vsel %vm1919_vm5, %v2545_v21, %v2538_v60  ;;  %v2573_v26 = vadd.f32 %v2572_v1, %v2571_v30  ;;  %v7727_v4 = vld [vmem:[#allocation44_spill] sm:$0xff]  ;;  %v7728_v30 = vld [vmem:[#allocation21_spill] sm:$0xff] }
 0x42d   :  { %v2586_v39 = vrot.slane %v2585_v48, 1  ;;  %v2695_v20 = vsel %vm1921_vm7, %v2552_v24, %v2694_v46  ;;  %v2580_v3 = vadd.f32 %v2579_v43, %v2578_v47  ;;  %v7729_v47 = vld [vmem:[#allocation23_spill] sm:$0xff] }
 0x42e   :  { %v2696_v15 = vsel %vm1923_vm8, %v2559_v53, %v2695_v20 }
 0x42f   :  { %v2697_v25 = vsel %vm1925_vm9, %v2566_v45, %v2696_v15  ;;  %v2587_v0 = vadd.f32 %v2586_v39, %v2585_v48 }
 0x430   :  { %v2698_v38 = vsel %vm1927_vm10, %v2573_v26, %v2697_v25 }
 0x431   :  { %v2699_v31 = vsel %vm1929_vm12, %v2580_v3, %v2698_v38 }
 0x432   :  { %v2700_v8 = vsel %vm1931_vm14, %v2587_v0, %v2699_v31 }
 0x433   :  { %5477 = vmatmul.mubr.msk.f32.vlgmr.msra.gmra.mrb[24].mxu0 %vm1271_vm6, %v2700_v8 }
 0x434   :  { %5770 = vmatpush3.bf16.msra.mxu0 %v6351_v57 }
 0x435   :  { %5772 = vmatprep.subr.bf16.mxu0 %v7722_v54 }
 0x438   :  { %5774 = vmatpush3.bf16.msra.mxu0 %v7722_v54 }
 0x439   :  { %5776 = vmatprep.subr.bf16.mxu0 %v7723_v17 }
 0x506   :  { %v5478_v23 = vpop.f32.mrb[24].mxu0 }
 0x507   :  { %v5891_v28 = vadd.f32 %v5478_v23, %v7724_v33  ;;  %v2771_v16 = vpop.f32.mrb[25].mxu0 }
 0x508   :  { %v5892_v22 = vadd.f32 %v2771_v16, %v7725_v42 }
 0x509   :  { %v2790_v14 = vadd.f32 %v5891_v28, %v5070_v63 }
 0x50a   :  { %v2789_v2 = vadd.f32 %v5892_v22, %v5070_v63 }
 0x50b   :  { %v2794_v56 = vmul.f32 0.01, %v2790_v14  ;;  %vm2792_vm1 = vcmp.ge.f32.partialorder %v2790_v14, 0.0 }
 0x50c   :  { %v2793_v52 = vmul.f32 0.01, %v2789_v2  ;;  %vm2791_vm2 = vcmp.ge.f32.partialorder %v2789_v2, 0.0 }
 0x50d   :  { %v2796_v51 = vsel %vm2792_vm1, %v2790_v14, %v2794_v56 }
 0x50e   :  { %v2795_v57 = vsel %vm2791_vm2, %v2789_v2, %v2793_v52  ;;  %v7730_v2 = vld [vmem:[#allocation47_spill] sm:$0xff] }
 0x50f   :  { %5487 = vmatprep.mubr.msk.f32.mxu1 %vm1271_vm6, %v2795_v57  ;;  %5509 = vmatprep.mubr.msk.f32.mxu0 %vm1271_vm6, %v2795_v57 }
 0x510   :  { %5488 = vmatmul.mubr.msk.f32.vlgmr.msra.gmra.mrb[32].mxu1 %vm1271_vm6, %v2796_v51  ;;  %5510 = vmatmul.mubr.msk.f32.vlgmr.msra.gmra.mrb[26].mxu0 %vm1271_vm6, %v2796_v51 }
 0x511   :  { %5762 = vmatpush3.bf16.msra.mxu1 %v6335_v49  ;;  %5498 = vmatprep.mubr.msk.f32.mxu1 %vm1271_vm6, %v2795_v57 }
 0x512   :  { %5764 = vmatprep.subr.bf16.mxu1 %v7726_v9  ;;  %5778 = vmatpush3.bf16.msra.mxu0 %v7723_v17 }
 0x513   :  { %5780 = vmatprep.subr.bf16.mxu0 %v7727_v4 }
 0x515   :  { %5766 = vmatpush3.bf16.msra.mxu1 %v7726_v9 }
 0x516   :  { %5782 = vmatpush3.bf16.msra.mxu0 %v7727_v4  ;;  %5784 = vmatprep.subr.bf16.mxu1 %v6770_v11  ;;  %v7731_v4 = vld [vmem:[#allocation49_spill] sm:$0xff] }
 0x517   :  { %5800 = vmatprep.subr.bf16.mxu0 %v6774_v62 }
 0x518   :  { %5499 = vmatmul.mubr.msk.f32.vlgmr.msra.gmra.mrb[34].mxu1 %vm1271_vm6, %v2796_v51 }
 0x519   :  { %5786 = vmatpush3.bf16.msra.mxu1 %v6770_v11 }
 0x51a   :  { %5788 = vmatprep.subr.bf16.mxu1 %v6782_v58 }
 0x51d   :  { %5790 = vmatpush3.bf16.msra.mxu1 %v6782_v58 }
 0x51e   :  { %5792 = vmatprep.subr.bf16.mxu1 %v6794_v50 }
 0x5e3   :  { %v5489_v49 = vpop.f32.mrb[32].mxu1 }
 0x5e4   :  { %v2875_v60 = vadd.f32 %v5489_v49, %v7728_v30  ;;  %v2869_v41 = vpop.f32.mrb[33].mxu1 }
 0x5e5   :  { %v2870_v13 = vadd.f32 %v2869_v41, %v7729_v47 }
 0x5e6   :  { %v3004_v21 = vcombine.high %v2875_v60, %v2875_v60  ;;  %v3011_v24 = vrot.slane %v2875_v60, %v6487_v36 }
 0x5e7   :  { %v2955_v53 = vcombine.high %v2870_v13, %v2870_v13  ;;  %v2962_v1 = vrot.slane %v2870_v13, %v6487_v36 }
 0x5e8   :  { %v3018_v11 = vrot.slane %v3004_v21, %v6487_v36  ;;  %v3019_v43 = vcombine.high %v3011_v24, %v3011_v24  ;;  %v3027_v48 = vrot.slane %v3011_v24, %v6487_v36 }
 0x5e9   :  { %v2969_v58 = vrot.slane %v2955_v53, %v6487_v36  ;;  %v2970_v46 = vcombine.high %v2962_v1, %v2962_v1  ;;  %v2978_v25 = vrot.slane %v2962_v1, %v6487_v36 }
 0x5ea   :  { %v3020_v45 = vcombine.high %v3018_v11, %v3018_v11  ;;  %v3034_v39 = vrot.slane %v3018_v11, %v6487_v36  ;;  %v3041_v20 = vrot.slane %v3019_v43, %v6487_v36  ;;  %v3049_v26 = vcombine.high %v3027_v48, %v3027_v48 }
 0x5eb   :  { %v3088_v15 = vrot.slane %v3027_v48, %v6358_v61  ;;  %v2971_v3 = vcombine.high %v2969_v58, %v2969_v58  ;;  %v5500_v0 = vpop.f32.mrb[34].mxu1  ;;  %v2985_v23 = vrot.slane %v2969_v58, %v6487_v36  ;;  %v2992_v63 = vrot.slane %v2970_v46, %v6487_v36  ;;  %v7732_v58 = vld [vmem:[#allocation50_spill] sm:$0xff] }
 0x5ec   :  { %v3048_v38 = vrot.slane %v3020_v45, %v6487_v36  ;;  %v3050_v31 = vcombine.high %v3034_v39, %v3034_v39  ;;  %v3051_v8 = vcombine.high %v3041_v20, %v3041_v20  ;;  %v3092_v54 = vrot.slane %v3041_v20, %v6358_v61  ;;  %v2944_v17 = vpop.f32.mrb[35].mxu1  ;;  %v7733_v45 = vld [vmem:[#allocation54_spill] sm:$0xff] }
 0x5ed   :  { %v2999_v28 = vrot.slane %v2971_v3, %v6487_v36  ;;  %v3096_v22 = vrot.slane %v3049_v26, %v6358_v61  ;;  %v3104_v14 = vrot.slane %v3034_v39, %v6358_v61  ;;  %v3141_v56 = vadd.f32 %v3088_v15, %v7730_v2  ;;  %v7734_v20 = vld [vmem:[#allocation46_spill] sm:$0xff]  ;;  %v7735_v15 = vld [vmem:[#allocation45_spill] sm:$0xff] }
 0x5ee   :  { %v3052_v16 = vcombine.high %v3048_v38, %v3048_v38  ;;  %v3000_v52 = vcombine.high %v2978_v25, %v2978_v25  ;;  %v3100_v57 = vrot.slane %v3051_v8, %v6358_v61  ;;  %v3108_v51 = vrot.slane %v3048_v38, %v6358_v61 }
 0x5ef   :  { %v3112_v9 = vrot.slane %v3050_v31, %v6358_v61  ;;  %v3142_v49 = vadd.f32 %v3092_v54, %v7731_v4  ;;  %v3001_v30 = vcombine.high %v2985_v23, %v2985_v23  ;;  %v3002_v60 = vcombine.high %v2992_v63, %v2992_v63  ;;  %v7737_v31 = vld [vmem:[#allocation62_spill] sm:$0xff]  ;;  %v7738_v54 = vld [vmem:[#allocation51_spill] sm:$0xff] }
 0x5f0   :  { %v3003_v41 = vcombine.high %v2999_v28, %v2999_v28  ;;  %v3056_v47 = vrot.slane %v2978_v25, %v6358_v61  ;;  %v3116_v13 = vrot.slane %v3052_v16, %v6358_v61  ;;  %v3060_v21 = vrot.slane %v2992_v63, %v6358_v61  ;;  %v7736_v25 = vld [vmem:[#allocation61_spill] sm:$0xff]  ;;  %v7739_v63 = vld [vmem:[#allocation48_spill] sm:$0xff] }
 0x5f1   :  { %v3064_v24 = vrot.slane %v3000_v52, %v6358_v61  ;;  %v3072_v53 = vrot.slane %v2985_v23, %v6358_v61  ;;  %v3068_v1 = vrot.slane %v3002_v60, %v6358_v61  ;;  %v3076_v11 = vrot.slane %v2999_v28, %v6358_v61  ;;  %v7740_v16 = vld [vmem:[#allocation52_spill] sm:$0xff]  ;;  %v7741_v52 = vld [vmem:[#allocation59_spill] sm:$0xff] }
 0x5f2   :  { %v3080_v43 = vrot.slane %v3001_v30, %v6358_v61  ;;  %v3084_v48 = vrot.slane %v3003_v41, %v6358_v61  ;;  %v3143_v46 = vadd.f32 %v3096_v22, %v7732_v58  ;;  %v7097_v39 = vadd.f32 %v3104_v14, %v7733_v45  ;;  %v7742_v22 = vld [vmem:[#allocation24_spill] sm:$0xff]  ;;  %v7743_v14 = vld [vmem:[#allocation25_spill] sm:$0xff] }
 0x5f3   :  { %v3133_v26 = vadd.f32 %v3056_v47, %v7734_v20  ;;  %v3134_v3 = vadd.f32 %v3060_v21, %v7735_v15  ;;  %v3135_v38 = vadd.f32 %v3064_v24, %v7736_v25  ;;  %v3136_v8 = vadd.f32 %v3068_v1, %v7737_v31  ;;  %v7744_v41 = vld [vmem:[#allocation53_spill] sm:$0xff]  ;;  %v7745_v21 = vld [vmem:[#allocation55_spill] sm:$0xff] }
 0x5f4   :  { %v3137_v23 = vadd.f32 %v3072_v53, %v7738_v54  ;;  %v3138_v28 = vadd.f32 %v3076_v11, %v7739_v63  ;;  %v3139_v2 = vadd.f32 %v3080_v43, %v7740_v16  ;;  %v3140_v4 = vadd.f32 %v3084_v48, %v7741_v52  ;;  %v7746_v24 = vld [vmem:[#allocation65_spill] sm:$0xff]  ;;  %v7747_v53 = vld [vmem:[#allocation64_spill] sm:$0xff] }
 0x5f5   :  { %v7108_v30 = vadd.f32 %v5500_v0, %v7742_v22  ;;  %v2945_v60 = vadd.f32 %v2944_v17, %v7743_v14  ;;  %v3144_v47 = vadd.f32 %v3100_v57, %v7744_v41  ;;  %v7113_v58 = vadd.f32 %v3108_v51, %v7745_v21 }
 0x5f6   :  { %v7116_v1 = vadd.f32 %v3112_v9, %v7746_v24  ;;  %v7119_v45 = vadd.f32 %v3116_v13, %v7747_v53 }
 0x5f7   :  { %v7122_v11 = vadd.f32 %v3141_v56, %v7108_v30  ;;  %v7125_v43 = vadd.f32 %v3142_v49, %v7108_v30  ;;  %v7128_v0 = vadd.f32 %v3143_v46, %v7108_v30  ;;  %v3149_v17 = vadd.f32 %v3133_v26, %v2945_v60 }
 0x5f8   :  { %v3150_v57 = vadd.f32 %v3134_v3, %v2945_v60  ;;  %v3151_v48 = vadd.f32 %v3135_v38, %v2945_v60  ;;  %v3152_v51 = vadd.f32 %v3136_v8, %v2945_v60  ;;  %v3153_v20 = vadd.f32 %v3137_v23, %v2945_v60 }
 0x5f9   :  { %v3154_v15 = vadd.f32 %v3138_v28, %v2945_v60  ;;  %v3155_v9 = vadd.f32 %v3139_v2, %v2945_v60  ;;  %v3156_v25 = vadd.f32 %v3140_v4, %v2945_v60  ;;  %vm3165_vm3 = vcmp.ge.f32.partialorder %v3149_v17, 0.0 }
 0x5fa   :  { %vm3166_vm4 = vcmp.ge.f32.partialorder %v3150_v57, 0.0  ;;  %vm3167_vm11 = vcmp.ge.f32.partialorder %v3151_v48, 0.0  ;;  %vm3168_vm13 = vcmp.ge.f32.partialorder %v3152_v51, 0.0  ;;  %vm3169_vm15 = vcmp.ge.f32.partialorder %v3153_v20, 0.0 }
 0x5fb   :  { %vm3170_vm0 = vcmp.ge.f32.partialorder %v3154_v15, 0.0  ;;  %vm3171_vm1 = vcmp.ge.f32.partialorder %v3155_v9, 0.0  ;;  %vm3172_vm2 = vcmp.ge.f32.partialorder %v3156_v25, 0.0  ;;  %v3181_v56 = vmul.f32 0.01, %v3149_v17 }
 0x5fc   :  { %v3182_v49 = vmul.f32 0.01, %v3150_v57  ;;  %v3183_v13 = vmul.f32 0.01, %v3151_v48  ;;  %v3184_v46 = vmul.f32 0.01, %v3152_v51  ;;  %v7131_v26 = vadd.f32 %v3144_v47, %v7108_v30 }
 0x5fd   :  { %v3185_v3 = vmul.f32 0.01, %v3153_v20  ;;  %v3186_v38 = vmul.f32 0.01, %v3154_v15  ;;  %v3187_v31 = vmul.f32 0.01, %v3155_v9  ;;  %v3197_v8 = vsel %vm3165_vm3, %v3149_v17, %v3181_v56 }
 0x5fe   :  { %v3188_v54 = vmul.f32 0.01, %v3156_v25  ;;  %v3198_v23 = vsel %vm3166_vm4, %v3150_v57, %v3182_v49  ;;  %v3199_v63 = vsel %vm3167_vm11, %v3151_v48, %v3183_v13  ;;  %v3200_v28 = vsel %vm3168_vm13, %v3152_v51, %v3184_v46 }
 0x5ff   :  { %v3201_v16 = vsel %vm3169_vm15, %v3153_v20, %v3185_v3  ;;  %v3202_v2 = vsel %vm3170_vm0, %v3154_v15, %v3186_v38  ;;  %v3203_v52 = vsel %vm3171_vm1, %v3155_v9, %v3187_v31  ;;  %v3213_v4 = vmul.f32 %v3197_v8, %v6484_v34 }
 0x600   :  { %v3204_v22 = vsel %vm3172_vm2, %v3156_v25, %v3188_v54  ;;  %v3214_v14 = vmul.f32 %v3198_v23, %v6504_v35  ;;  %v3215_v60 = vmul.f32 %v3199_v63, %v6493_v18  ;;  %v3216_v41 = vmul.f32 %v3200_v28, %v6585_v55 }
 0x601   :  { %v3217_v47 = vmul.f32 %v3201_v16, %v6617_v27  ;;  %v3218_v21 = vmul.f32 %v3202_v2, %v7712_v10  ;;  %v3219_v24 = vmul.f32 %v3203_v52, %v7713_v44  ;;  %v3220_v53 = vmul.f32 %v3204_v22, %v7714_v59 }
 0x602   :  { %v3229_v17 = vsel %vm1271_vm6, %v3213_v4, 0.0  ;;  %v3236_v57 = vsel %vm1271_vm6, %v3214_v14, 0.0  ;;  %v3243_v48 = vsel %vm1271_vm6, %v3215_v60, 0.0  ;;  %v3250_v51 = vsel %vm1271_vm6, %v3216_v41, 0.0 }
 0x603   :  { %v3230_v20 = vrot.slane %v3229_v17, 4  ;;  %v3237_v15 = vrot.slane %v3236_v57, 4  ;;  %v3244_v9 = vrot.slane %v3243_v48, 4  ;;  %v3251_v25 = vrot.slane %v3250_v51, 4 }
 0x604   :  { %v3257_v56 = vsel %vm1271_vm6, %v3217_v47, 0.0  ;;  %v3264_v49 = vsel %vm1271_vm6, %v3218_v21, 0.0  ;;  %v3271_v13 = vsel %vm1271_vm6, %v3219_v24, 0.0  ;;  %v3278_v46 = vsel %vm1271_vm6, %v3220_v53, 0.0 }
 0x605   :  { %v3231_v3 = vadd.f32 %v3230_v20, %v3229_v17  ;;  %v3238_v38 = vadd.f32 %v3237_v15, %v3236_v57  ;;  %v3245_v31 = vadd.f32 %v3244_v9, %v3243_v48  ;;  %v3252_v8 = vadd.f32 %v3251_v25, %v3250_v51 }
 0x606   :  { %v3258_v54 = vrot.slane %v3257_v56, 4  ;;  %v3265_v23 = vrot.slane %v3264_v49, 4  ;;  %v3272_v63 = vrot.slane %v3271_v13, 4  ;;  %v3279_v28 = vrot.slane %v3278_v46, 4 }
 0x607   :  { %v3232_v16 = vrot.slane %v3231_v3, 2  ;;  %v3239_v2 = vrot.slane %v3238_v38, 2  ;;  %v3246_v52 = vrot.slane %v3245_v31, 2  ;;  %v3253_v4 = vrot.slane %v3252_v8, 2 }
 0x608   :  { %v3259_v22 = vadd.f32 %v3258_v54, %v3257_v56  ;;  %v3266_v14 = vadd.f32 %v3265_v23, %v3264_v49  ;;  %v3273_v60 = vadd.f32 %v3272_v63, %v3271_v13  ;;  %v3280_v41 = vadd.f32 %v3279_v28, %v3278_v46 }
 0x609   :  { %v3233_v47 = vadd.f32 %v3232_v16, %v3231_v3  ;;  %v3240_v21 = vadd.f32 %v3239_v2, %v3238_v38  ;;  %v3247_v24 = vadd.f32 %v3246_v52, %v3245_v31  ;;  %v3254_v53 = vadd.f32 %v3253_v4, %v3252_v8 }
 0x60a   :  { %v3260_v17 = vrot.slane %v3259_v22, 2  ;;  %v3267_v57 = vrot.slane %v3266_v14, 2  ;;  %v3274_v48 = vrot.slane %v3273_v60, 2  ;;  %v3281_v51 = vrot.slane %v3280_v41, 2 }
 0x60b   :  { %v3234_v20 = vrot.slane %v3233_v47, 1  ;;  %v3241_v15 = vrot.slane %v3240_v21, 1  ;;  %v3248_v9 = vrot.slane %v3247_v24, 1  ;;  %v3255_v25 = vrot.slane %v3254_v53, 1 }
 0x60c   :  { %v3261_v42 = vadd.f32 %v3260_v17, %v3259_v22  ;;  %v3268_v33 = vadd.f32 %v3267_v57, %v3266_v14  ;;  %v3275_v59 = vadd.f32 %v3274_v48, %v3273_v60  ;;  %v3282_v44 = vadd.f32 %v3281_v51, %v3280_v41 }
 0x60d   :  { %v3235_v56 = vadd.f32 %v3234_v20, %v3233_v47  ;;  %v3242_v49 = vadd.f32 %v3241_v15, %v3240_v21  ;;  %v3249_v13 = vadd.f32 %v3248_v9, %v3247_v24  ;;  %v3256_v46 = vadd.f32 %v3255_v25, %v3254_v53 }
 0x60e   :  { %v3262_v3 = vrot.slane %v3261_v42, 1  ;;  %v3269_v38 = vrot.slane %v3268_v33, 1  ;;  %v3276_v31 = vrot.slane %v3275_v59, 1  ;;  %v3283_v8 = vrot.slane %v3282_v44, 1 }
 0x60f   :  { %v3432_v54 = vsel %vm1919_vm5, %v3242_v49, %v3235_v56  ;;  %v3161_v23 = vadd.f32 %v7097_v39, %v7108_v30  ;;  %v3162_v63 = vadd.f32 %v7113_v58, %v7108_v30  ;;  %v3163_v28 = vadd.f32 %v7116_v1, %v7108_v30 }
 0x610   :  { %v3263_v16 = vadd.f32 %v3262_v3, %v3261_v42  ;;  %v3270_v2 = vadd.f32 %v3269_v38, %v3268_v33  ;;  %v3277_v52 = vadd.f32 %v3276_v31, %v3275_v59  ;;  %v3284_v4 = vadd.f32 %v3283_v8, %v3282_v44 }
 0x611   :  { %v3433_v22 = vsel %vm1921_vm7, %v3249_v13, %v3432_v54  ;;  %v3164_v14 = vadd.f32 %v7119_v45, %v7108_v30  ;;  %vm3173_vm3 = vcmp.ge.f32.partialorder %v7122_v11, 0.0  ;;  %vm3174_vm4 = vcmp.ge.f32.partialorder %v7125_v43, 0.0 }
 0x612   :  { %v3434_v39 = vsel %vm1923_vm8, %v3256_v46, %v3433_v22  ;;  %vm3175_vm11 = vcmp.ge.f32.partialorder %v7128_v0, 0.0  ;;  %vm3176_vm13 = vcmp.ge.f32.partialorder %v7131_v26, 0.0  ;;  %vm3177_vm15 = vcmp.ge.f32.partialorder %v3161_v23, 0.0 }
 0x613   :  { %v3435_v33 = vsel %vm1925_vm9, %v3263_v16, %v3434_v39  ;;  %vm3178_vm0 = vcmp.ge.f32.partialorder %v3162_v63, 0.0  ;;  %vm3179_vm1 = vcmp.ge.f32.partialorder %v3163_v28, 0.0  ;;  %vm3180_vm2 = vcmp.ge.f32.partialorder %v3164_v14, 0.0 }
 0x614   :  { %v3436_v44 = vsel %vm1927_vm10, %v3270_v2, %v3435_v33  ;;  %v3189_v59 = vmul.f32 0.01, %v7122_v11  ;;  %v3190_v42 = vmul.f32 0.01, %v7125_v43  ;;  %v3191_v30 = vmul.f32 0.01, %v7128_v0 }
 0x615   :  { %v3437_v58 = vsel %vm1929_vm12, %v3277_v52, %v3436_v44  ;;  %v3192_v1 = vmul.f32 0.01, %v7131_v26  ;;  %v3193_v45 = vmul.f32 0.01, %v3161_v23  ;;  %v3194_v60 = vmul.f32 0.01, %v3162_v63 }
 0x616   :  { %v3438_v41 = vsel %vm1931_vm14, %v3284_v4, %v3437_v58  ;;  %v3195_v47 = vmul.f32 0.01, %v3163_v28  ;;  %v3196_v21 = vmul.f32 0.01, %v3164_v14  ;;  %v3205_v24 = vsel %vm3173_vm3, %v7122_v11, %v3189_v59 }
 0x617   :  { %5520 = vmatprep.mubr.msk.f32.mxu0 %vm1271_vm6, %v3438_v41  ;;  %v3206_v53 = vsel %vm3174_vm4, %v7125_v43, %v3190_v42  ;;  %v3207_v17 = vsel %vm3175_vm11, %v7128_v0, %v3191_v30  ;;  %v3208_v57 = vsel %vm3176_vm13, %v7131_v26, %v3192_v1  ;;  %v3209_v48 = vsel %vm3177_vm15, %v3161_v23, %v3193_v45 }
 0x618   :  { %v3210_v51 = vsel %vm3178_vm0, %v3162_v63, %v3194_v60  ;;  %v3211_v11 = vsel %vm3179_vm1, %v3163_v28, %v3195_v47  ;;  %v3212_v20 = vsel %vm3180_vm2, %v3164_v14, %v3196_v21  ;;  %v3221_v15 = vmul.f32 %v3205_v24, %v6522_v32 }
 0x619   :  { %v3222_v43 = vmul.f32 %v3206_v53, %v6547_v12  ;;  %v3223_v9 = vmul.f32 %v3207_v17, %v7715_v40  ;;  %v3224_v0 = vmul.f32 %v3208_v57, %v7716_v6  ;;  %v3225_v25 = vmul.f32 %v3209_v48, %v7717_v29 }
 0x61a   :  { %v3226_v26 = vmul.f32 %v3210_v51, %v7718_v37  ;;  %v3227_v56 = vmul.f32 %v3211_v11, %v7719_v7  ;;  %v3228_v49 = vmul.f32 %v3212_v20, %v7720_v19  ;;  %v3285_v13 = vsel %vm1271_vm6, %v3221_v15, 0.0 }
 0x61b   :  { %v3286_v46 = vrot.slane %v3285_v13, 4  ;;  %v3292_v3 = vsel %vm1271_vm6, %v3222_v43, 0.0  ;;  %v3299_v38 = vsel %vm1271_vm6, %v3223_v9, 0.0  ;;  %v3306_v31 = vsel %vm1271_vm6, %v3224_v0, 0.0 }
 0x61c   :  { %v3293_v8 = vrot.slane %v3292_v3, 4  ;;  %v3300_v54 = vrot.slane %v3299_v38, 4  ;;  %v3307_v23 = vrot.slane %v3306_v31, 4  ;;  %v3313_v63 = vsel %vm1271_vm6, %v3225_v25, 0.0 }
 0x61d   :  { %v3287_v28 = vadd.f32 %v3286_v46, %v3285_v13  ;;  %v3314_v16 = vrot.slane %v3313_v63, 4  ;;  %v3320_v2 = vsel %vm1271_vm6, %v3226_v26, 0.0  ;;  %v3327_v52 = vsel %vm1271_vm6, %v3227_v56, 0.0 }
 0x61e   :  { %v3294_v4 = vadd.f32 %v3293_v8, %v3292_v3  ;;  %v3301_v22 = vadd.f32 %v3300_v54, %v3299_v38  ;;  %v3308_v14 = vadd.f32 %v3307_v23, %v3306_v31  ;;  %v3321_v39 = vrot.slane %v3320_v2, 4 }
 0x61f   :  { %v3288_v33 = vrot.slane %v3287_v28, 2  ;;  %v3315_v44 = vadd.f32 %v3314_v16, %v3313_v63  ;;  %v3328_v59 = vrot.slane %v3327_v52, 4  ;;  %v3334_v42 = vsel %vm1271_vm6, %v3228_v49, 0.0 }
 0x620   :  { %v3295_v30 = vrot.slane %v3294_v4, 2  ;;  %v3302_v58 = vrot.slane %v3301_v22, 2  ;;  %v3309_v1 = vrot.slane %v3308_v14, 2  ;;  %v3322_v45 = vadd.f32 %v3321_v39, %v3320_v2 }
 0x621   :  { %v3289_v60 = vadd.f32 %v3288_v33, %v3287_v28  ;;  %v3316_v41 = vrot.slane %v3315_v44, 2  ;;  %v3329_v47 = vadd.f32 %v3328_v59, %v3327_v52  ;;  %v3335_v21 = vrot.slane %v3334_v42, 4 }
 0x622   :  { %v3296_v24 = vadd.f32 %v3295_v30, %v3294_v4  ;;  %v3303_v53 = vadd.f32 %v3302_v58, %v3301_v22  ;;  %v3310_v17 = vadd.f32 %v3309_v1, %v3308_v14  ;;  %v3323_v57 = vrot.slane %v3322_v45, 2  ;;  %v7750_v1 = vld [vmem:[#allocation27_spill] sm:$0xff] }
 0x623   :  { %v3290_v48 = vrot.slane %v3289_v60, 1  ;;  %v3317_v51 = vadd.f32 %v3316_v41, %v3315_v44  ;;  %v3330_v11 = vrot.slane %v3329_v47, 2  ;;  %v3336_v20 = vadd.f32 %v3335_v21, %v3334_v42  ;;  %v7748_v44 = vld [vmem:[#allocation71_spill] sm:$0xff]  ;;  %v7749_v42 = vld [vmem:[#allocation26_spill] sm:$0xff] }
 0x624   :  { %v3297_v15 = vrot.slane %v3296_v24, 1  ;;  %v3304_v43 = vrot.slane %v3303_v53, 1  ;;  %v3311_v9 = vrot.slane %v3310_v17, 1  ;;  %v3324_v0 = vadd.f32 %v3323_v57, %v3322_v45 }
 0x625   :  { %v3291_v25 = vadd.f32 %v3290_v48, %v3289_v60  ;;  %v3318_v26 = vrot.slane %v3317_v51, 1  ;;  %v3331_v56 = vadd.f32 %v3330_v11, %v3329_v47  ;;  %v3337_v49 = vrot.slane %v3336_v20, 2  ;;  %v5961_v60 = vld [vmem:[%s7679_s14] ss:$0 sm:$0xff] }
 0x626   :  { %v3298_v13 = vadd.f32 %v3297_v15, %v3296_v24  ;;  %v3305_v46 = vadd.f32 %v3304_v43, %v3303_v53  ;;  %v3312_v3 = vadd.f32 %v3311_v9, %v3310_v17  ;;  %v3325_v38 = vrot.slane %v3324_v0, 1  ;;  %v7752_v15 = vld [vmem:[#allocation70_spill] sm:$0xff] }
 0x627   :  { %v3332_v31 = vrot.slane %v3331_v56, 1  ;;  %v3338_v8 = vadd.f32 %v3337_v49, %v3336_v20  ;;  %v3319_v23 = vadd.f32 %v3318_v26, %v3317_v51  ;;  %v4273_v43 = vld [vmem:[%s7751_s12] sm:$0xff]  ;;  %v4274_v9 = vld [vmem:[%s7751_s12 + $0x8] sm:$0xff]  ;;  %v4275_v26 = vld [vmem:[%s7751_s12 + $0x10] sm:$0xff]  ;;  %vm7604_vm11 = vmmov 0  }
 0x628   :  { %v3439_v54 = vsel %vm1919_vm5, %v3298_v13, %v3291_v25  ;;  %v3326_v16 = vadd.f32 %v3325_v38, %v3324_v0  ;;  %v7753_v0 = vld [vmem:[#allocation72_spill] sm:$0xff]  ;;  %v5816_v25 = vpack.c.bf16 %v4274_v9, %v4273_v43  ;;  %v6022_v13 = vmov 0.0  }
 0x629   :  { %v3339_v63 = vrot.slane %v3338_v8, 1  ;;  %v3440_v28 = vsel %vm1921_vm7, %v3305_v46, %v3439_v54  ;;  %v3333_v52 = vadd.f32 %v3332_v31, %v3331_v56  ;;  %v4276_v56 = vld [vmem:[%s7751_s12 + $0x18] sm:$0xff] }
 0x62a   :  { %v3441_v2 = vsel %vm1923_vm8, %v3312_v3, %v3440_v28  ;;  %v5819_v49 = vpack.c.bf16 %v4276_v56, %v4275_v26  ;;  %v7754_v3 = vld [vmem:[#allocation35_spill] sm:$0xff] }
 0x62b   :  { %v3442_v4 = vsel %vm1925_vm9, %v3319_v23, %v3441_v2  ;;  %v3340_v22 = vadd.f32 %v3339_v63, %v3338_v8  ;;  %v7755_v8 = vld [vmem:[#allocation36_spill] sm:$0xff] }
 0x62c   :  { %v3443_v14 = vsel %vm1927_vm10, %v3326_v16, %v3442_v4 }
 0x62d   :  { %v3444_v39 = vsel %vm1929_vm12, %v3333_v52, %v3443_v14 }
 0x62e   :  { %v3445_v33 = vsel %vm1931_vm14, %v3340_v22, %v3444_v39 }
 0x62f   :  { %5521 = vmatmul.mubr.msk.f32.vlgmr.msra.gmra.mrb[26].mxu0 %vm1271_vm6, %v3445_v33 }
 0x630   :  { %5802 = vmatpush3.bf16.msra.mxu0 %v6774_v62 }
 0x631   :  { %5804 = vmatprep.subr.bf16.mxu0 %v6786_v5 }
 0x634   :  { %5806 = vmatpush3.bf16.msra.mxu0 %v6786_v5 }
 0x635   :  { %5808 = vmatprep.subr.bf16.mxu0 %v7748_v44 }
 0x702   :  { %v5522_v59 = vpop.f32.mrb[26].mxu0 }
 0x703   :  { %v5893_v30 = vadd.f32 %v5522_v59, %v7749_v42  ;;  %v3516_v58 = vpop.f32.mrb[27].mxu0 }
 0x704   :  { %v5894_v45 = vadd.f32 %v3516_v58, %v7750_v1 }
 0x705   :  { %v3528_v41 = vadd.f32 %v5961_v60, %v5893_v30 }
 0x706   :  { %v3527_v47 = vadd.f32 %v5961_v60, %v5894_v45 }
 0x707   :  { %vm3530_vm3 = vcmp.ge.f32.partialorder %v3528_v41, 0.0  ;;  %v3532_v21 = vmul.f32 0.01, %v3528_v41 }
 0x708   :  { %vm3529_vm4 = vcmp.ge.f32.partialorder %v3527_v47, 0.0  ;;  %v3531_v24 = vmul.f32 0.01, %v3527_v47 }
 0x709   :  { %v3534_v62 = vsel %vm3530_vm3, %v3528_v41, %v3532_v21 }
 0x70a   :  { %v3533_v53 = vsel %vm3529_vm4, %v3527_v47, %v3531_v24  ;;  %v4298_v5 = vrot.slane %v3534_v62, 7  ;;  %v4607_v17 = vrot.slane %v3534_v62, 1 }
 0x70b   :  { %5531 = vmatprep.mubr.msk.f32.mxu1 %vm1271_vm6, %v3533_v53  ;;  %5553 = vmatprep.mubr.msk.f32.mxu0 %vm1271_vm6, %v3533_v53  ;;  %v4456_v57 = vrot.slane %v3533_v53, 1  ;;  %v4606_v48 = vrot.slane %v3533_v53, 2 }
 0x70c   :  { %5532 = vmatmul.mubr.msk.f32.vlgmr.msra.gmra.mrb[36].mxu1 %vm1271_vm6, %v3534_v62  ;;  %5554 = vmatmul.mubr.msk.f32.vlgmr.msra.gmra.mrb[28].mxu0 %vm1271_vm6, %v3534_v62  ;;  %v4299_v51 = vsel %vm1919_vm5, %v4298_v5, %v3533_v53 }
 0x70d   :  { %5794 = vmatpush3.bf16.msra.mxu1 %v6794_v50  ;;  %5542 = vmatprep.mubr.msk.f32.mxu1 %vm1271_vm6, %v3533_v53  ;;  %v7236_v11 = vsel %vm1919_vm5, %v3534_v62, %v4456_v57  ;;  %v7239_v20 = vsel %vm1919_vm5, %v4607_v17, %v4606_v48  ;;  %v6020_v50 = vmov 0.0|0.0   ;;  %v7756_v48 = vld [vmem:[#allocation31_spill] sm:$0xff] }
 0x70e   :  { %5796 = vmatprep.subr.bf16.mxu1 %v7752_v15  ;;  %5810 = vmatpush3.bf16.msra.mxu0 %v7748_v44 }
 0x70f   :  { %5812 = vmatprep.subr.bf16.mxu0 %v7753_v0 }
 0x711   :  { %5798 = vmatpush3.bf16.msra.mxu1 %v7752_v15 }
 0x712   :  { %5815 = vmatprep.subr.bf16.mxu1 %v6020_v50  ;;  %5814 = vmatpush3.bf16.msra.mxu0 %v7753_v0 }
 0x713   :  { %5851 = vmatprep.subr.bf16.mxu0 %v6020_v50 }
 0x714   :  { %5543 = vmatmul.mubr.msk.f32.vlgmr.msra.gmra.mrb[38].mxu1 %vm1271_vm6, %v3534_v62 }
 0x715   :  { %5817 = vmatpush3.bf16.msra.mxu1 %v5816_v25  ;;  %5575 = vmatprep.mubr.msk.f32.mxu1 %vm7604_vm11, %v6022_v13  ;;  %v7757_v25 = vld [vmem:[#allocation29_spill] sm:$0xff] }
 0x716   :  { %5818 = vmatprep.subr.bf16.mxu1 %v6020_v50 }
 0x719   :  { %5820 = vmatpush3.bf16.msra.mxu1 %v5819_v49 }
 0x71a   :  { %5821 = vmatprep.subr.bf16.mxu1 %v6020_v50 }
 0x71c   :  { %5576 = vmatmul.mubr.msk.f32.vlgmr.msra.gmra.mrb[40].mxu1 %vm1271_vm6, %v4299_v51 }
 0x71d   :  { %5586 = vmatprep.mubr.msk.f32.mxu1 %vm7604_vm11, %v6022_v13 }
 0x7df   :  { %v5533_v46 = vpop.f32.mrb[36].mxu1 }
 0x7e0   :  { %v3613_v38 = vadd.f32 %v5533_v46, %v7754_v3  ;;  %v3607_v31 = vpop.f32.mrb[37].mxu1 }
 0x7e1   :  { %v3608_v54 = vadd.f32 %v3607_v31, %v7755_v8 }
 0x7e2   :  { %v3742_v23 = vcombine.high %v3613_v38, %v3613_v38  ;;  %v3749_v63 = vrot.slane %v3613_v38, %v6487_v36 }
 0x7e3   :  { %v3693_v28 = vcombine.high %v3608_v54, %v3608_v54  ;;  %v3700_v16 = vrot.slane %v3608_v54, %v6487_v36 }
 0x7e4   :  { %v3756_v2 = vrot.slane %v3742_v23, %v6487_v36  ;;  %v3757_v52 = vcombine.high %v3749_v63, %v3749_v63  ;;  %v3765_v4 = vrot.slane %v3749_v63, %v6487_v36 }
 0x7e5   :  { %v3707_v22 = vrot.slane %v3693_v28, %v6487_v36  ;;  %v3708_v14 = vcombine.high %v3700_v16, %v3700_v16  ;;  %v3716_v58 = vrot.slane %v3700_v16, %v6487_v36  ;;  %v7758_v16 = vld [vmem:[#allocation42_spill] sm:$0xff] }
 0x7e6   :  { %v3758_v39 = vcombine.high %v3756_v2, %v3756_v2  ;;  %v3772_v33 = vrot.slane %v3756_v2, %v6487_v36  ;;  %v3779_v44 = vrot.slane %v3757_v52, %v6487_v36  ;;  %v3787_v59 = vcombine.high %v3765_v4, %v3765_v4  ;;  %v7759_v52 = vld [vmem:[#allocation32_spill] sm:$0xff] }
 0x7e7   :  { %v3826_v42 = vrot.slane %v3765_v4, %v6358_v61  ;;  %v3709_v30 = vcombine.high %v3707_v22, %v3707_v22  ;;  %v5544_v1 = vpop.f32.mrb[38].mxu1  ;;  %v3723_v24 = vrot.slane %v3707_v22, %v6487_v36  ;;  %v3730_v62 = vrot.slane %v3708_v14, %v6487_v36  ;;  %v7760_v22 = vld [vmem:[#allocation74_spill] sm:$0xff] }
 0x7e8   :  { %v3786_v45 = vrot.slane %v3758_v39, %v6487_v36  ;;  %v3788_v60 = vcombine.high %v3772_v33, %v3772_v33  ;;  %v3789_v41 = vcombine.high %v3779_v44, %v3779_v44  ;;  %v3830_v47 = vrot.slane %v3779_v44, %v6358_v61  ;;  %v3682_v21 = vpop.f32.mrb[39].mxu1  ;;  %v7761_v39 = vld [vmem:[#allocation73_spill] sm:$0xff]  ;;  %v7762_v44 = vld [vmem:[#allocation76_spill] sm:$0xff] }
 0x7e9   :  { %v3737_v53 = vrot.slane %v3709_v30, %v6487_v36  ;;  %v3834_v17 = vrot.slane %v3787_v59, %v6358_v61  ;;  %v3842_v57 = vrot.slane %v3772_v33, %v6358_v61  ;;  %v3879_v51 = vadd.f32 %v3826_v42, %v7756_v48  ;;  %v7763_v42 = vld [vmem:[#allocation75_spill] sm:$0xff]  ;;  %v7770_v48 = vld [vmem:[#allocation41_spill] sm:$0xff] }
 0x7ea   :  { %v3790_v5 = vcombine.high %v3786_v45, %v3786_v45  ;;  %v3738_v15 = vcombine.high %v3716_v58, %v3716_v58  ;;  %v3838_v43 = vrot.slane %v3789_v41, %v6358_v61  ;;  %v3846_v9 = vrot.slane %v3786_v45, %v6358_v61 }
 0x7eb   :  { %v3850_v0 = vrot.slane %v3788_v60, %v6358_v61  ;;  %v3880_v26 = vadd.f32 %v3830_v47, %v7757_v25  ;;  %v3739_v56 = vcombine.high %v3723_v24, %v3723_v24  ;;  %v3740_v49 = vcombine.high %v3730_v62, %v3730_v62  ;;  %v7765_v60 = vld [vmem:[#allocation77_spill] sm:$0xff]  ;;  %v7766_v47 = vld [vmem:[#allocation28_spill] sm:$0xff]  ;;  %v7771_v25 = vld [vmem:[#allocation30_spill] sm:$0xff] }
 0x7ec   :  { %v3741_v46 = vcombine.high %v3737_v53, %v3737_v53  ;;  %v3794_v36 = vrot.slane %v3716_v58, %v6358_v61  ;;  %v3854_v3 = vrot.slane %v3790_v5, %v6358_v61  ;;  %v3798_v38 = vrot.slane %v3730_v62, %v6358_v61  ;;  %v7764_v58 = vld [vmem:[#allocation78_spill] sm:$0xff] }
 0x7ed   :  { %v3802_v31 = vrot.slane %v3738_v15, %v6358_v61  ;;  %v3810_v8 = vrot.slane %v3723_v24, %v6358_v61  ;;  %v3806_v54 = vrot.slane %v3740_v49, %v6358_v61  ;;  %v3814_v23 = vrot.slane %v3737_v53, %v6358_v61  ;;  %v7768_v53 = vld [vmem:[#allocation37_spill] sm:$0xff]  ;;  %v7772_v49 = vld [vmem:[#allocation34_spill] sm:$0xff] }
 0x7ee   :  { %v3818_v63 = vrot.slane %v3739_v56, %v6358_v61  ;;  %v3822_v28 = vrot.slane %v3741_v46, %v6358_v61  ;;  %v3881_v2 = vadd.f32 %v3834_v17, %v7758_v16  ;;  %v7294_v4 = vadd.f32 %v3842_v57, %v7759_v52  ;;  %v7767_v61 = vld [vmem:[#allocation79_spill] sm:$0xff]  ;;  %v7769_v17 = vld [vmem:[#allocation38_spill] sm:$0xff] }
 0x7ef   :  { %v3871_v14 = vadd.f32 %v3794_v36, %v7760_v22  ;;  %v3872_v33 = vadd.f32 %v3798_v38, %v7761_v39  ;;  %v3873_v59 = vadd.f32 %v3802_v31, %v7762_v44  ;;  %v3874_v30 = vadd.f32 %v3806_v54, %v7763_v42  ;;  %v7773_v36 = vld [vmem:[#allocation33_spill] sm:$0xff] }
 0x7f0   :  { %v3875_v45 = vadd.f32 %v3810_v8, %v7764_v58  ;;  %v3876_v41 = vadd.f32 %v3814_v23, %v7765_v60  ;;  %v3877_v24 = vadd.f32 %v3818_v63, %v7766_v47  ;;  %v3878_v62 = vadd.f32 %v3822_v28, %v7767_v61 }
 0x7f1   :  { %v7305_v5 = vadd.f32 %v5544_v1, %v7768_v53  ;;  %v3683_v57 = vadd.f32 %v3682_v21, %v7769_v17  ;;  %v3882_v15 = vadd.f32 %v3838_v43, %v7770_v48  ;;  %v7310_v56 = vadd.f32 %v3846_v9, %v7771_v25  ;;  %v7774_v17 = vld [vmem:[#allocation63_spill] sm:$0xff]  ;;  %v7775_v48 = vld [vmem:[#allocation66_spill] sm:$0xff] }
 0x7f2   :  { %v7313_v46 = vadd.f32 %v3850_v0, %v7772_v49  ;;  %v7316_v38 = vadd.f32 %v3854_v3, %v7773_v36 }
 0x7f3   :  { %v7319_v31 = vadd.f32 %v3879_v51, %v7305_v5  ;;  %v7322_v8 = vadd.f32 %v3880_v26, %v7305_v5  ;;  %v7325_v1 = vadd.f32 %v3881_v2, %v7305_v5  ;;  %v3887_v21 = vadd.f32 %v3871_v14, %v3683_v57 }
 0x7f4   :  { %v3888_v43 = vadd.f32 %v3872_v33, %v3683_v57  ;;  %v3889_v54 = vadd.f32 %v3873_v59, %v3683_v57  ;;  %v3890_v9 = vadd.f32 %v3874_v30, %v3683_v57  ;;  %v3891_v23 = vadd.f32 %v3875_v45, %v3683_v57 }
 0x7f5   :  { %v3892_v63 = vadd.f32 %v3876_v41, %v3683_v57  ;;  %v3893_v0 = vadd.f32 %v3877_v24, %v3683_v57  ;;  %v3894_v28 = vadd.f32 %v3878_v62, %v3683_v57  ;;  %vm3903_vm13 = vcmp.ge.f32.partialorder %v3887_v21, 0.0 }
 0x7f6   :  { %vm3904_vm15 = vcmp.ge.f32.partialorder %v3888_v43, 0.0  ;;  %vm3905_vm0 = vcmp.ge.f32.partialorder %v3889_v54, 0.0  ;;  %vm3906_vm1 = vcmp.ge.f32.partialorder %v3890_v9, 0.0  ;;  %vm3907_vm2 = vcmp.ge.f32.partialorder %v3891_v23, 0.0 }
 0x7f7   :  { %vm3908_vm3 = vcmp.ge.f32.partialorder %v3892_v63, 0.0  ;;  %vm3909_vm4 = vcmp.ge.f32.partialorder %v3893_v0, 0.0  ;;  %vm3910_vm11 = vcmp.ge.f32.partialorder %v3894_v28, 0.0  ;;  %v3919_v51 = vmul.f32 0.01, %v3887_v21 }
 0x7f8   :  { %v3920_v26 = vmul.f32 0.01, %v3888_v43  ;;  %v3921_v3 = vmul.f32 0.01, %v3889_v54  ;;  %v3922_v16 = vmul.f32 0.01, %v3890_v9  ;;  %v7328_v2 = vadd.f32 %v3882_v15, %v7305_v5 }
 0x7f9   :  { %v3923_v52 = vmul.f32 0.01, %v3891_v23  ;;  %v3924_v22 = vmul.f32 0.01, %v3892_v63  ;;  %v3925_v14 = vmul.f32 0.01, %v3893_v0  ;;  %v3935_v39 = vsel %vm3903_vm13, %v3887_v21, %v3919_v51 }
 0x7fa   :  { %v3926_v33 = vmul.f32 0.01, %v3894_v28  ;;  %v3936_v44 = vsel %vm3904_vm15, %v3888_v43, %v3920_v26  ;;  %v3937_v59 = vsel %vm3905_vm0, %v3889_v54, %v3921_v3  ;;  %v3938_v42 = vsel %vm3906_vm1, %v3890_v9, %v3922_v16 }
 0x7fb   :  { %v3939_v30 = vsel %vm3907_vm2, %v3891_v23, %v3923_v52  ;;  %v3940_v58 = vsel %vm3908_vm3, %v3892_v63, %v3924_v22  ;;  %v3941_v45 = vsel %vm3909_vm4, %v3893_v0, %v3925_v14  ;;  %v3951_v60 = vmul.f32 %v3935_v39, %v6484_v34 }
 0x7fc   :  { %v3942_v41 = vsel %vm3910_vm11, %v3894_v28, %v3926_v33  ;;  %v3952_v47 = vmul.f32 %v3936_v44, %v6504_v35  ;;  %v3953_v24 = vmul.f32 %v3937_v59, %v6493_v18  ;;  %v3954_v61 = vmul.f32 %v3938_v42, %v6585_v55 }
 0x7fd   :  { %v3955_v62 = vmul.f32 %v3939_v30, %v6617_v27  ;;  %v3956_v53 = vmul.f32 %v3940_v58, %v7712_v10  ;;  %v3957_v57 = vmul.f32 %v3941_v45, %v7774_v17  ;;  %v3958_v15 = vmul.f32 %v3942_v41, %v7775_v48 }
 0x7fe   :  { %v3967_v25 = vsel %vm1271_vm6, %v3951_v60, 0.0  ;;  %v3974_v34 = vsel %vm1271_vm6, %v3952_v47, 0.0  ;;  %v3981_v49 = vsel %vm1271_vm6, %v3953_v24, 0.0  ;;  %v3988_v35 = vsel %vm1271_vm6, %v3954_v61, 0.0 }
 0x7ff   :  { %v3968_v36 = vrot.slane %v3967_v25, 4  ;;  %v3975_v18 = vrot.slane %v3974_v34, 4  ;;  %v3982_v21 = vrot.slane %v3981_v49, 4  ;;  %v3989_v55 = vrot.slane %v3988_v35, 4 }
 0x800   :  { %v3995_v27 = vsel %vm1271_vm6, %v3955_v62, 0.0  ;;  %v4002_v10 = vsel %vm1271_vm6, %v3956_v53, 0.0  ;;  %v4009_v43 = vsel %vm1271_vm6, %v3957_v57, 0.0  ;;  %v4016_v54 = vsel %vm1271_vm6, %v3958_v15, 0.0 }
 0x801   :  { %v3969_v9 = vadd.f32 %v3968_v36, %v3967_v25  ;;  %v3976_v23 = vadd.f32 %v3975_v18, %v3974_v34  ;;  %v3983_v63 = vadd.f32 %v3982_v21, %v3981_v49  ;;  %v3990_v0 = vadd.f32 %v3989_v55, %v3988_v35 }
 0x802   :  { %v3996_v28 = vrot.slane %v3995_v27, 4  ;;  %v4003_v51 = vrot.slane %v4002_v10, 4  ;;  %v4010_v26 = vrot.slane %v4009_v43, 4  ;;  %v4017_v3 = vrot.slane %v4016_v54, 4 }
 0x803   :  { %v3970_v16 = vrot.slane %v3969_v9, 2  ;;  %v3977_v52 = vrot.slane %v3976_v23, 2  ;;  %v3984_v22 = vrot.slane %v3983_v63, 2  ;;  %v3991_v14 = vrot.slane %v3990_v0, 2 }
 0x804   :  { %v3997_v39 = vadd.f32 %v3996_v28, %v3995_v27  ;;  %v4004_v33 = vadd.f32 %v4003_v51, %v4002_v10  ;;  %v4011_v44 = vadd.f32 %v4010_v26, %v4009_v43  ;;  %v4018_v59 = vadd.f32 %v4017_v3, %v4016_v54 }
 0x805   :  { %v3971_v42 = vadd.f32 %v3970_v16, %v3969_v9  ;;  %v3978_v30 = vadd.f32 %v3977_v52, %v3976_v23  ;;  %v3985_v58 = vadd.f32 %v3984_v22, %v3983_v63  ;;  %v3992_v45 = vadd.f32 %v3991_v14, %v3990_v0 }
 0x806   :  { %v3998_v60 = vrot.slane %v3997_v39, 2  ;;  %v4005_v41 = vrot.slane %v4004_v33, 2  ;;  %v4012_v47 = vrot.slane %v4011_v44, 2  ;;  %v4019_v24 = vrot.slane %v4018_v59, 2 }
 0x807   :  { %v3972_v61 = vrot.slane %v3971_v42, 1  ;;  %v3979_v62 = vrot.slane %v3978_v30, 1  ;;  %v3986_v53 = vrot.slane %v3985_v58, 1  ;;  %v3993_v17 = vrot.slane %v3992_v45, 1 }
 0x808   :  { %v3999_v57 = vadd.f32 %v3998_v60, %v3997_v39  ;;  %v4006_v48 = vadd.f32 %v4005_v41, %v4004_v33  ;;  %v4013_v15 = vadd.f32 %v4012_v47, %v4011_v44  ;;  %v4020_v25 = vadd.f32 %v4019_v24, %v4018_v59 }
 0x809   :  { %v3973_v34 = vadd.f32 %v3972_v61, %v3971_v42  ;;  %v3980_v49 = vadd.f32 %v3979_v62, %v3978_v30  ;;  %v3987_v35 = vadd.f32 %v3986_v53, %v3985_v58  ;;  %v3994_v36 = vadd.f32 %v3993_v17, %v3992_v45 }
 0x80a   :  { %v4000_v18 = vrot.slane %v3999_v57, 1  ;;  %v4007_v21 = vrot.slane %v4006_v48, 1  ;;  %v4014_v55 = vrot.slane %v4013_v15, 1  ;;  %v4021_v27 = vrot.slane %v4020_v25, 1 }
 0x80b   :  { %v4170_v10 = vsel %vm1919_vm5, %v3980_v49, %v3973_v34  ;;  %v3899_v43 = vadd.f32 %v7294_v4, %v7305_v5  ;;  %v3900_v54 = vadd.f32 %v7310_v56, %v7305_v5  ;;  %v3901_v9 = vadd.f32 %v7313_v46, %v7305_v5 }
 0x80c   :  { %v4001_v23 = vadd.f32 %v4000_v18, %v3999_v57  ;;  %v4008_v63 = vadd.f32 %v4007_v21, %v4006_v48  ;;  %v4015_v0 = vadd.f32 %v4014_v55, %v4013_v15  ;;  %v4022_v28 = vadd.f32 %v4021_v27, %v4020_v25 }
 0x80d   :  { %v4171_v51 = vsel %vm1921_vm7, %v3987_v35, %v4170_v10  ;;  %v3902_v26 = vadd.f32 %v7316_v38, %v7305_v5  ;;  %vm3911_vm11 = vcmp.ge.f32.partialorder %v7319_v31, 0.0  ;;  %vm3912_vm13 = vcmp.ge.f32.partialorder %v7322_v8, 0.0 }
 0x80e   :  { %v4172_v4 = vsel %vm1923_vm8, %v3994_v36, %v4171_v51  ;;  %vm3913_vm15 = vcmp.ge.f32.partialorder %v7325_v1, 0.0  ;;  %vm3914_vm0 = vcmp.ge.f32.partialorder %v7328_v2, 0.0  ;;  %vm3915_vm1 = vcmp.ge.f32.partialorder %v3899_v43, 0.0 }
 0x80f   :  { %v4173_v56 = vsel %vm1925_vm9, %v4001_v23, %v4172_v4  ;;  %vm3916_vm2 = vcmp.ge.f32.partialorder %v3900_v54, 0.0  ;;  %vm3917_vm3 = vcmp.ge.f32.partialorder %v3901_v9, 0.0  ;;  %vm3918_vm4 = vcmp.ge.f32.partialorder %v3902_v26, 0.0 }
 0x810   :  { %v4174_v46 = vsel %vm1927_vm10, %v4008_v63, %v4173_v56  ;;  %v3927_v5 = vmul.f32 0.01, %v7319_v31  ;;  %v3928_v38 = vmul.f32 0.01, %v7322_v8  ;;  %v3929_v3 = vmul.f32 0.01, %v7325_v1 }
 0x811   :  { %v4175_v16 = vsel %vm1929_vm12, %v4015_v0, %v4174_v46  ;;  %v3930_v52 = vmul.f32 0.01, %v7328_v2  ;;  %v3931_v22 = vmul.f32 0.01, %v3899_v43  ;;  %v3932_v14 = vmul.f32 0.01, %v3900_v54 }
 0x812   :  { %v4176_v39 = vsel %vm1931_vm14, %v4022_v28, %v4175_v16  ;;  %v3933_v33 = vmul.f32 0.01, %v3901_v9  ;;  %v3934_v44 = vmul.f32 0.01, %v3902_v26  ;;  %v3943_v59 = vsel %vm3911_vm11, %v7319_v31, %v3927_v5 }
 0x813   :  { %5564 = vmatprep.mubr.msk.f32.mxu0 %vm1271_vm6, %v4176_v39  ;;  %v3944_v42 = vsel %vm3912_vm13, %v7322_v8, %v3928_v38  ;;  %v3945_v30 = vsel %vm3913_vm15, %v7325_v1, %v3929_v3  ;;  %v3946_v58 = vsel %vm3914_vm0, %v7328_v2, %v3930_v52  ;;  %v3947_v45 = vsel %vm3915_vm1, %v3899_v43, %v3931_v22 }
 0x814   :  { %v3948_v60 = vsel %vm3916_vm2, %v3900_v54, %v3932_v14  ;;  %v3949_v31 = vsel %vm3917_vm3, %v3901_v9, %v3933_v33  ;;  %v3950_v41 = vsel %vm3918_vm4, %v3902_v26, %v3934_v44  ;;  %v3959_v47 = vmul.f32 %v3943_v59, %v6522_v32 }
 0x815   :  { %v3960_v8 = vmul.f32 %v3944_v42, %v6547_v12  ;;  %v3961_v24 = vmul.f32 %v3945_v30, %v7715_v40  ;;  %v3962_v1 = vmul.f32 %v3946_v58, %v7716_v6  ;;  %v3963_v61 = vmul.f32 %v3947_v45, %v7717_v29 }
 0x816   :  { %v3964_v2 = vmul.f32 %v3948_v60, %v7718_v37  ;;  %v3965_v62 = vmul.f32 %v3949_v31, %v7719_v7  ;;  %v3966_v53 = vmul.f32 %v3950_v41, %v7720_v19  ;;  %v4023_v17 = vsel %vm1271_vm6, %v3959_v47, 0.0 }
 0x817   :  { %v4024_v57 = vrot.slane %v4023_v17, 4  ;;  %v4030_v48 = vsel %vm1271_vm6, %v3960_v8, 0.0  ;;  %v4037_v32 = vsel %vm1271_vm6, %v3961_v24, 0.0  ;;  %v4044_v12 = vsel %vm1271_vm6, %v3962_v1, 0.0 }
 0x818   :  { %v4031_v40 = vrot.slane %v4030_v48, 4  ;;  %v4038_v15 = vrot.slane %v4037_v32, 4  ;;  %v4045_v6 = vrot.slane %v4044_v12, 4  ;;  %v4051_v29 = vsel %vm1271_vm6, %v3963_v61, 0.0 }
 0x819   :  { %v4025_v25 = vadd.f32 %v4024_v57, %v4023_v17  ;;  %v4052_v37 = vrot.slane %v4051_v29, 4  ;;  %v4058_v7 = vsel %vm1271_vm6, %v3964_v2, 0.0  ;;  %v4065_v19 = vsel %vm1271_vm6, %v3965_v62, 0.0 }
 0x81a   :  { %v4032_v34 = vadd.f32 %v4031_v40, %v4030_v48  ;;  %v4039_v49 = vadd.f32 %v4038_v15, %v4037_v32  ;;  %v4046_v35 = vadd.f32 %v4045_v6, %v4044_v12  ;;  %v4059_v36 = vrot.slane %v4058_v7, 4  ;;  %v4277_v32 = vld [vmem:[%s7751_s12 + $0x20] sm:$0xff]  ;;  %v4278_v12 = vld [vmem:[%s7751_s12 + $0x28] sm:$0xff]  ;;  %v4279_v15 = vld [vmem:[%s7751_s12 + $0x30] sm:$0xff] }
 0x81b   :  { %v4026_v18 = vrot.slane %v4025_v25, 2  ;;  %v4053_v21 = vadd.f32 %v4052_v37, %v4051_v29  ;;  %v4066_v55 = vrot.slane %v4065_v19, 4  ;;  %v4072_v27 = vsel %vm1271_vm6, %v3966_v53, 0.0  ;;  %v4280_v6 = vld [vmem:[%s7751_s12 + $0x38] sm:$0xff]  ;;  %v4760_v37 = vld [vmem:[%s7776_s20 + $0x8] sm:$0xff] }
 0x81c   :  { %v4033_v10 = vrot.slane %v4032_v34, 2  ;;  %v4040_v43 = vrot.slane %v4039_v49, 2  ;;  %v4047_v54 = vrot.slane %v4046_v35, 2  ;;  %v4060_v9 = vadd.f32 %v4059_v36, %v4058_v7  ;;  %v4761_v7 = vld [vmem:[%s7776_s20 + $0x10] sm:$0xff]  ;;  %v4764_v36 = vld [vmem:[%s7776_s20 + $0x28] sm:$0xff] }
 0x81d   :  { %v4027_v23 = vadd.f32 %v4026_v18, %v4025_v25  ;;  %v4054_v63 = vrot.slane %v4053_v21, 2  ;;  %v4067_v0 = vadd.f32 %v4066_v55, %v4065_v19  ;;  %v4073_v28 = vrot.slane %v4072_v27, 4  ;;  %v4759_v25 = vld [vmem:[%s7776_s20] sm:$0xff]  ;;  %v4766_v55 = vld [vmem:[%s7776_s20 + $0x38] sm:$0xff] }
 0x81e   :  { %v4034_v51 = vadd.f32 %v4033_v10, %v4032_v34  ;;  %v4041_v26 = vadd.f32 %v4040_v43, %v4039_v49  ;;  %v4048_v4 = vadd.f32 %v4047_v54, %v4046_v35  ;;  %v4061_v56 = vrot.slane %v4060_v9, 2  ;;  %v4762_v34 = vld [vmem:[%s7776_s20 + $0x18] sm:$0xff]  ;;  %v4763_v35 = vld [vmem:[%s7776_s20 + $0x20] sm:$0xff]  ;;  %v4768_v43 = vld [vmem:[%s7776_s20 + $0x48] sm:$0xff] }
 0x81f   :  { %v4028_v46 = vrot.slane %v4027_v23, 1  ;;  %v4055_v5 = vadd.f32 %v4054_v63, %v4053_v21  ;;  %v4068_v38 = vrot.slane %v4067_v0, 2  ;;  %v4074_v3 = vadd.f32 %v4073_v28, %v4072_v27  ;;  %v4765_v21 = vld [vmem:[%s7776_s20 + $0x30] sm:$0xff]  ;;  %v4767_v10 = vld [vmem:[%s7776_s20 + $0x40] sm:$0xff] }
 0x820   :  { %v4035_v16 = vrot.slane %v4034_v51, 1  ;;  %v4042_v52 = vrot.slane %v4041_v26, 1  ;;  %v4049_v22 = vrot.slane %v4048_v4, 1  ;;  %v4062_v14 = vadd.f32 %v4061_v56, %v4060_v9  ;;  %v7779_v28 = vld [vmem:[#allocation40_spill] sm:$0xff] }
 0x821   :  { %v4029_v39 = vadd.f32 %v4028_v46, %v4027_v23  ;;  %v4056_v33 = vrot.slane %v4055_v5, 1  ;;  %v4069_v44 = vadd.f32 %v4068_v38, %v4067_v0  ;;  %v4075_v59 = vrot.slane %v4074_v3, 2  ;;  %v7778_v23 = vld [vmem:[#allocation39_spill] sm:$0xff] }
 0x822   :  { %v4036_v42 = vadd.f32 %v4035_v16, %v4034_v51  ;;  %v4043_v30 = vadd.f32 %v4042_v52, %v4041_v26  ;;  %v4050_v58 = vadd.f32 %v4049_v22, %v4048_v4  ;;  %v4063_v45 = vrot.slane %v4062_v14, 1  ;;  %v5962_v26 = vld [vmem:[%s7721_s6] ss:$0 sm:$0xff]  ;;  %v4282_v38 = vld [vmem:[%s7751_s12 + $0x48] sm:$0xff] }
 0x823   :  { %v4070_v60 = vrot.slane %v4069_v44, 1  ;;  %v4076_v31 = vadd.f32 %v4075_v59, %v4074_v3  ;;  %v4057_v47 = vadd.f32 %v4056_v33, %v4055_v5  ;;  %v5822_v40 = vpack.c.bf16 %v4278_v12, %v4277_v32  ;;  %v4281_v5 = vld [vmem:[%s7751_s12 + $0x40] sm:$0xff]  ;;  %v4283_v59 = vld [vmem:[%s7751_s12 + $0x50] sm:$0xff] }
 0x824   :  { %v4177_v41 = vsel %vm1919_vm5, %v4036_v42, %v4029_v39  ;;  %v4064_v1 = vadd.f32 %v4063_v45, %v4062_v14  ;;  %v5825_v29 = vpack.c.bf16 %v4280_v6, %v4279_v15  ;;  %v5852_v19 = vpack.c.bf16 %v4760_v37, %v4759_v25  ;;  %v4284_v42 = vld [vmem:[%s7751_s12 + $0x58] sm:$0xff]  ;;  %v4295_v12 = vld [vmem:[%s7751_s12 + $0xb0] sm:$0xff]  ;;  %v4771_v25 = vld [vmem:[%s7776_s20 + $0x60] sm:$0xff] }
 0x825   :  { %v4077_v8 = vrot.slane %v4076_v31, 1  ;;  %v4178_v24 = vsel %vm1921_vm7, %v4043_v30, %v4177_v41  ;;  %v4071_v2 = vadd.f32 %v4070_v60, %v4069_v44  ;;  %vm7777_vm7 = vmmov 0   ;;  %5823 = vmatpush3.bf16.msra.mxu1 %v5822_v40  ;;  %v4286_v41 = vld [vmem:[%s7751_s12 + $0x68] sm:$0xff]  ;;  %v4296_v40 = vld [vmem:[%s7751_s12 + $0xb8] sm:$0xff]  ;;  %v4769_v6 = vld [vmem:[%s7776_s20 + $0x50] sm:$0xff] }
 0x826   :  { %v4179_v61 = vsel %vm1923_vm8, %v4050_v58, %v4178_v24  ;;  %5824 = vmatprep.subr.bf16.mxu1 %v6020_v50  ;;  %v5855_v49 = vpack.c.bf16 %v4762_v34, %v4761_v7  ;;  %v5858_v18 = vpack.c.bf16 %v4764_v36, %v4763_v35  ;;  %v5861_v27 = vpack.c.bf16 %v4766_v55, %v4765_v21  ;;  %v4288_v24 = vld [vmem:[%s7751_s12 + $0x78] sm:$0xff]  ;;  %v4772_v7 = vld [vmem:[%s7776_s20 + $0x68] sm:$0xff]  ;;  %v5088_v35 = vld [vmem:[%s7780_s27] ss:$0 sm:$0xff] }
 0x827   :  { %v4180_v62 = vsel %vm1925_vm9, %v4057_v47, %v4179_v61  ;;  %v4078_v53 = vadd.f32 %v4077_v8, %v4076_v31  ;;  %v5864_v54 = vpack.c.bf16 %v4768_v43, %v4767_v10  ;;  %v5828_v39 = vpack.c.bf16 %v4282_v38, %v4281_v5  ;;  %v4285_v31 = vld [vmem:[%s7751_s12 + $0x60] sm:$0xff]  ;;  %v4287_v8 = vld [vmem:[%s7751_s12 + $0x70] sm:$0xff]  ;;  %v4774_v34 = vld [vmem:[%s7776_s20 + $0x78] sm:$0xff] }
 0x828   :  { %v4181_v17 = vsel %vm1927_vm10, %v4064_v1, %v4180_v62  ;;  %v5831_v60 = vpack.c.bf16 %v4284_v42, %v4283_v59  ;;  %v5834_v47 = vpack.c.bf16 %v4286_v41, %v4285_v31  ;;  %v5837_v1 = vpack.c.bf16 %v4288_v24, %v4287_v8  ;;  %v4289_v61 = vld [vmem:[%s7751_s12 + $0x80] sm:$0xff] }
 0x829   :  { %v4182_v57 = vsel %vm1929_vm12, %v4071_v2, %v4181_v17  ;;  %5826 = vmatpush3.bf16.msra.mxu1 %v5825_v29  ;;  %v4290_v2 = vld [vmem:[%s7751_s12 + $0x88] sm:$0xff]  ;;  %v4292_v17 = vld [vmem:[%s7751_s12 + $0x98] sm:$0xff]  ;;  %v5849_v15 = vpack.c.bf16 %v4296_v40, %v4295_v12  ;;  %v4853_v55 = vld [vmem:[%s6182_s25] sm:$0xff] }
 0x82a   :  { %v4183_v48 = vsel %vm1931_vm14, %v4078_v53, %v4182_v57  ;;  %5827 = vmatprep.subr.bf16.mxu1 %v6020_v50  ;;  %v5840_v62 = vpack.c.bf16 %v4290_v2, %v4289_v61  ;;  %v4291_v53 = vld [vmem:[%s7751_s12 + $0x90] sm:$0xff]  ;;  %v4293_v57 = vld [vmem:[%s7751_s12 + $0xa0] sm:$0xff]  ;;  %v4770_v29 = vld [vmem:[%s7776_s20 + $0x58] sm:$0xff] }
 0x82b   :  { %5565 = vmatmul.mubr.msk.f32.vlgmr.msra.gmra.mrb[28].mxu0 %vm1271_vm6, %v4183_v48  ;;  %v4294_v48 = vld [vmem:[%s7751_s12 + $0xa8] sm:$0xff]  ;;  %v5867_v37 = vpack.c.bf16 %v4770_v29, %v4769_v6 }
 0x82c   :  { %5665 = vmatprep.mubr.msk.f32.mxu0 %vm7777_vm7, %v6022_v13  ;;  %5853 = vmatpush3.bf16.msra.mxu0 %v5852_v19  ;;  %v5846_v32 = vpack.c.bf16 %v4294_v48, %v4293_v57  ;;  %v4773_v19 = vld [vmem:[%s7776_s20 + $0x70] sm:$0xff] }
 0x82d   :  { %5854 = vmatprep.subr.bf16.mxu0 %v6020_v50 }
 0x830   :  { %5856 = vmatpush3.bf16.msra.mxu0 %v5855_v49  ;;  %v5873_v49 = vpack.c.bf16 %v4774_v34, %v4773_v19 }
 0x831   :  { %5857 = vmatprep.subr.bf16.mxu0 %v6020_v50 }
 0x834   :  { %5859 = vmatpush3.bf16.msra.mxu0 %v5858_v18 }
 0x835   :  { %5860 = vmatprep.subr.bf16.mxu0 %v6020_v50 }
 0x838   :  { %5862 = vmatpush3.bf16.msra.mxu0 %v5861_v27  ;;  %v4854_v27 = vld [vmem:[%s6182_s25 + $0x8] sm:$0xff] }
 0x839   :  { %5863 = vmatprep.subr.bf16.mxu0 %v6020_v50  ;;  %v5876_v10 = vpack.c.bf16 %v4854_v27, %v4853_v55 }
 0x83c   :  { %5865 = vmatpush3.bf16.msra.mxu0 %v5864_v54  ;;  %v4855_v54 = vld [vmem:[%s6182_s25 + $0x10] sm:$0xff] }
 0x83d   :  { %5866 = vmatprep.subr.bf16.mxu0 %v6020_v50 }
 0x840   :  { %5868 = vmatpush3.bf16.msra.mxu0 %v5867_v37 }
 0x841   :  { %5869 = vmatprep.subr.bf16.mxu0 %v6020_v50 }
 0x8fe   :  { %v5566_v9 = vpop.f32.mrb[28].mxu0 }
 0x8ff   :  { %v5895_v63 = vadd.f32 %v5566_v9, %v7778_v23  ;;  %v4254_v0 = vpop.f32.mrb[29].mxu0  ;;  %v4856_v9 = vld [vmem:[%s6182_s25 + $0x18] sm:$0xff]  ;;  %v4857_v23 = vld [vmem:[%s6182_s25 + $0x20] sm:$0xff] }
 0x900   :  { %v5896_v51 = vadd.f32 %v4254_v0, %v7779_v28  ;;  %v4858_v0 = vld [vmem:[%s6182_s25 + $0x28] sm:$0xff] }
 0x901   :  { %v4266_v4 = vadd.f32 %v5962_v26, %v5895_v63  ;;  %v5879_v63 = vpack.c.bf16 %v4856_v9, %v4855_v54  ;;  %v5882_v28 = vpack.c.bf16 %v4858_v0, %v4857_v23 }
 0x902   :  { %v4265_v56 = vadd.f32 %v5962_v26, %v5896_v51  ;;  %v4859_v51 = vld [vmem:[%s6182_s25 + $0x30] sm:$0xff]  ;;  %v4860_v26 = vld [vmem:[%s6182_s25 + $0x38] sm:$0xff]  ;;  %s6023_s25 = smov [#allocation2]  }
 0x903   :  { %vm4268_vm8 = vcmp.ge.f32.partialorder %v4266_v4, 0.0  ;;  %v4270_v46 = vmul.f32 0.01, %v4266_v4  ;;  %s4955_s28 = sshll.u32 %s6023_s25, 4  ;;  %s4956_s28 = int_to_ptr.vmem [resolvable:$true] %s4955_s28 }
 0x904   :  { %vm4267_vm9 = vcmp.ge.f32.partialorder %v4265_v56, 0.0  ;;  %v4269_v3 = vmul.f32 0.01, %v4265_v56  ;;  %p5968_p1 = scmp.lt.s32.totalorder %s4956_s28, %s4956_s28 }
 0x905   :  { %v4272_v16 = vsel %vm4268_vm8, %v4266_v4, %v4270_v46  ;;  %v5885_v4 = vpack.c.bf16 %v4860_v26, %v4859_v51 }
 0x906   :  { %v4381_v52 = vrot.slane %v4272_v16, 7  ;;  %v4683_v22 = vrot.slane %v4272_v16, 1  ;;  %v4271_v14 = vsel %vm4267_vm9, %v4265_v56, %v4269_v3  ;;  %v5095_v3 = vld [vmem:[%s6187_s30] ss:$0 sm:$0xff] }
 0x907   :  { %v4531_v33 = vrot.slane %v4271_v14, 1  ;;  %v4682_v44 = vrot.slane %v4271_v14, 2 }
 0x908   :  { %v4382_v30 = vsel %vm1919_vm5, %v4381_v52, %v4271_v14 }
 0x909   :  { %5587 = vmatmul.mubr.msk.f32.vlgmr.msra.gmra.mrb[40].mxu1 %vm1271_vm6, %v4382_v30  ;;  %v4532_v58 = vsel %vm1919_vm5, %v4272_v16, %v4531_v33  ;;  %v4684_v45 = vsel %vm1919_vm5, %v4683_v22, %v4682_v44  ;;  %vm4947_vm5 = vcmask 17408  }
 0x90a   :  { %5829 = vmatpush3.bf16.msra.mxu1 %v5828_v39  ;;  %5597 = vmatprep.mubr.msk.f32.mxu1 %vm7777_vm7, %v6022_v13 }
 0x90b   :  { %5830 = vmatprep.subr.bf16.mxu1 %v6020_v50 }
 0x90e   :  { %5832 = vmatpush3.bf16.msra.mxu1 %v5831_v60 }
 0x90f   :  { %5833 = vmatprep.subr.bf16.mxu1 %v6020_v50 }
 0x911   :  { %5598 = vmatmul.mubr.msk.f32.vlgmr.msra.gmra.mrb[40].mxu1 %vm1271_vm6, %v7236_v11  ;;  %v5843_v11 = vpack.c.bf16 %v4292_v17, %v4291_v53 }
 0x912   :  { %5835 = vmatpush3.bf16.msra.mxu1 %v5834_v47  ;;  %5608 = vmatprep.mubr.msk.f32.mxu1 %vm7777_vm7, %v6022_v13 }
 0x913   :  { %5836 = vmatprep.subr.bf16.mxu1 %v6020_v50 }
 0x916   :  { %5838 = vmatpush3.bf16.msra.mxu1 %v5837_v1 }
 0x917   :  { %5839 = vmatprep.subr.bf16.mxu1 %v6020_v50 }
 0x919   :  { %5609 = vmatmul.mubr.msk.f32.vlgmr.msra.gmra.mrb[40].mxu1 %vm1271_vm6, %v4532_v58 }
 0x91a   :  { %5841 = vmatpush3.bf16.msra.mxu1 %v5840_v62  ;;  %5619 = vmatprep.mubr.msk.f32.mxu1 %vm7777_vm7, %v6022_v13 }
 0x91b   :  { %5842 = vmatprep.subr.bf16.mxu1 %v6020_v50 }
 0x91e   :  { %5844 = vmatpush3.bf16.msra.mxu1 %v5843_v11 }
 0x91f   :  { %5845 = vmatprep.subr.bf16.mxu1 %v6020_v50 }
 0x921   :  { %5620 = vmatmul.mubr.msk.f32.vlgmr.msra.gmra.mrb[40].mxu1 %vm1271_vm6, %v7239_v20  ;;  %v5870_v20 = vpack.c.bf16 %v4772_v7, %v4771_v25 }
 0x922   :  { %5847 = vmatpush3.bf16.msra.mxu1 %v5846_v32  ;;  %5630 = vmatprep.mubr.msk.f32.mxu1 %vm7777_vm7, %v6022_v13 }
 0x923   :  { %5848 = vmatprep.subr.bf16.mxu1 %v6020_v50  ;;  %5871 = vmatpush3.bf16.msra.mxu0 %v5870_v20 }
 0x924   :  { %5872 = vmatprep.subr.bf16.mxu0 %v6020_v50 }
 0x926   :  { %5850 = vmatpush3.bf16.msra.mxu1 %v5849_v15 }
 0x927   :  { %5874 = vmatpush3.bf16.msra.mxu0 %v5873_v49 }
 0x928   :  { %5875 = vmatprep.subr.bf16.mxu0 %v6020_v50 }
 0x929   :  { %5631 = vmatmul.mubr.msk.f32.vlgmr.msra.gmra.mrb[40].mxu1 %vm1271_vm6, %v4684_v45  ;;  %vm4868_vm6 = vcmask 523264  }
 0x9fc   :  { %v4753_v36 = vpop.f32.mrb[40].mxu1 }
 0x9fd   :  { %v5897_v18 = vadd.f32 %v5088_v35, %v4753_v36  ;;  %v5632_v21 = vpop.f32.mrb[41].mxu1 }
 0x9ff   :  { %5953 = vtanh.f32 %v5897_v18 }
 0xa09   :  { %v5954_v43 = vpop.eup %5953 }
 0xa0a   :  { %5666 = vmatmul.mubr.f32.vlgmr.msra.gmra.mrb[30].mxu0 %v5954_v43 }
 0xa0b   :  { %5877 = vmatpush3.bf16.msra.mxu0 %v5876_v10  ;;  %5684 = vmatprep.mubr.msk.f32.mxu0 %vm7777_vm7, %v6022_v13  ;;  %v5094_v13 = vld [vmem:[%s6177_s4] ss:$0 sm:$0xff]  ;;  %s5963_s4 = scalar_lea.vmem %s4956_s28, 32 }
 0xa0c   :  { %5878 = vmatprep.subr.bf16.mxu0 %v6020_v50  ;;  %p5964_p0 = scmp.ne.s32.totalorder %s4956_s28, %s5963_s4  ;;  %p5969_p2 = scmp.lt.s32.totalorder %s5963_s4, %s5963_s4 }
 0xa0e   :  { %p5970_p3 = por %p5969_p2, %p5968_p1 }
 0xa0f   :  { %5880 = vmatpush3.bf16.msra.mxu0 %v5879_v63 }
 0xa10   :  { %5881 = vmatprep.subr.bf16.mxu0 %v6020_v50  ;;  %p5971_p4 = pnand %p5970_p3, %p5964_p0 }
 0xa13   :  { %5883 = vmatpush3.bf16.msra.mxu0 %v5882_v28 }
 0xa14   :  { %5884 = vmatprep.subr.bf16.mxu0 %v6020_v50 }
 0xa17   :  { %5886 = vmatpush3.bf16.msra.mxu0 %v5885_v4 }
 0xadd   :  { %v4848_v56 = vpop.f32.mrb[30].mxu0 }
 0xade   :  { %v4849_v46 = vadd.f32 %v5094_v13, %v4848_v56  ;;  %v5667_v5 = vpop.f32.mrb[31].mxu0 }
 0xae0   :  { %5955 = vtanh.f32 %v4849_v46 }
 0xaea   :  { %v5956_v38 = vpop.eup %5955 }
 0xaeb   :  { %5685 = vmatmul.mubr.msk.f32.vlgmr.msra.gmra.mrb[32].mxu0 %vm4868_vm6, %v5956_v38 }
 0xbbe   :  { %v4938_v16 = vpop.f32.mrb[32].mxu0 }
 0xbbf   :  { %v4939_v52 = vadd.f32 %v5095_v3, %v4938_v16  ;;  %v5686_v22 = vpop.f32.mrb[33].mxu0 }
 0xbc1   :  { %v4942_v14 = vsub.f32 0.0, %v4939_v52 }
 0xbc3   :  { %v4943_v39 = vmul.f32 1.442695, %v4942_v14 }
 0xbc5   :  { %5957 = vpow2.f32 %v4943_v39 }
 0xbcf   :  { %v5958_v33 = vpop.eup %5957 }
 0xbd0   :  { %v4945_v44 = vadd.f32 1.0, %v5958_v33 }
 0xbd2   :  { %5959 = vrcp.f32 %v4945_v44 }
 0xbdc   :  { %v5960_v50 = vpop.eup %5959 }
 0xbdd   :  { %4948 = vst.msk [vmem:[#allocation2] sm:$0x3] %vm4947_vm5, %v5960_v50 }
 0xbde   :  { %5974 = shalt.err (!%p5971_p4)
}
 0xbdf   :  { %s5975_s30 = scalar_lea.hbm %s6192_s17, 32 }
 0xbe0   :  { %p5976_p5 = scmp.ne.s32.totalorder %s6192_s17, %s5975_s30  ;;  %p5979_p6 = scmp.lt.u32.totalorder %s5975_s30, %s6192_s17 }
 0xbe2   :  { %p5981_p7 = pnand %p5979_p6, %p5976_p5 }
 0xbe4   :  { %5984 = shalt.err (!%p5981_p7)
}
 0xbe5   :  { %4958 = dma.vmem_to_hbm [thread:$0]  %s4956_s28, 32, %s6192_s17, [#allocation3]  }
 0xbe6   :  { %5985 = dma.done.wait [#allocation3], 32  }
 0xbe7   :  { %5986 = vsyncadd [#allocation3], 4294967264 }
 0xbe8   :  { %4962 = vsyncpa [#allocation3], 1 }

</bundles_post_ra>
